<compile_context>
chip_gen: v7x
topology: tpu7x:2x2x1
jax: 0.10.0
libtpu: 0.0.40
codegen_flags: <defaults>
</compile_context>

<pallas_src>
import functools

import jax
import jax.numpy as jnp
from jax import lax
from jax.experimental import pallas as pl
from jax.experimental.pallas import tpu as pltpu


def _round_up(x, m):
    return (x + m - 1) // m * m


def _pick_tile(dim_p, desired, mult):
    """Largest tile <= desired that is a multiple of `mult` and divides dim_p
    (dim_p is already a multiple of mult)."""
    t = min(desired, dim_p)
    t -= t % mult
    t = max(t, mult)
    while dim_p % t != 0:
        t -= mult
    return t


def _block_spec(shape, index_map, *, buffer_count=None):
    """BlockSpec with optional explicit buffer count (Buffered(1) to
    single-buffer constant-index operands).  Falls back gracefully if the
    pipeline_mode kwarg is unavailable."""
    if buffer_count is None:
        return pl.BlockSpec(shape, index_map)
    try:
        return pl.BlockSpec(shape, index_map,
                            pipeline_mode=pl.Buffered(buffer_count))
    except TypeError:
        return pl.BlockSpec(shape, index_map)


# ----------------------------------------------------------------------------
# Kernel 1: generic tiled matmul + bias  (LSTM input projection and decoder).
#           out = cast(x) @ w_t + b   (f32 accumulation)
# ----------------------------------------------------------------------------
def _matmul_bias_kernel(x_ref, w_ref, b_ref, o_ref):
    x = x_ref[...]
    if x.dtype != w_ref.dtype:          # activations -> weight dtype (bf16 MXU)
        x = x.astype(w_ref.dtype)
    acc = jnp.dot(x, w_ref[...], preferred_element_type=jnp.float32)
    o_ref[...] = (acc + b_ref[...]).astype(o_ref.dtype)


def matmul_bias(x, w_t, b, *, tm=512, tn=1024, out_dtype=jnp.float32):
    """x: (M, K), w_t: (K, N), b: (1, N) f32  ->  (Mp, Np) out_dtype.

    Weight-varying axis (N) is the OUTER grid axis so each weight tile is read
    from HBM exactly once.  K stays whole.  Callers pre-pad N to a lane
    multiple at init; M is padded to 8 only if needed (never in this model).
    Output is returned padded; callers slice only what they need.
    """
    M, K = x.shape
    _, N = w_t.shape

    Mp = _round_up(M, 8)
    Np = _round_up(N, 128)
    if Mp != M:
        x = jnp.pad(x, ((0, Mp - M), (0, 0)))
    if Np != N:                            # fallback only; weights are pre-padded
        w_t = jnp.pad(w_t, ((0, 0), (0, Np - N)))
        b = jnp.pad(b, ((0, 0), (0, Np - N)))

    tm = _pick_tile(Mp, tm, 8)
    tn = _pick_tile(Np, tn, 128)

    x_item = jnp.dtype(x.dtype).itemsize
    w_item = jnp.dtype(w_t.dtype).itemsize
    o_item = jnp.dtype(out_dtype).itemsize

    def footprint(tm_, tn_):               # double-buffered VMEM footprint
        return 2 * (tm_ * K * x_item + K * tn_ * w_item
                    + tn_ * 4 + tm_ * tn_ * o_item)

    # Keep footprint well under v7x's 64 MiB VMEM.
    while footprint(tm, tn) > (44 << 20):
        if tn > 128 and (tn >= tm or tm <= 8):
            tn = _pick_tile(Np, max(tn // 2, 128), 128)
        elif tm > 8:
            tm = _pick_tile(Mp, max(tm // 2, 8), 8)
        else:
            break

    vmem_limit = int(min(max(footprint(tm, tn) + (4 << 20), 32 << 20), 60 << 20))
    grid = (Np // tn, Mp // tm)            # weights on the slow (outer) axis

    out = pl.pallas_call(
        _matmul_bias_kernel,
        out_shape=jax.ShapeDtypeStruct((Mp, Np), out_dtype),
        grid_spec=pltpu.PrefetchScalarGridSpec(
            num_scalar_prefetch=0,
            grid=grid,
            in_specs=[pl.BlockSpec((tm, K), lambda j, i: (i, 0)),
                      pl.BlockSpec((K, tn), lambda j, i: (0, j)),
                      pl.BlockSpec((1, tn), lambda j, i: (0, j))],
            out_specs=pl.BlockSpec((tm, tn), lambda j, i: (i, j)),
        ),
        compiler_params=pltpu.CompilerParams(
            dimension_semantics=("parallel", "parallel"),
            vmem_limit_bytes=vmem_limit),
        cost_estimate=pl.CostEstimate(
            flops=2 * Mp * K * Np,
            transcendentals=0,
            bytes_accessed=int(x_item * Mp * K + w_item * K * Np
                               + 4 * Np + o_item * Mp * Np)),
    )(x, w_t, b)
    return out                              # padded (Mp, Np)


# ----------------------------------------------------------------------------
# Kernel 2: LSTM recurrence over the sequence (input projection pre-computed).
# ----------------------------------------------------------------------------
def _lstm_recurrence_kernel(gx_ref, whh_ref, h0_ref, c0_ref,
                            y_ref, hN_ref, cN_ref,
                            h_scr, c_scr, *, seq, chunk, Hp, unroll):
    """One (batch-block, chunk) tile of one LSTM layer.

    gx_ref  : (chunk, Bb, 4*Hp)  precomputed x @ W_ih^T + (b_ih + b_hh)
    whh_ref : (Hp, 4*Hp)         transposed, gate-block padded W_hh (bf16)
    h0/c0   : (Bb, Hp)           initial state (used only when chunk-id == 0)
    y_ref   : (chunk, Bb, Hp)    hidden outputs
    hN/cN   : (Bb, Hp)           final state (valid after the last chunk)
    h_scr/c_scr : (Bb, Hp) VMEM  state carried across the "arbitrary" seq axis

    Gate bands [i | f | g | o] sit at Hp-aligned columns, so every slice below
    is whole-vreg and the full (Bb, 4*Hp) pre-activation is never live.
    """
    s = pl.program_id(1)

    @pl.when(s == 0)
    def _():
        h_scr[...] = h0_ref[...]
        c_scr[...] = c0_ref[...]

    mxu_dtype = whh_ref.dtype
    needs_mask = (seq % chunk) != 0
    base = s * chunk

    def step(t, carry):
        h, c = carry
        hm = h.astype(mxu_dtype)

        def gate(g):
            return (gx_ref[t, :, g * Hp:(g + 1) * Hp].astype(jnp.float32)
                    + jnp.dot(hm, whh_ref[:, g * Hp:(g + 1) * Hp],
                              preferred_element_type=jnp.float32))

        i_g = jax.nn.sigmoid(gate(0))
        f_g = jax.nn.sigmoid(gate(1))
        g_g = jnp.tanh(gate(2))
        o_g = jax.nn.sigmoid(gate(3))
        c_new = f_g * c + i_g * g_g
        h_new = o_g * jnp.tanh(c_new)
        if needs_mask:                       # only when seq % chunk != 0
            valid = (base + t) < seq
            h_new = jnp.where(valid, h_new, h)
            c_new = jnp.where(valid, c_new, c)
        y_ref[t] = h_new                     # unmasked lane-dense (Bb, Hp) store
        return (h_new, c_new)

    h_fin, c_fin = lax.fori_loop(0, chunk, step,
                                 (h_scr[...], c_scr[...]), unroll=unroll)
    h_scr[...] = h_fin
    c_scr[...] = c_fin
    hN_ref[...] = h_fin
    cN_ref[...] = c_fin


def lstm_recurrence(gx, whh_t, h0, c0, *, max_chunk=128):
    """gx: (seq, Bp, 4*Hp), whh_t: (Hp, 4*Hp), h0/c0: (Bp, Hp)."""
    seq, Bp, G = gx.shape
    Hp = whh_t.shape[0]

    # Megacore (v7x): split batch across a parallel axis when it is large.
    Bb = Bp // 2 if (Bp >= 16 and (Bp // 2) % 8 == 0) else Bp
    nb = Bp // Bb

    gx_item = jnp.dtype(gx.dtype).itemsize
    whh_item = jnp.dtype(whh_t.dtype).itemsize

    def vmem_need(chunk):
        return (Hp * G * whh_item                 # whh, single-buffered
                + 8 * Bb * Hp * 4                 # h0/c0/hN/cN/scratch
                + 2 * chunk * Bb * G * gx_item    # gx chunk (double-buffered)
                + 2 * chunk * Bb * Hp * 4)        # y chunk (double-buffered)

    chunk = max(1, min(max_chunk, seq))
    while chunk > 8 and vmem_need(chunk) > (40 << 20):   # fits v7x 64 MiB VMEM
        chunk = max(8, chunk // 2)
    n_chunks = pl.cdiv(seq, chunk)
    Sp = n_chunks * chunk
    if Sp != seq:
        gx = jnp.pad(gx, ((0, Sp - seq), (0, 0), (0, 0)))

    unroll = 8 if Hp <= 256 else (4 if Hp <= 512 else 2)  # vreg-pressure aware
    vmem_limit = int(min(max(vmem_need(chunk) + (8 << 20), 32 << 20), 60 << 20))

    kernel = functools.partial(_lstm_recurrence_kernel,
                               seq=seq, chunk=chunk, Hp=Hp, unroll=unroll)
    y, h_n, c_n = pl.pallas_call(
        kernel,
        out_shape=(jax.ShapeDtypeStruct((Sp, Bp, Hp), jnp.float32),
                   jax.ShapeDtypeStruct((Bp, Hp), jnp.float32),
                   jax.ShapeDtypeStruct((Bp, Hp), jnp.float32)),
        grid_spec=pltpu.PrefetchScalarGridSpec(
            num_scalar_prefetch=0,
            grid=(nb, n_chunks),
            in_specs=[
                pl.BlockSpec((chunk, Bb, G), lambda b, s: (s, b, 0)),
                _block_spec((Hp, G), lambda b, s: (0, 0), buffer_count=1),
                _block_spec((Bb, Hp), lambda b, s: (b, 0), buffer_count=1),
                _block_spec((Bb, Hp), lambda b, s: (b, 0), buffer_count=1),
            ],
            out_specs=(pl.BlockSpec((chunk, Bb, Hp), lambda b, s: (s, b, 0)),
                       pl.BlockSpec((Bb, Hp), lambda b, s: (b, 0)),
                       pl.BlockSpec((Bb, Hp), lambda b, s: (b, 0))),
            scratch_shapes=[pltpu.VMEM((Bb, Hp), jnp.float32),
                            pltpu.VMEM((Bb, Hp), jnp.float32)]),
        compiler_params=pltpu.CompilerParams(
            dimension_semantics=("parallel", "arbitrary"),
            vmem_limit_bytes=vmem_limit),
        cost_estimate=pl.CostEstimate(
            flops=2 * Sp * Bp * Hp * G + 10 * Sp * Bp * Hp,
            transcendentals=5 * Sp * Bp * Hp,
            bytes_accessed=int(gx_item * Sp * Bp * G + whh_item * Hp * G
                               + 4 * Sp * Bp * Hp)),
    )(gx, whh_t, h0, c0)
    return y[:seq], h_n, c_n


# ----------------------------------------------------------------------------
# Parameter construction (mirrors RNNModel.init_weights / nn.LSTM defaults),
# pre-transposed, gate-block padded, and pre-cast to the MXU dtype.
# ----------------------------------------------------------------------------
def _gate_pad_transpose(w, H, Hp, in_dim_p):
    """PyTorch (4H, in_dim) [i,f,g,o] -> (in_dim_p, 4*Hp), gate blocks at
    Hp-aligned columns; extra rows/lanes are zero."""
    in_dim = w.shape[1]
    out = jnp.zeros((in_dim_p, 4 * Hp), w.dtype)
    for g in range(4):
        out = out.at[:in_dim, g * Hp: g * Hp + H].set(w[g * H:(g + 1) * H, :].T)
    return out


def _gate_pad_bias(b, H, Hp):
    out = jnp.zeros((1, 4 * Hp), b.dtype)
    for g in range(4):
        out = out.at[0, g * Hp: g * Hp + H].set(b[g * H:(g + 1) * H])
    return out


def init_params(key, ntoken, ninp, nhid, nlayers, *, matmul_dtype=jnp.bfloat16):
    """Uniform init mirroring RNNModel.init_weights / nn.LSTM defaults.
    Weights are stored in `matmul_dtype` (bf16 by default) for the MXU;
    biases and the embedding stay f32; accumulation is always f32."""
    md = matmul_dtype or jnp.float32
    Hp = _round_up(nhid, 128)
    Ntok_p = _round_up(ntoken, 128)        # decoder pre-padded to lane multiple
    initrange = 0.1
    stdv = 1.0 / float(nhid) ** 0.5
    keys = jax.random.split(key, 2 + 4 * nlayers)
    params = {}
    # Encoder / decoder: uniform(-0.1, 0.1), decoder bias zero.
    params["encoder_w"] = jax.random.uniform(
        keys[0], (ntoken, ninp), jnp.float32, -initrange, initrange)
    dec_w = jax.random.uniform(
        keys[1], (ntoken, nhid), jnp.float32, -initrange, initrange)
    dec_w_t = jnp.zeros((Hp, Ntok_p), jnp.float32).at[:nhid, :ntoken].set(dec_w.T)
    params["decoder_w_t"] = dec_w_t.astype(md)            # (Hp, Ntok_p)
    params["decoder_b"] = jnp.zeros((1, Ntok_p), jnp.float32)
    # LSTM layers: uniform(-1/sqrt(nhid), 1/sqrt(nhid)).
    wih_t, whh_t, bias = [], [], []
    for l in range(nlayers):
        in_dim = ninp if l == 0 else nhid
        in_dim_p = ninp if l == 0 else Hp     # layer >0 consumes padded hidden
        k_ih, k_hh, k_bih, k_bhh = keys[2 + 4 * l: 2 + 4 * (l + 1)]
        w_ih = jax.random.uniform(k_ih, (4 * nhid, in_dim), jnp.float32, -stdv, stdv)
        w_hh = jax.random.uniform(k_hh, (4 * nhid, nhid), jnp.float32, -stdv, stdv)
        b_ih = jax.random.uniform(k_bih, (4 * nhid,), jnp.float32, -stdv, stdv)
        b_hh = jax.random.uniform(k_bhh, (4 * nhid,), jnp.float32, -stdv, stdv)
        wih_t.append(_gate_pad_transpose(w_ih, nhid, Hp, in_dim_p).astype(md))
        whh_t.append(_gate_pad_transpose(w_hh, nhid, Hp, Hp).astype(md))
        bias.append(_gate_pad_bias(b_ih + b_hh, nhid, Hp))   # stays f32
    params["lstm_wih_t"] = wih_t
    params["lstm_whh_t"] = whh_t
    params["lstm_b"] = bias
    return params


def _pad_state(s, Bp, Hp):
    b, h = s.shape
    if b == Bp and h == Hp:
        return s
    return jnp.pad(s, ((0, Bp - b), (0, Hp - h)))


# ----------------------------------------------------------------------------
# Forward pass (RNNModel.forward equivalent).
# ----------------------------------------------------------------------------
@functools.partial(jax.jit, static_argnames=("nlayers",))
def rnn_model_forward(tokens, h0, c0, params, *, nlayers):
    """tokens: (seq, batch) int32; h0, c0: (nlayers, batch, nhid) f32.
    Returns (decoded (seq, batch, ntoken), (h_n, c_n))."""
    seq, batch = tokens.shape
    nhid = h0.shape[-1]
    Hp = params["lstm_whh_t"][0].shape[0]
    ntoken = params["encoder_w"].shape[0]
    Bp = _round_up(batch, 8)
    gx_dtype = params["lstm_whh_t"][0].dtype   # bf16 gx halves its HBM round trip

    # Embedding gather (glue); Dropout -> identity (eval mode).
    emb = jnp.take(params["encoder_w"], tokens, axis=0)    # (seq, batch, ninp)
    x = emb
    if Bp != batch:
        x = jnp.pad(x, ((0, 0), (0, Bp - batch), (0, 0)))  # zero batch padding

    h_finals, c_finals = [], []
    for l in range(nlayers):
        in_dim = x.shape[-1]
        # Hoisted input projection + bias: one big MXU matmul per layer.
        gx = matmul_bias(x.reshape(seq * Bp, in_dim),
                         params["lstm_wih_t"][l], params["lstm_b"][l],
                         out_dtype=gx_dtype)
        gx = gx.reshape(seq, Bp, 4 * Hp)
        h0l = _pad_state(h0[l], Bp, Hp)
        c0l = _pad_state(c0[l], Bp, Hp)
        y, h_n, c_n = lstm_recurrence(gx, params["lstm_whh_t"][l], h0l, c0l)
        h_finals.append(h_n[:batch, :nhid])
        c_finals.append(c_n[:batch, :nhid])
        x = y                                              # (seq, Bp, Hp) padded

    # Decoder: tiled matmul, logits stay lane-padded until the final slice.
    logits = matmul_bias(x.reshape(seq * Bp, Hp),
                         params["decoder_w_t"], params["decoder_b"],
                         out_dtype=jnp.float32)
    Ntok_p = logits.shape[1]
    decoded = logits.reshape(seq, Bp, Ntok_p)[:, :batch, :ntoken]
    return decoded, (jnp.stack(h_finals, axis=0), jnp.stack(c_finals, axis=0))


# ----------------------------------------------------------------------------
# Demo
# ----------------------------------------------------------------------------
if __name__ == "__main__":
    ntoken, ninp, nhid, nlayers = 64, 32, 32, 2
    seq, batch = 8, 2

    key = jax.random.PRNGKey(0)
    k_params, k_tokens = jax.random.split(key)

    params = init_params(k_params, ntoken, ninp, nhid, nlayers)
    tokens = jax.random.randint(k_tokens, (seq, batch), 0, ntoken, dtype=jnp.int32)
    h0 = jnp.zeros((nlayers, batch, nhid), jnp.float32)    # RNNModel.init_hidden
    c0 = jnp.zeros((nlayers, batch, nhid), jnp.float32)

    decoded, (h_n, c_n) = rnn_model_forward(tokens, h0, c0, params, nlayers=nlayers)
    jax.block_until_ready((decoded, h_n, c_n))

    assert decoded.shape == (seq, batch, ntoken)
    assert h_n.shape == (nlayers, batch, nhid)
    assert c_n.shape == (nlayers, batch, nhid)
    assert bool(jnp.all(jnp.isfinite(decoded)))
    assert bool(jnp.all(jnp.isfinite(h_n))) and bool(jnp.all(jnp.isfinite(c_n)))
    # TODO(synk): vocab/Dictionary handling, dropout masks (train mode),
    # .pt checkpoint loading, and extract() surprisal/entropy utilities from
    # the original module have no kernel equivalent.
    print("KERNEL_OK")
</pallas_src>

<mosaic_0001>
module attributes {stable_mosaic.version = 11 : i64} {
  func.func @_matmul_bias_kernel(%arg0: i32, %arg1: i32, %arg2: memref<64x32xf32, #tpu.memory_space<vmem>>, %arg3: memref<32x512xbf16, #tpu.memory_space<vmem>>, %arg4: memref<1x512xf32, #tpu.memory_space<vmem>>, %arg5: memref<64x512xbf16, #tpu.memory_space<vmem>>) attributes {dimension_semantics = [#tpu.dimension_semantics<parallel>, #tpu.dimension_semantics<parallel>], iteration_bounds = array<i64: 1, 1>, scalar_prefetch = 0 : i64, scratch_operands = 0 : i64, tpu.core_type = #tpu.core_type<tc>, window_params = [{transform_indices = @transform_0, window_bounds = array<i64: 64, 32>}, {transform_indices = @transform_1, window_bounds = array<i64: 32, 512>}, {transform_indices = @transform_2, window_bounds = array<i64: 1, 512>}, {transform_indices = @transform_3, window_bounds = array<i64: 64, 512>}]} {
    %c0 = arith.constant 0 : index
    %c0_0 = arith.constant 0 : index
    %0 = vector.load %arg2[%c0, %c0_0] : memref<64x32xf32, #tpu.memory_space<vmem>>, vector<64x32xf32>
    %1 = arith.truncf %0 : vector<64x32xf32> to vector<64x32xbf16>
    %c0_1 = arith.constant 0 : index
    %c0_2 = arith.constant 0 : index
    %2 = vector.load %arg3[%c0_1, %c0_2] : memref<32x512xbf16, #tpu.memory_space<vmem>>, vector<32x512xbf16>
    %cst = arith.constant dense<0.000000e+00> : vector<64x512xf32>
    %3 = tpu.matmul %1, %2, %cst {dimension_numbers = #tpu.dot_dimension_numbers<[1], [0], [0], [1], [0, 0, 1, 1], [], []>} : vector<64x32xbf16>, vector<32x512xbf16>, vector<64x512xf32> -> vector<64x512xf32>
    %c0_3 = arith.constant 0 : index
    %c0_4 = arith.constant 0 : index
    %4 = vector.load %arg4[%c0_3, %c0_4] : memref<1x512xf32, #tpu.memory_space<vmem>>, vector<1x512xf32>
    %5 = vector.broadcast %4 : vector<1x512xf32> to vector<64x512xf32>
    %6 = arith.addf %3, %5 : vector<64x512xf32>
    %7 = arith.truncf %6 : vector<64x512xf32> to vector<64x512xbf16>
    %c0_5 = arith.constant 0 : index
    %c0_6 = arith.constant 0 : index
    %8 = vector.load %arg5[%c0_5, %c0_6] : memref<64x512xbf16, #tpu.memory_space<vmem>>, vector<64x512xbf16>
    tpu.vector_store %arg5[%c0_5, %c0_6], %7 {strides = array<i32>} : memref<64x512xbf16, #tpu.memory_space<vmem>>, vector<64x512xbf16>,
    return
  }
  func.func @transform_0(%arg0: i32, %arg1: i32) -> (i32, i32) {
    %c0_i32 = arith.constant 0 : i32
    %c0_i32_0 = arith.constant 0 : i32
    return %arg1, %c0_i32 : i32, i32
  }
  func.func @transform_1(%arg0: i32, %arg1: i32) -> (i32, i32) {
    %c0_i32 = arith.constant 0 : i32
    %c0_i32_0 = arith.constant 0 : i32
    return %c0_i32, %arg0 : i32, i32
  }
  func.func @transform_2(%arg0: i32, %arg1: i32) -> (i32, i32) {
    %c0_i32 = arith.constant 0 : i32
    %c0_i32_0 = arith.constant 0 : i32
    return %c0_i32, %arg0 : i32, i32
  }
  func.func @transform_3(%arg0: i32, %arg1: i32) -> (i32, i32) {
    %c0_i32 = arith.constant 0 : i32
    return %arg1, %arg0 : i32, i32
  }
}

module attributes {stable_mosaic.version = 11 : i64} {
  func.func @_matmul_bias_kernel(%arg0: i32, %arg1: i32, %arg2: memref<64x128xf32, #tpu.memory_space<vmem>>, %arg3: memref<128x128xbf16, #tpu.memory_space<vmem>>, %arg4: memref<1x128xf32, #tpu.memory_space<vmem>>, %arg5: memref<64x128xf32, #tpu.memory_space<vmem>>) attributes {dimension_semantics = [#tpu.dimension_semantics<parallel>, #tpu.dimension_semantics<parallel>], iteration_bounds = array<i64: 1, 1>, scalar_prefetch = 0 : i64, scratch_operands = 0 : i64, tpu.core_type = #tpu.core_type<tc>, window_params = [{transform_indices = @transform_0, window_bounds = array<i64: 64, 128>}, {transform_indices = @transform_1, window_bounds = array<i64: 128, 128>}, {transform_indices = @transform_2, window_bounds = array<i64: 1, 128>}, {transform_indices = @transform_3, window_bounds = array<i64: 64, 128>}]} {
    %c0 = arith.constant 0 : index
    %c0_0 = arith.constant 0 : index
    %0 = vector.load %arg2[%c0, %c0_0] : memref<64x128xf32, #tpu.memory_space<vmem>>, vector<64x128xf32>
    %1 = arith.truncf %0 : vector<64x128xf32> to vector<64x128xbf16>
    %c0_1 = arith.constant 0 : index
    %c0_2 = arith.constant 0 : index
    %2 = vector.load %arg3[%c0_1, %c0_2] : memref<128x128xbf16, #tpu.memory_space<vmem>>, vector<128x128xbf16>
    %cst = arith.constant dense<0.000000e+00> : vector<64x128xf32>
    %3 = tpu.matmul %1, %2, %cst {dimension_numbers = #tpu.dot_dimension_numbers<[1], [0], [0], [1], [0, 0, 1, 1], [], []>} : vector<64x128xbf16>, vector<128x128xbf16>, vector<64x128xf32> -> vector<64x128xf32>
    %c0_3 = arith.constant 0 : index
    %c0_4 = arith.constant 0 : index
    %4 = vector.load %arg4[%c0_3, %c0_4] : memref<1x128xf32, #tpu.memory_space<vmem>>, vector<1x128xf32>
    %5 = vector.broadcast %4 : vector<1x128xf32> to vector<64x128xf32>
    %6 = arith.addf %3, %5 : vector<64x128xf32>
    %c0_5 = arith.constant 0 : index
    %c0_6 = arith.constant 0 : index
    %7 = vector.load %arg5[%c0_5, %c0_6] : memref<64x128xf32, #tpu.memory_space<vmem>>, vector<64x128xf32>
    tpu.vector_store %arg5[%c0_5, %c0_6], %6 {strides = array<i32>} : memref<64x128xf32, #tpu.memory_space<vmem>>, vector<64x128xf32>,
    return
  }
  func.func @transform_0(%arg0: i32, %arg1: i32) -> (i32, i32) {
    %c0_i32 = arith.constant 0 : i32
    %c0_i32_0 = arith.constant 0 : i32
    return %arg1, %c0_i32 : i32, i32
  }
  func.func @transform_1(%arg0: i32, %arg1: i32) -> (i32, i32) {
    %c0_i32 = arith.constant 0 : i32
    %c0_i32_0 = arith.constant 0 : i32
    return %c0_i32, %arg0 : i32, i32
  }
  func.func @transform_2(%arg0: i32, %arg1: i32) -> (i32, i32) {
    %c0_i32 = arith.constant 0 : i32
    %c0_i32_0 = arith.constant 0 : i32
    return %c0_i32, %arg0 : i32, i32
  }
  func.func @transform_3(%arg0: i32, %arg1: i32) -> (i32, i32) {
    %c0_i32 = arith.constant 0 : i32
    return %arg1, %arg0 : i32, i32
  }
}

module attributes {stable_mosaic.version = 11 : i64} {
  func.func @_matmul_bias_kernel(%arg0: i32, %arg1: i32, %arg2: memref<64x128xf32, #tpu.memory_space<vmem>>, %arg3: memref<128x512xbf16, #tpu.memory_space<vmem>>, %arg4: memref<1x512xf32, #tpu.memory_space<vmem>>, %arg5: memref<64x512xbf16, #tpu.memory_space<vmem>>) attributes {dimension_semantics = [#tpu.dimension_semantics<parallel>, #tpu.dimension_semantics<parallel>], iteration_bounds = array<i64: 1, 1>, scalar_prefetch = 0 : i64, scratch_operands = 0 : i64, tpu.core_type = #tpu.core_type<tc>, window_params = [{transform_indices = @transform_0, window_bounds = array<i64: 64, 128>}, {transform_indices = @transform_1, window_bounds = array<i64: 128, 512>}, {transform_indices = @transform_2, window_bounds = array<i64: 1, 512>}, {transform_indices = @transform_3, window_bounds = array<i64: 64, 512>}]} {
    %c0 = arith.constant 0 : index
    %c0_0 = arith.constant 0 : index
    %0 = vector.load %arg2[%c0, %c0_0] : memref<64x128xf32, #tpu.memory_space<vmem>>, vector<64x128xf32>
    %1 = arith.truncf %0 : vector<64x128xf32> to vector<64x128xbf16>
    %c0_1 = arith.constant 0 : index
    %c0_2 = arith.constant 0 : index
    %2 = vector.load %arg3[%c0_1, %c0_2] : memref<128x512xbf16, #tpu.memory_space<vmem>>, vector<128x512xbf16>
    %cst = arith.constant dense<0.000000e+00> : vector<64x512xf32>
    %3 = tpu.matmul %1, %2, %cst {dimension_numbers = #tpu.dot_dimension_numbers<[1], [0], [0], [1], [0, 0, 1, 1], [], []>} : vector<64x128xbf16>, vector<128x512xbf16>, vector<64x512xf32> -> vector<64x512xf32>
    %c0_3 = arith.constant 0 : index
    %c0_4 = arith.constant 0 : index
    %4 = vector.load %arg4[%c0_3, %c0_4] : memref<1x512xf32, #tpu.memory_space<vmem>>, vector<1x512xf32>
    %5 = vector.broadcast %4 : vector<1x512xf32> to vector<64x512xf32>
    %6 = arith.addf %3, %5 : vector<64x512xf32>
    %7 = arith.truncf %6 : vector<64x512xf32> to vector<64x512xbf16>
    %c0_5 = arith.constant 0 : index
    %c0_6 = arith.constant 0 : index
    %8 = vector.load %arg5[%c0_5, %c0_6] : memref<64x512xbf16, #tpu.memory_space<vmem>>, vector<64x512xbf16>
    tpu.vector_store %arg5[%c0_5, %c0_6], %7 {strides = array<i32>} : memref<64x512xbf16, #tpu.memory_space<vmem>>, vector<64x512xbf16>,
    return
  }
  func.func @transform_0(%arg0: i32, %arg1: i32) -> (i32, i32) {
    %c0_i32 = arith.constant 0 : i32
    %c0_i32_0 = arith.constant 0 : i32
    return %arg1, %c0_i32 : i32, i32
  }
  func.func @transform_1(%arg0: i32, %arg1: i32) -> (i32, i32) {
    %c0_i32 = arith.constant 0 : i32
    %c0_i32_0 = arith.constant 0 : i32
    return %c0_i32, %arg0 : i32, i32
  }
  func.func @transform_2(%arg0: i32, %arg1: i32) -> (i32, i32) {
    %c0_i32 = arith.constant 0 : i32
    %c0_i32_0 = arith.constant 0 : i32
    return %c0_i32, %arg0 : i32, i32
  }
  func.func @transform_3(%arg0: i32, %arg1: i32) -> (i32, i32) {
    %c0_i32 = arith.constant 0 : i32
    return %arg1, %arg0 : i32, i32
  }
}

module attributes {stable_mosaic.version = 11 : i64} {
  func.func @_lstm_recurrence_kernel(%arg0: i32, %arg1: i32, %arg2: memref<8x8x512xbf16, #tpu.memory_space<vmem>>, %arg3: memref<128x512xbf16, #tpu.memory_space<vmem>>, %arg4: memref<8x128xf32, #tpu.memory_space<vmem>>, %arg5: memref<8x128xf32, #tpu.memory_space<vmem>>, %arg6: memref<8x8x128xf32, #tpu.memory_space<vmem>>, %arg7: memref<8x128xf32, #tpu.memory_space<vmem>>, %arg8: memref<8x128xf32, #tpu.memory_space<vmem>>, %arg9: memref<8x128xf32, #tpu.memory_space<vmem>>, %arg10: memref<8x128xf32, #tpu.memory_space<vmem>>) attributes {dimension_semantics = [#tpu.dimension_semantics<parallel>, #tpu.dimension_semantics<arbitrary>], iteration_bounds = array<i64: 1, 1>, scalar_prefetch = 0 : i64, scratch_operands = 2 : i64, tpu.core_type = #tpu.core_type<tc>, window_params = [{transform_indices = @transform_0, window_bounds = array<i64: 8, 8, 512>}, {pipeline_mode = #tpu.pipeline_mode<synchronous>, transform_indices = @transform_1, window_bounds = array<i64: 128, 512>}, {pipeline_mode = #tpu.pipeline_mode<synchronous>, transform_indices = @transform_2, window_bounds = array<i64: 8, 128>}, {pipeline_mode = #tpu.pipeline_mode<synchronous>, transform_indices = @transform_3, window_bounds = array<i64: 8, 128>}, {transform_indices = @transform_4, window_bounds = array<i64: 8, 8, 128>}, {transform_indices = @transform_5, window_bounds = array<i64: 8, 128>}, {transform_indices = @transform_6, window_bounds = array<i64: 8, 128>}]} {
    %c0_i32 = arith.constant 0 : i32
    %0 = arith.cmpi eq, %arg1, %c0_i32 : i32
    %1 = arith.extui %0 : i1 to i32
    %c0_i32_0 = arith.constant 0 : i32
    %2 = arith.cmpi ne, %1, %c0_i32_0 : i32
    scf.if %2 {
      %c0_209 = arith.constant 0 : index
      %c0_210 = arith.constant 0 : index
      %441 = vector.load %arg4[%c0_209, %c0_210] : memref<8x128xf32, #tpu.memory_space<vmem>>, vector<8x128xf32>
      %c0_211 = arith.constant 0 : index
      %c0_212 = arith.constant 0 : index
      %442 = vector.load %arg9[%c0_211, %c0_212] : memref<8x128xf32, #tpu.memory_space<vmem>>, vector<8x128xf32>
      tpu.vector_store %arg9[%c0_211, %c0_212], %441 {strides = array<i32>} : memref<8x128xf32, #tpu.memory_space<vmem>>, vector<8x128xf32>,
      %c0_213 = arith.constant 0 : index
      %c0_214 = arith.constant 0 : index
      %443 = vector.load %arg5[%c0_213, %c0_214] : memref<8x128xf32, #tpu.memory_space<vmem>>, vector<8x128xf32>
      %c0_215 = arith.constant 0 : index
      %c0_216 = arith.constant 0 : index
      %444 = vector.load %arg10[%c0_215, %c0_216] : memref<8x128xf32, #tpu.memory_space<vmem>>, vector<8x128xf32>
      tpu.vector_store %arg10[%c0_215, %c0_216], %443 {strides = array<i32>} : memref<8x128xf32, #tpu.memory_space<vmem>>, vector<8x128xf32>,
    } else {
    }
    %c0 = arith.constant 0 : index
    %c0_1 = arith.constant 0 : index
    %3 = vector.load %arg9[%c0, %c0_1] : memref<8x128xf32, #tpu.memory_space<vmem>>, vector<8x128xf32>
    %c0_2 = arith.constant 0 : index
    %c0_3 = arith.constant 0 : index
    %4 = vector.load %arg10[%c0_2, %c0_3] : memref<8x128xf32, #tpu.memory_space<vmem>>, vector<8x128xf32>
    %c0_i32_4 = arith.constant 0 : i32
    %5 = arith.truncf %3 : vector<8x128xf32> to vector<8x128xbf16>
    %6 = arith.index_cast %c0_i32_4 : i32 to index
    %c0_5 = arith.constant 0 : index
    %c0_6 = arith.constant 0 : index
    %7 = vector.load %arg2[%6, %c0_5, %c0_6] : memref<8x8x512xbf16, #tpu.memory_space<vmem>>, vector<1x8x128xbf16>
    %8 = vector.shape_cast %7 : vector<1x8x128xbf16> to vector<8x128xbf16>
    %9 = arith.extf %8 : vector<8x128xbf16> to vector<8x128xf32>
    %c0_7 = arith.constant 0 : index
    %c0_8 = arith.constant 0 : index
    %10 = vector.load %arg3[%c0_7, %c0_8] : memref<128x512xbf16, #tpu.memory_space<vmem>>, vector<128x128xbf16>
    %cst = arith.constant dense<0.000000e+00> : vector<8x128xf32>
    %11 = tpu.matmul %5, %10, %cst {dimension_numbers = #tpu.dot_dimension_numbers<[1], [0], [0], [1], [0, 0, 1, 1], [], []>} : vector<8x128xbf16>, vector<128x128xbf16>, vector<8x128xf32> -> vector<8x128xf32>
    %12 = arith.addf %9, %11 : vector<8x128xf32>
    %13 = arith.negf %12 : vector<8x128xf32>
    %14 = math.exp %13 : vector<8x128xf32>
    %cst_9 = arith.constant 1.000000e+00 : f32
    %15 = vector.broadcast %cst_9 : f32 to vector<8x128xf32>
    %16 = arith.addf %15, %14 : vector<8x128xf32>
    %17 = arith.divf %15, %16 : vector<8x128xf32>
    %18 = arith.index_cast %c0_i32_4 : i32 to index
    %c0_10 = arith.constant 0 : index
    %c128 = arith.constant 128 : index
    %19 = vector.load %arg2[%18, %c0_10, %c128] : memref<8x8x512xbf16, #tpu.memory_space<vmem>>, vector<1x8x128xbf16>
    %20 = vector.shape_cast %19 : vector<1x8x128xbf16> to vector<8x128xbf16>
    %21 = arith.extf %20 : vector<8x128xbf16> to vector<8x128xf32>
    %c0_11 = arith.constant 0 : index
    %c128_12 = arith.constant 128 : index
    %22 = vector.load %arg3[%c0_11, %c128_12] : memref<128x512xbf16, #tpu.memory_space<vmem>>, vector<128x128xbf16>
    %cst_13 = arith.constant dense<0.000000e+00> : vector<8x128xf32>
    %23 = tpu.matmul %5, %22, %cst_13 {dimension_numbers = #tpu.dot_dimension_numbers<[1], [0], [0], [1], [0, 0, 1, 1], [], []>} : vector<8x128xbf16>, vector<128x128xbf16>, vector<8x128xf32> -> vector<8x128xf32>
    %24 = arith.addf %21, %23 : vector<8x128xf32>
    %25 = arith.negf %24 : vector<8x128xf32>
    %26 = math.exp %25 : vector<8x128xf32>
    %cst_14 = arith.constant 1.000000e+00 : f32
    %27 = vector.broadcast %cst_14 : f32 to vector<8x128xf32>
    %28 = arith.addf %27, %26 : vector<8x128xf32>
    %29 = arith.divf %27, %28 : vector<8x128xf32>
    %30 = arith.index_cast %c0_i32_4 : i32 to index
    %c0_15 = arith.constant 0 : index
    %c256 = arith.constant 256 : index
    %31 = vector.load %arg2[%30, %c0_15, %c256] : memref<8x8x512xbf16, #tpu.memory_space<vmem>>, vector<1x8x128xbf16>
    %32 = vector.shape_cast %31 : vector<1x8x128xbf16> to vector<8x128xbf16>
    %33 = arith.extf %32 : vector<8x128xbf16> to vector<8x128xf32>
    %c0_16 = arith.constant 0 : index
    %c256_17 = arith.constant 256 : index
    %34 = vector.load %arg3[%c0_16, %c256_17] : memref<128x512xbf16, #tpu.memory_space<vmem>>, vector<128x128xbf16>
    %cst_18 = arith.constant dense<0.000000e+00> : vector<8x128xf32>
    %35 = tpu.matmul %5, %34, %cst_18 {dimension_numbers = #tpu.dot_dimension_numbers<[1], [0], [0], [1], [0, 0, 1, 1], [], []>} : vector<8x128xbf16>, vector<128x128xbf16>, vector<8x128xf32> -> vector<8x128xf32>
    %36 = arith.addf %33, %35 : vector<8x128xf32>
    %37 = math.tanh %36 : vector<8x128xf32>
    %38 = arith.index_cast %c0_i32_4 : i32 to index
    %c0_19 = arith.constant 0 : index
    %c384 = arith.constant 384 : index
    %39 = vector.load %arg2[%38, %c0_19, %c384] : memref<8x8x512xbf16, #tpu.memory_space<vmem>>, vector<1x8x128xbf16>
    %40 = vector.shape_cast %39 : vector<1x8x128xbf16> to vector<8x128xbf16>
    %41 = arith.extf %40 : vector<8x128xbf16> to vector<8x128xf32>
    %c0_20 = arith.constant 0 : index
    %c384_21 = arith.constant 384 : index
    %42 = vector.load %arg3[%c0_20, %c384_21] : memref<128x512xbf16, #tpu.memory_space<vmem>>, vector<128x128xbf16>
    %cst_22 = arith.constant dense<0.000000e+00> : vector<8x128xf32>
    %43 = tpu.matmul %5, %42, %cst_22 {dimension_numbers = #tpu.dot_dimension_numbers<[1], [0], [0], [1], [0, 0, 1, 1], [], []>} : vector<8x128xbf16>, vector<128x128xbf16>, vector<8x128xf32> -> vector<8x128xf32>
    %44 = arith.addf %41, %43 : vector<8x128xf32>
    %45 = arith.negf %44 : vector<8x128xf32>
    %46 = math.exp %45 : vector<8x128xf32>
    %cst_23 = arith.constant 1.000000e+00 : f32
    %47 = vector.broadcast %cst_23 : f32 to vector<8x128xf32>
    %48 = arith.addf %47, %46 : vector<8x128xf32>
    %49 = arith.divf %47, %48 : vector<8x128xf32>
    %50 = arith.mulf %29, %4 : vector<8x128xf32>
    %51 = arith.mulf %17, %37 : vector<8x128xf32>
    %52 = arith.addf %50, %51 : vector<8x128xf32>
    %53 = math.tanh %52 : vector<8x128xf32>
    %54 = arith.mulf %49, %53 : vector<8x128xf32>
    %55 = arith.index_cast %c0_i32_4 : i32 to index
    %c0_24 = arith.constant 0 : index
    %c0_25 = arith.constant 0 : index
    %56 = vector.load %arg6[%55, %c0_24, %c0_25] : memref<8x8x128xf32, #tpu.memory_space<vmem>>, vector<1x8x128xf32>
    %57 = vector.shape_cast %56 : vector<1x8x128xf32> to vector<8x128xf32>
    %58 = vector.shape_cast %54 : vector<8x128xf32> to vector<1x8x128xf32>
    tpu.vector_store %arg6[%55, %c0_24, %c0_25], %58 {strides = array<i32>} : memref<8x8x128xf32, #tpu.memory_space<vmem>>, vector<1x8x128xf32>,
    %c1_i32 = arith.constant 1 : i32
    %59 = arith.truncf %54 : vector<8x128xf32> to vector<8x128xbf16>
    %60 = arith.index_cast %c1_i32 : i32 to index
    %c0_26 = arith.constant 0 : index
    %c0_27 = arith.constant 0 : index
    %61 = vector.load %arg2[%60, %c0_26, %c0_27] : memref<8x8x512xbf16, #tpu.memory_space<vmem>>, vector<1x8x128xbf16>
    %62 = vector.shape_cast %61 : vector<1x8x128xbf16> to vector<8x128xbf16>
    %63 = arith.extf %62 : vector<8x128xbf16> to vector<8x128xf32>
    %c0_28 = arith.constant 0 : index
    %c0_29 = arith.constant 0 : index
    %64 = vector.load %arg3[%c0_28, %c0_29] : memref<128x512xbf16, #tpu.memory_space<vmem>>, vector<128x128xbf16>
    %cst_30 = arith.constant dense<0.000000e+00> : vector<8x128xf32>
    %65 = tpu.matmul %59, %64, %cst_30 {dimension_numbers = #tpu.dot_dimension_numbers<[1], [0], [0], [1], [0, 0, 1, 1], [], []>} : vector<8x128xbf16>, vector<128x128xbf16>, vector<8x128xf32> -> vector<8x128xf32>
    %66 = arith.addf %63, %65 : vector<8x128xf32>
    %67 = arith.negf %66 : vector<8x128xf32>
    %68 = math.exp %67 : vector<8x128xf32>
    %cst_31 = arith.constant 1.000000e+00 : f32
    %69 = vector.broadcast %cst_31 : f32 to vector<8x128xf32>
    %70 = arith.addf %69, %68 : vector<8x128xf32>
    %71 = arith.divf %69, %70 : vector<8x128xf32>
    %72 = arith.index_cast %c1_i32 : i32 to index
    %c0_32 = arith.constant 0 : index
    %c128_33 = arith.constant 128 : index
    %73 = vector.load %arg2[%72, %c0_32, %c128_33] : memref<8x8x512xbf16, #tpu.memory_space<vmem>>, vector<1x8x128xbf16>
    %74 = vector.shape_cast %73 : vector<1x8x128xbf16> to vector<8x128xbf16>
    %75 = arith.extf %74 : vector<8x128xbf16> to vector<8x128xf32>
    %c0_34 = arith.constant 0 : index
    %c128_35 = arith.constant 128 : index
    %76 = vector.load %arg3[%c0_34, %c128_35] : memref<128x512xbf16, #tpu.memory_space<vmem>>, vector<128x128xbf16>
    %cst_36 = arith.constant dense<0.000000e+00> : vector<8x128xf32>
    %77 = tpu.matmul %59, %76, %cst_36 {dimension_numbers = #tpu.dot_dimension_numbers<[1], [0], [0], [1], [0, 0, 1, 1], [], []>} : vector<8x128xbf16>, vector<128x128xbf16>, vector<8x128xf32> -> vector<8x128xf32>
    %78 = arith.addf %75, %77 : vector<8x128xf32>
    %79 = arith.negf %78 : vector<8x128xf32>
    %80 = math.exp %79 : vector<8x128xf32>
    %cst_37 = arith.constant 1.000000e+00 : f32
    %81 = vector.broadcast %cst_37 : f32 to vector<8x128xf32>
    %82 = arith.addf %81, %80 : vector<8x128xf32>
    %83 = arith.divf %81, %82 : vector<8x128xf32>
    %84 = arith.index_cast %c1_i32 : i32 to index
    %c0_38 = arith.constant 0 : index
    %c256_39 = arith.constant 256 : index
    %85 = vector.load %arg2[%84, %c0_38, %c256_39] : memref<8x8x512xbf16, #tpu.memory_space<vmem>>, vector<1x8x128xbf16>
    %86 = vector.shape_cast %85 : vector<1x8x128xbf16> to vector<8x128xbf16>
    %87 = arith.extf %86 : vector<8x128xbf16> to vector<8x128xf32>
    %c0_40 = arith.constant 0 : index
    %c256_41 = arith.constant 256 : index
    %88 = vector.load %arg3[%c0_40, %c256_41] : memref<128x512xbf16, #tpu.memory_space<vmem>>, vector<128x128xbf16>
    %cst_42 = arith.constant dense<0.000000e+00> : vector<8x128xf32>
    %89 = tpu.matmul %59, %88, %cst_42 {dimension_numbers = #tpu.dot_dimension_numbers<[1], [0], [0], [1], [0, 0, 1, 1], [], []>} : vector<8x128xbf16>, vector<128x128xbf16>, vector<8x128xf32> -> vector<8x128xf32>
    %90 = arith.addf %87, %89 : vector<8x128xf32>
    %91 = math.tanh %90 : vector<8x128xf32>
    %92 = arith.index_cast %c1_i32 : i32 to index
    %c0_43 = arith.constant 0 : index
    %c384_44 = arith.constant 384 : index
    %93 = vector.load %arg2[%92, %c0_43, %c384_44] : memref<8x8x512xbf16, #tpu.memory_space<vmem>>, vector<1x8x128xbf16>
    %94 = vector.shape_cast %93 : vector<1x8x128xbf16> to vector<8x128xbf16>
    %95 = arith.extf %94 : vector<8x128xbf16> to vector<8x128xf32>
    %c0_45 = arith.constant 0 : index
    %c384_46 = arith.constant 384 : index
    %96 = vector.load %arg3[%c0_45, %c384_46] : memref<128x512xbf16, #tpu.memory_space<vmem>>, vector<128x128xbf16>
    %cst_47 = arith.constant dense<0.000000e+00> : vector<8x128xf32>
    %97 = tpu.matmul %59, %96, %cst_47 {dimension_numbers = #tpu.dot_dimension_numbers<[1], [0], [0], [1], [0, 0, 1, 1], [], []>} : vector<8x128xbf16>, vector<128x128xbf16>, vector<8x128xf32> -> vector<8x128xf32>
    %98 = arith.addf %95, %97 : vector<8x128xf32>
    %99 = arith.negf %98 : vector<8x128xf32>
    %100 = math.exp %99 : vector<8x128xf32>
    %cst_48 = arith.constant 1.000000e+00 : f32
    %101 = vector.broadcast %cst_48 : f32 to vector<8x128xf32>
    %102 = arith.addf %101, %100 : vector<8x128xf32>
    %103 = arith.divf %101, %102 : vector<8x128xf32>
    %104 = arith.mulf %83, %52 : vector<8x128xf32>
    %105 = arith.mulf %71, %91 : vector<8x128xf32>
    %106 = arith.addf %104, %105 : vector<8x128xf32>
    %107 = math.tanh %106 : vector<8x128xf32>
    %108 = arith.mulf %103, %107 : vector<8x128xf32>
    %109 = arith.index_cast %c1_i32 : i32 to index
    %c0_49 = arith.constant 0 : index
    %c0_50 = arith.constant 0 : index
    %110 = vector.load %arg6[%109, %c0_49, %c0_50] : memref<8x8x128xf32, #tpu.memory_space<vmem>>, vector<1x8x128xf32>
    %111 = vector.shape_cast %110 : vector<1x8x128xf32> to vector<8x128xf32>
    %112 = vector.shape_cast %108 : vector<8x128xf32> to vector<1x8x128xf32>
    tpu.vector_store %arg6[%109, %c0_49, %c0_50], %112 {strides = array<i32>} : memref<8x8x128xf32, #tpu.memory_space<vmem>>, vector<1x8x128xf32>,
    %c2_i32 = arith.constant 2 : i32
    %113 = arith.truncf %108 : vector<8x128xf32> to vector<8x128xbf16>
    %114 = arith.index_cast %c2_i32 : i32 to index
    %c0_51 = arith.constant 0 : index
    %c0_52 = arith.constant 0 : index
    %115 = vector.load %arg2[%114, %c0_51, %c0_52] : memref<8x8x512xbf16, #tpu.memory_space<vmem>>, vector<1x8x128xbf16>
    %116 = vector.shape_cast %115 : vector<1x8x128xbf16> to vector<8x128xbf16>
    %117 = arith.extf %116 : vector<8x128xbf16> to vector<8x128xf32>
    %c0_53 = arith.constant 0 : index
    %c0_54 = arith.constant 0 : index
    %118 = vector.load %arg3[%c0_53, %c0_54] : memref<128x512xbf16, #tpu.memory_space<vmem>>, vector<128x128xbf16>
    %cst_55 = arith.constant dense<0.000000e+00> : vector<8x128xf32>
    %119 = tpu.matmul %113, %118, %cst_55 {dimension_numbers = #tpu.dot_dimension_numbers<[1], [0], [0], [1], [0, 0, 1, 1], [], []>} : vector<8x128xbf16>, vector<128x128xbf16>, vector<8x128xf32> -> vector<8x128xf32>
    %120 = arith.addf %117, %119 : vector<8x128xf32>
    %121 = arith.negf %120 : vector<8x128xf32>
    %122 = math.exp %121 : vector<8x128xf32>
    %cst_56 = arith.constant 1.000000e+00 : f32
    %123 = vector.broadcast %cst_56 : f32 to vector<8x128xf32>
    %124 = arith.addf %123, %122 : vector<8x128xf32>
    %125 = arith.divf %123, %124 : vector<8x128xf32>
    %126 = arith.index_cast %c2_i32 : i32 to index
    %c0_57 = arith.constant 0 : index
    %c128_58 = arith.constant 128 : index
    %127 = vector.load %arg2[%126, %c0_57, %c128_58] : memref<8x8x512xbf16, #tpu.memory_space<vmem>>, vector<1x8x128xbf16>
    %128 = vector.shape_cast %127 : vector<1x8x128xbf16> to vector<8x128xbf16>
    %129 = arith.extf %128 : vector<8x128xbf16> to vector<8x128xf32>
    %c0_59 = arith.constant 0 : index
    %c128_60 = arith.constant 128 : index
    %130 = vector.load %arg3[%c0_59, %c128_60] : memref<128x512xbf16, #tpu.memory_space<vmem>>, vector<128x128xbf16>
    %cst_61 = arith.constant dense<0.000000e+00> : vector<8x128xf32>
    %131 = tpu.matmul %113, %130, %cst_61 {dimension_numbers = #tpu.dot_dimension_numbers<[1], [0], [0], [1], [0, 0, 1, 1], [], []>} : vector<8x128xbf16>, vector<128x128xbf16>, vector<8x128xf32> -> vector<8x128xf32>
    %132 = arith.addf %129, %131 : vector<8x128xf32>
    %133 = arith.negf %132 : vector<8x128xf32>
    %134 = math.exp %133 : vector<8x128xf32>
    %cst_62 = arith.constant 1.000000e+00 : f32
    %135 = vector.broadcast %cst_62 : f32 to vector<8x128xf32>
    %136 = arith.addf %135, %134 : vector<8x128xf32>
    %137 = arith.divf %135, %136 : vector<8x128xf32>
    %138 = arith.index_cast %c2_i32 : i32 to index
    %c0_63 = arith.constant 0 : index
    %c256_64 = arith.constant 256 : index
    %139 = vector.load %arg2[%138, %c0_63, %c256_64] : memref<8x8x512xbf16, #tpu.memory_space<vmem>>, vector<1x8x128xbf16>
    %140 = vector.shape_cast %139 : vector<1x8x128xbf16> to vector<8x128xbf16>
    %141 = arith.extf %140 : vector<8x128xbf16> to vector<8x128xf32>
    %c0_65 = arith.constant 0 : index
    %c256_66 = arith.constant 256 : index
    %142 = vector.load %arg3[%c0_65, %c256_66] : memref<128x512xbf16, #tpu.memory_space<vmem>>, vector<128x128xbf16>
    %cst_67 = arith.constant dense<0.000000e+00> : vector<8x128xf32>
    %143 = tpu.matmul %113, %142, %cst_67 {dimension_numbers = #tpu.dot_dimension_numbers<[1], [0], [0], [1], [0, 0, 1, 1], [], []>} : vector<8x128xbf16>, vector<128x128xbf16>, vector<8x128xf32> -> vector<8x128xf32>
    %144 = arith.addf %141, %143 : vector<8x128xf32>
    %145 = math.tanh %144 : vector<8x128xf32>
    %146 = arith.index_cast %c2_i32 : i32 to index
    %c0_68 = arith.constant 0 : index
    %c384_69 = arith.constant 384 : index
    %147 = vector.load %arg2[%146, %c0_68, %c384_69] : memref<8x8x512xbf16, #tpu.memory_space<vmem>>, vector<1x8x128xbf16>
    %148 = vector.shape_cast %147 : vector<1x8x128xbf16> to vector<8x128xbf16>
    %149 = arith.extf %148 : vector<8x128xbf16> to vector<8x128xf32>
    %c0_70 = arith.constant 0 : index
    %c384_71 = arith.constant 384 : index
    %150 = vector.load %arg3[%c0_70, %c384_71] : memref<128x512xbf16, #tpu.memory_space<vmem>>, vector<128x128xbf16>
    %cst_72 = arith.constant dense<0.000000e+00> : vector<8x128xf32>
    %151 = tpu.matmul %113, %150, %cst_72 {dimension_numbers = #tpu.dot_dimension_numbers<[1], [0], [0], [1], [0, 0, 1, 1], [], []>} : vector<8x128xbf16>, vector<128x128xbf16>, vector<8x128xf32> -> vector<8x128xf32>
    %152 = arith.addf %149, %151 : vector<8x128xf32>
    %153 = arith.negf %152 : vector<8x128xf32>
    %154 = math.exp %153 : vector<8x128xf32>
    %cst_73 = arith.constant 1.000000e+00 : f32
    %155 = vector.broadcast %cst_73 : f32 to vector<8x128xf32>
    %156 = arith.addf %155, %154 : vector<8x128xf32>
    %157 = arith.divf %155, %156 : vector<8x128xf32>
    %158 = arith.mulf %137, %106 : vector<8x128xf32>
    %159 = arith.mulf %125, %145 : vector<8x128xf32>
    %160 = arith.addf %158, %159 : vector<8x128xf32>
    %161 = math.tanh %160 : vector<8x128xf32>
    %162 = arith.mulf %157, %161 : vector<8x128xf32>
    %163 = arith.index_cast %c2_i32 : i32 to index
    %c0_74 = arith.constant 0 : index
    %c0_75 = arith.constant 0 : index
    %164 = vector.load %arg6[%163, %c0_74, %c0_75] : memref<8x8x128xf32, #tpu.memory_space<vmem>>, vector<1x8x128xf32>
    %165 = vector.shape_cast %164 : vector<1x8x128xf32> to vector<8x128xf32>
    %166 = vector.shape_cast %162 : vector<8x128xf32> to vector<1x8x128xf32>
    tpu.vector_store %arg6[%163, %c0_74, %c0_75], %166 {strides = array<i32>} : memref<8x8x128xf32, #tpu.memory_space<vmem>>, vector<1x8x128xf32>,
    %c3_i32 = arith.constant 3 : i32
    %167 = arith.truncf %162 : vector<8x128xf32> to vector<8x128xbf16>
    %168 = arith.index_cast %c3_i32 : i32 to index
    %c0_76 = arith.constant 0 : index
    %c0_77 = arith.constant 0 : index
    %169 = vector.load %arg2[%168, %c0_76, %c0_77] : memref<8x8x512xbf16, #tpu.memory_space<vmem>>, vector<1x8x128xbf16>
    %170 = vector.shape_cast %169 : vector<1x8x128xbf16> to vector<8x128xbf16>
    %171 = arith.extf %170 : vector<8x128xbf16> to vector<8x128xf32>
    %c0_78 = arith.constant 0 : index
    %c0_79 = arith.constant 0 : index
    %172 = vector.load %arg3[%c0_78, %c0_79] : memref<128x512xbf16, #tpu.memory_space<vmem>>, vector<128x128xbf16>
    %cst_80 = arith.constant dense<0.000000e+00> : vector<8x128xf32>
    %173 = tpu.matmul %167, %172, %cst_80 {dimension_numbers = #tpu.dot_dimension_numbers<[1], [0], [0], [1], [0, 0, 1, 1], [], []>} : vector<8x128xbf16>, vector<128x128xbf16>, vector<8x128xf32> -> vector<8x128xf32>
    %174 = arith.addf %171, %173 : vector<8x128xf32>
    %175 = arith.negf %174 : vector<8x128xf32>
    %176 = math.exp %175 : vector<8x128xf32>
    %cst_81 = arith.constant 1.000000e+00 : f32
    %177 = vector.broadcast %cst_81 : f32 to vector<8x128xf32>
    %178 = arith.addf %177, %176 : vector<8x128xf32>
    %179 = arith.divf %177, %178 : vector<8x128xf32>
    %180 = arith.index_cast %c3_i32 : i32 to index
    %c0_82 = arith.constant 0 : index
    %c128_83 = arith.constant 128 : index
    %181 = vector.load %arg2[%180, %c0_82, %c128_83] : memref<8x8x512xbf16, #tpu.memory_space<vmem>>, vector<1x8x128xbf16>
    %182 = vector.shape_cast %181 : vector<1x8x128xbf16> to vector<8x128xbf16>
    %183 = arith.extf %182 : vector<8x128xbf16> to vector<8x128xf32>
    %c0_84 = arith.constant 0 : index
    %c128_85 = arith.constant 128 : index
    %184 = vector.load %arg3[%c0_84, %c128_85] : memref<128x512xbf16, #tpu.memory_space<vmem>>, vector<128x128xbf16>
    %cst_86 = arith.constant dense<0.000000e+00> : vector<8x128xf32>
    %185 = tpu.matmul %167, %184, %cst_86 {dimension_numbers = #tpu.dot_dimension_numbers<[1], [0], [0], [1], [0, 0, 1, 1], [], []>} : vector<8x128xbf16>, vector<128x128xbf16>, vector<8x128xf32> -> vector<8x128xf32>
    %186 = arith.addf %183, %185 : vector<8x128xf32>
    %187 = arith.negf %186 : vector<8x128xf32>
    %188 = math.exp %187 : vector<8x128xf32>
    %cst_87 = arith.constant 1.000000e+00 : f32
    %189 = vector.broadcast %cst_87 : f32 to vector<8x128xf32>
    %190 = arith.addf %189, %188 : vector<8x128xf32>
    %191 = arith.divf %189, %190 : vector<8x128xf32>
    %192 = arith.index_cast %c3_i32 : i32 to index
    %c0_88 = arith.constant 0 : index
    %c256_89 = arith.constant 256 : index
    %193 = vector.load %arg2[%192, %c0_88, %c256_89] : memref<8x8x512xbf16, #tpu.memory_space<vmem>>, vector<1x8x128xbf16>
    %194 = vector.shape_cast %193 : vector<1x8x128xbf16> to vector<8x128xbf16>
    %195 = arith.extf %194 : vector<8x128xbf16> to vector<8x128xf32>
    %c0_90 = arith.constant 0 : index
    %c256_91 = arith.constant 256 : index
    %196 = vector.load %arg3[%c0_90, %c256_91] : memref<128x512xbf16, #tpu.memory_space<vmem>>, vector<128x128xbf16>
    %cst_92 = arith.constant dense<0.000000e+00> : vector<8x128xf32>
    %197 = tpu.matmul %167, %196, %cst_92 {dimension_numbers = #tpu.dot_dimension_numbers<[1], [0], [0], [1], [0, 0, 1, 1], [], []>} : vector<8x128xbf16>, vector<128x128xbf16>, vector<8x128xf32> -> vector<8x128xf32>
    %198 = arith.addf %195, %197 : vector<8x128xf32>
    %199 = math.tanh %198 : vector<8x128xf32>
    %200 = arith.index_cast %c3_i32 : i32 to index
    %c0_93 = arith.constant 0 : index
    %c384_94 = arith.constant 384 : index
    %201 = vector.load %arg2[%200, %c0_93, %c384_94] : memref<8x8x512xbf16, #tpu.memory_space<vmem>>, vector<1x8x128xbf16>
    %202 = vector.shape_cast %201 : vector<1x8x128xbf16> to vector<8x128xbf16>
    %203 = arith.extf %202 : vector<8x128xbf16> to vector<8x128xf32>
    %c0_95 = arith.constant 0 : index
    %c384_96 = arith.constant 384 : index
    %204 = vector.load %arg3[%c0_95, %c384_96] : memref<128x512xbf16, #tpu.memory_space<vmem>>, vector<128x128xbf16>
    %cst_97 = arith.constant dense<0.000000e+00> : vector<8x128xf32>
    %205 = tpu.matmul %167, %204, %cst_97 {dimension_numbers = #tpu.dot_dimension_numbers<[1], [0], [0], [1], [0, 0, 1, 1], [], []>} : vector<8x128xbf16>, vector<128x128xbf16>, vector<8x128xf32> -> vector<8x128xf32>
    %206 = arith.addf %203, %205 : vector<8x128xf32>
    %207 = arith.negf %206 : vector<8x128xf32>
    %208 = math.exp %207 : vector<8x128xf32>
    %cst_98 = arith.constant 1.000000e+00 : f32
    %209 = vector.broadcast %cst_98 : f32 to vector<8x128xf32>
    %210 = arith.addf %209, %208 : vector<8x128xf32>
    %211 = arith.divf %209, %210 : vector<8x128xf32>
    %212 = arith.mulf %191, %160 : vector<8x128xf32>
    %213 = arith.mulf %179, %199 : vector<8x128xf32>
    %214 = arith.addf %212, %213 : vector<8x128xf32>
    %215 = math.tanh %214 : vector<8x128xf32>
    %216 = arith.mulf %211, %215 : vector<8x128xf32>
    %217 = arith.index_cast %c3_i32 : i32 to index
    %c0_99 = arith.constant 0 : index
    %c0_100 = arith.constant 0 : index
    %218 = vector.load %arg6[%217, %c0_99, %c0_100] : memref<8x8x128xf32, #tpu.memory_space<vmem>>, vector<1x8x128xf32>
    %219 = vector.shape_cast %218 : vector<1x8x128xf32> to vector<8x128xf32>
    %220 = vector.shape_cast %216 : vector<8x128xf32> to vector<1x8x128xf32>
    tpu.vector_store %arg6[%217, %c0_99, %c0_100], %220 {strides = array<i32>} : memref<8x8x128xf32, #tpu.memory_space<vmem>>, vector<1x8x128xf32>,
    %c4_i32 = arith.constant 4 : i32
    %221 = arith.truncf %216 : vector<8x128xf32> to vector<8x128xbf16>
    %222 = arith.index_cast %c4_i32 : i32 to index
    %c0_101 = arith.constant 0 : index
    %c0_102 = arith.constant 0 : index
    %223 = vector.load %arg2[%222, %c0_101, %c0_102] : memref<8x8x512xbf16, #tpu.memory_space<vmem>>, vector<1x8x128xbf16>
    %224 = vector.shape_cast %223 : vector<1x8x128xbf16> to vector<8x128xbf16>
    %225 = arith.extf %224 : vector<8x128xbf16> to vector<8x128xf32>
    %c0_103 = arith.constant 0 : index
    %c0_104 = arith.constant 0 : index
    %226 = vector.load %arg3[%c0_103, %c0_104] : memref<128x512xbf16, #tpu.memory_space<vmem>>, vector<128x128xbf16>
    %cst_105 = arith.constant dense<0.000000e+00> : vector<8x128xf32>
    %227 = tpu.matmul %221, %226, %cst_105 {dimension_numbers = #tpu.dot_dimension_numbers<[1], [0], [0], [1], [0, 0, 1, 1], [], []>} : vector<8x128xbf16>, vector<128x128xbf16>, vector<8x128xf32> -> vector<8x128xf32>
    %228 = arith.addf %225, %227 : vector<8x128xf32>
    %229 = arith.negf %228 : vector<8x128xf32>
    %230 = math.exp %229 : vector<8x128xf32>
    %cst_106 = arith.constant 1.000000e+00 : f32
    %231 = vector.broadcast %cst_106 : f32 to vector<8x128xf32>
    %232 = arith.addf %231, %230 : vector<8x128xf32>
    %233 = arith.divf %231, %232 : vector<8x128xf32>
    %234 = arith.index_cast %c4_i32 : i32 to index
    %c0_107 = arith.constant 0 : index
    %c128_108 = arith.constant 128 : index
    %235 = vector.load %arg2[%234, %c0_107, %c128_108] : memref<8x8x512xbf16, #tpu.memory_space<vmem>>, vector<1x8x128xbf16>
    %236 = vector.shape_cast %235 : vector<1x8x128xbf16> to vector<8x128xbf16>
    %237 = arith.extf %236 : vector<8x128xbf16> to vector<8x128xf32>
    %c0_109 = arith.constant 0 : index
    %c128_110 = arith.constant 128 : index
    %238 = vector.load %arg3[%c0_109, %c128_110] : memref<128x512xbf16, #tpu.memory_space<vmem>>, vector<128x128xbf16>
    %cst_111 = arith.constant dense<0.000000e+00> : vector<8x128xf32>
    %239 = tpu.matmul %221, %238, %cst_111 {dimension_numbers = #tpu.dot_dimension_numbers<[1], [0], [0], [1], [0, 0, 1, 1], [], []>} : vector<8x128xbf16>, vector<128x128xbf16>, vector<8x128xf32> -> vector<8x128xf32>
    %240 = arith.addf %237, %239 : vector<8x128xf32>
    %241 = arith.negf %240 : vector<8x128xf32>
    %242 = math.exp %241 : vector<8x128xf32>
    %cst_112 = arith.constant 1.000000e+00 : f32
    %243 = vector.broadcast %cst_112 : f32 to vector<8x128xf32>
    %244 = arith.addf %243, %242 : vector<8x128xf32>
    %245 = arith.divf %243, %244 : vector<8x128xf32>
    %246 = arith.index_cast %c4_i32 : i32 to index
    %c0_113 = arith.constant 0 : index
    %c256_114 = arith.constant 256 : index
    %247 = vector.load %arg2[%246, %c0_113, %c256_114] : memref<8x8x512xbf16, #tpu.memory_space<vmem>>, vector<1x8x128xbf16>
    %248 = vector.shape_cast %247 : vector<1x8x128xbf16> to vector<8x128xbf16>
    %249 = arith.extf %248 : vector<8x128xbf16> to vector<8x128xf32>
    %c0_115 = arith.constant 0 : index
    %c256_116 = arith.constant 256 : index
    %250 = vector.load %arg3[%c0_115, %c256_116] : memref<128x512xbf16, #tpu.memory_space<vmem>>, vector<128x128xbf16>
    %cst_117 = arith.constant dense<0.000000e+00> : vector<8x128xf32>
    %251 = tpu.matmul %221, %250, %cst_117 {dimension_numbers = #tpu.dot_dimension_numbers<[1], [0], [0], [1], [0, 0, 1, 1], [], []>} : vector<8x128xbf16>, vector<128x128xbf16>, vector<8x128xf32> -> vector<8x128xf32>
    %252 = arith.addf %249, %251 : vector<8x128xf32>
    %253 = math.tanh %252 : vector<8x128xf32>
    %254 = arith.index_cast %c4_i32 : i32 to index
    %c0_118 = arith.constant 0 : index
    %c384_119 = arith.constant 384 : index
    %255 = vector.load %arg2[%254, %c0_118, %c384_119] : memref<8x8x512xbf16, #tpu.memory_space<vmem>>, vector<1x8x128xbf16>
    %256 = vector.shape_cast %255 : vector<1x8x128xbf16> to vector<8x128xbf16>
    %257 = arith.extf %256 : vector<8x128xbf16> to vector<8x128xf32>
    %c0_120 = arith.constant 0 : index
    %c384_121 = arith.constant 384 : index
    %258 = vector.load %arg3[%c0_120, %c384_121] : memref<128x512xbf16, #tpu.memory_space<vmem>>, vector<128x128xbf16>
    %cst_122 = arith.constant dense<0.000000e+00> : vector<8x128xf32>
    %259 = tpu.matmul %221, %258, %cst_122 {dimension_numbers = #tpu.dot_dimension_numbers<[1], [0], [0], [1], [0, 0, 1, 1], [], []>} : vector<8x128xbf16>, vector<128x128xbf16>, vector<8x128xf32> -> vector<8x128xf32>
    %260 = arith.addf %257, %259 : vector<8x128xf32>
    %261 = arith.negf %260 : vector<8x128xf32>
    %262 = math.exp %261 : vector<8x128xf32>
    %cst_123 = arith.constant 1.000000e+00 : f32
    %263 = vector.broadcast %cst_123 : f32 to vector<8x128xf32>
    %264 = arith.addf %263, %262 : vector<8x128xf32>
    %265 = arith.divf %263, %264 : vector<8x128xf32>
    %266 = arith.mulf %245, %214 : vector<8x128xf32>
    %267 = arith.mulf %233, %253 : vector<8x128xf32>
    %268 = arith.addf %266, %267 : vector<8x128xf32>
    %269 = math.tanh %268 : vector<8x128xf32>
    %270 = arith.mulf %265, %269 : vector<8x128xf32>
    %271 = arith.index_cast %c4_i32 : i32 to index
    %c0_124 = arith.constant 0 : index
    %c0_125 = arith.constant 0 : index
    %272 = vector.load %arg6[%271, %c0_124, %c0_125] : memref<8x8x128xf32, #tpu.memory_space<vmem>>, vector<1x8x128xf32>
    %273 = vector.shape_cast %272 : vector<1x8x128xf32> to vector<8x128xf32>
    %274 = vector.shape_cast %270 : vector<8x128xf32> to vector<1x8x128xf32>
    tpu.vector_store %arg6[%271, %c0_124, %c0_125], %274 {strides = array<i32>} : memref<8x8x128xf32, #tpu.memory_space<vmem>>, vector<1x8x128xf32>,
    %c5_i32 = arith.constant 5 : i32
    %275 = arith.truncf %270 : vector<8x128xf32> to vector<8x128xbf16>
    %276 = arith.index_cast %c5_i32 : i32 to index
    %c0_126 = arith.constant 0 : index
    %c0_127 = arith.constant 0 : index
    %277 = vector.load %arg2[%276, %c0_126, %c0_127] : memref<8x8x512xbf16, #tpu.memory_space<vmem>>, vector<1x8x128xbf16>
    %278 = vector.shape_cast %277 : vector<1x8x128xbf16> to vector<8x128xbf16>
    %279 = arith.extf %278 : vector<8x128xbf16> to vector<8x128xf32>
    %c0_128 = arith.constant 0 : index
    %c0_129 = arith.constant 0 : index
    %280 = vector.load %arg3[%c0_128, %c0_129] : memref<128x512xbf16, #tpu.memory_space<vmem>>, vector<128x128xbf16>
    %cst_130 = arith.constant dense<0.000000e+00> : vector<8x128xf32>
    %281 = tpu.matmul %275, %280, %cst_130 {dimension_numbers = #tpu.dot_dimension_numbers<[1], [0], [0], [1], [0, 0, 1, 1], [], []>} : vector<8x128xbf16>, vector<128x128xbf16>, vector<8x128xf32> -> vector<8x128xf32>
    %282 = arith.addf %279, %281 : vector<8x128xf32>
    %283 = arith.negf %282 : vector<8x128xf32>
    %284 = math.exp %283 : vector<8x128xf32>
    %cst_131 = arith.constant 1.000000e+00 : f32
    %285 = vector.broadcast %cst_131 : f32 to vector<8x128xf32>
    %286 = arith.addf %285, %284 : vector<8x128xf32>
    %287 = arith.divf %285, %286 : vector<8x128xf32>
    %288 = arith.index_cast %c5_i32 : i32 to index
    %c0_132 = arith.constant 0 : index
    %c128_133 = arith.constant 128 : index
    %289 = vector.load %arg2[%288, %c0_132, %c128_133] : memref<8x8x512xbf16, #tpu.memory_space<vmem>>, vector<1x8x128xbf16>
    %290 = vector.shape_cast %289 : vector<1x8x128xbf16> to vector<8x128xbf16>
    %291 = arith.extf %290 : vector<8x128xbf16> to vector<8x128xf32>
    %c0_134 = arith.constant 0 : index
    %c128_135 = arith.constant 128 : index
    %292 = vector.load %arg3[%c0_134, %c128_135] : memref<128x512xbf16, #tpu.memory_space<vmem>>, vector<128x128xbf16>
    %cst_136 = arith.constant dense<0.000000e+00> : vector<8x128xf32>
    %293 = tpu.matmul %275, %292, %cst_136 {dimension_numbers = #tpu.dot_dimension_numbers<[1], [0], [0], [1], [0, 0, 1, 1], [], []>} : vector<8x128xbf16>, vector<128x128xbf16>, vector<8x128xf32> -> vector<8x128xf32>
    %294 = arith.addf %291, %293 : vector<8x128xf32>
    %295 = arith.negf %294 : vector<8x128xf32>
    %296 = math.exp %295 : vector<8x128xf32>
    %cst_137 = arith.constant 1.000000e+00 : f32
    %297 = vector.broadcast %cst_137 : f32 to vector<8x128xf32>
    %298 = arith.addf %297, %296 : vector<8x128xf32>
    %299 = arith.divf %297, %298 : vector<8x128xf32>
    %300 = arith.index_cast %c5_i32 : i32 to index
    %c0_138 = arith.constant 0 : index
    %c256_139 = arith.constant 256 : index
    %301 = vector.load %arg2[%300, %c0_138, %c256_139] : memref<8x8x512xbf16, #tpu.memory_space<vmem>>, vector<1x8x128xbf16>
    %302 = vector.shape_cast %301 : vector<1x8x128xbf16> to vector<8x128xbf16>
    %303 = arith.extf %302 : vector<8x128xbf16> to vector<8x128xf32>
    %c0_140 = arith.constant 0 : index
    %c256_141 = arith.constant 256 : index
    %304 = vector.load %arg3[%c0_140, %c256_141] : memref<128x512xbf16, #tpu.memory_space<vmem>>, vector<128x128xbf16>
    %cst_142 = arith.constant dense<0.000000e+00> : vector<8x128xf32>
    %305 = tpu.matmul %275, %304, %cst_142 {dimension_numbers = #tpu.dot_dimension_numbers<[1], [0], [0], [1], [0, 0, 1, 1], [], []>} : vector<8x128xbf16>, vector<128x128xbf16>, vector<8x128xf32> -> vector<8x128xf32>
    %306 = arith.addf %303, %305 : vector<8x128xf32>
    %307 = math.tanh %306 : vector<8x128xf32>
    %308 = arith.index_cast %c5_i32 : i32 to index
    %c0_143 = arith.constant 0 : index
    %c384_144 = arith.constant 384 : index
    %309 = vector.load %arg2[%308, %c0_143, %c384_144] : memref<8x8x512xbf16, #tpu.memory_space<vmem>>, vector<1x8x128xbf16>
    %310 = vector.shape_cast %309 : vector<1x8x128xbf16> to vector<8x128xbf16>
    %311 = arith.extf %310 : vector<8x128xbf16> to vector<8x128xf32>
    %c0_145 = arith.constant 0 : index
    %c384_146 = arith.constant 384 : index
    %312 = vector.load %arg3[%c0_145, %c384_146] : memref<128x512xbf16, #tpu.memory_space<vmem>>, vector<128x128xbf16>
    %cst_147 = arith.constant dense<0.000000e+00> : vector<8x128xf32>
    %313 = tpu.matmul %275, %312, %cst_147 {dimension_numbers = #tpu.dot_dimension_numbers<[1], [0], [0], [1], [0, 0, 1, 1], [], []>} : vector<8x128xbf16>, vector<128x128xbf16>, vector<8x128xf32> -> vector<8x128xf32>
    %314 = arith.addf %311, %313 : vector<8x128xf32>
    %315 = arith.negf %314 : vector<8x128xf32>
    %316 = math.exp %315 : vector<8x128xf32>
    %cst_148 = arith.constant 1.000000e+00 : f32
    %317 = vector.broadcast %cst_148 : f32 to vector<8x128xf32>
    %318 = arith.addf %317, %316 : vector<8x128xf32>
    %319 = arith.divf %317, %318 : vector<8x128xf32>
    %320 = arith.mulf %299, %268 : vector<8x128xf32>
    %321 = arith.mulf %287, %307 : vector<8x128xf32>
    %322 = arith.addf %320, %321 : vector<8x128xf32>
    %323 = math.tanh %322 : vector<8x128xf32>
    %324 = arith.mulf %319, %323 : vector<8x128xf32>
    %325 = arith.index_cast %c5_i32 : i32 to index
    %c0_149 = arith.constant 0 : index
    %c0_150 = arith.constant 0 : index
    %326 = vector.load %arg6[%325, %c0_149, %c0_150] : memref<8x8x128xf32, #tpu.memory_space<vmem>>, vector<1x8x128xf32>
    %327 = vector.shape_cast %326 : vector<1x8x128xf32> to vector<8x128xf32>
    %328 = vector.shape_cast %324 : vector<8x128xf32> to vector<1x8x128xf32>
    tpu.vector_store %arg6[%325, %c0_149, %c0_150], %328 {strides = array<i32>} : memref<8x8x128xf32, #tpu.memory_space<vmem>>, vector<1x8x128xf32>,
    %c6_i32 = arith.constant 6 : i32
    %329 = arith.truncf %324 : vector<8x128xf32> to vector<8x128xbf16>
    %330 = arith.index_cast %c6_i32 : i32 to index
    %c0_151 = arith.constant 0 : index
    %c0_152 = arith.constant 0 : index
    %331 = vector.load %arg2[%330, %c0_151, %c0_152] : memref<8x8x512xbf16, #tpu.memory_space<vmem>>, vector<1x8x128xbf16>
    %332 = vector.shape_cast %331 : vector<1x8x128xbf16> to vector<8x128xbf16>
    %333 = arith.extf %332 : vector<8x128xbf16> to vector<8x128xf32>
    %c0_153 = arith.constant 0 : index
    %c0_154 = arith.constant 0 : index
    %334 = vector.load %arg3[%c0_153, %c0_154] : memref<128x512xbf16, #tpu.memory_space<vmem>>, vector<128x128xbf16>
    %cst_155 = arith.constant dense<0.000000e+00> : vector<8x128xf32>
    %335 = tpu.matmul %329, %334, %cst_155 {dimension_numbers = #tpu.dot_dimension_numbers<[1], [0], [0], [1], [0, 0, 1, 1], [], []>} : vector<8x128xbf16>, vector<128x128xbf16>, vector<8x128xf32> -> vector<8x128xf32>
    %336 = arith.addf %333, %335 : vector<8x128xf32>
    %337 = arith.negf %336 : vector<8x128xf32>
    %338 = math.exp %337 : vector<8x128xf32>
    %cst_156 = arith.constant 1.000000e+00 : f32
    %339 = vector.broadcast %cst_156 : f32 to vector<8x128xf32>
    %340 = arith.addf %339, %338 : vector<8x128xf32>
    %341 = arith.divf %339, %340 : vector<8x128xf32>
    %342 = arith.index_cast %c6_i32 : i32 to index
    %c0_157 = arith.constant 0 : index
    %c128_158 = arith.constant 128 : index
    %343 = vector.load %arg2[%342, %c0_157, %c128_158] : memref<8x8x512xbf16, #tpu.memory_space<vmem>>, vector<1x8x128xbf16>
    %344 = vector.shape_cast %343 : vector<1x8x128xbf16> to vector<8x128xbf16>
    %345 = arith.extf %344 : vector<8x128xbf16> to vector<8x128xf32>
    %c0_159 = arith.constant 0 : index
    %c128_160 = arith.constant 128 : index
    %346 = vector.load %arg3[%c0_159, %c128_160] : memref<128x512xbf16, #tpu.memory_space<vmem>>, vector<128x128xbf16>
    %cst_161 = arith.constant dense<0.000000e+00> : vector<8x128xf32>
    %347 = tpu.matmul %329, %346, %cst_161 {dimension_numbers = #tpu.dot_dimension_numbers<[1], [0], [0], [1], [0, 0, 1, 1], [], []>} : vector<8x128xbf16>, vector<128x128xbf16>, vector<8x128xf32> -> vector<8x128xf32>
    %348 = arith.addf %345, %347 : vector<8x128xf32>
    %349 = arith.negf %348 : vector<8x128xf32>
    %350 = math.exp %349 : vector<8x128xf32>
    %cst_162 = arith.constant 1.000000e+00 : f32
    %351 = vector.broadcast %cst_162 : f32 to vector<8x128xf32>
    %352 = arith.addf %351, %350 : vector<8x128xf32>
    %353 = arith.divf %351, %352 : vector<8x128xf32>
    %354 = arith.index_cast %c6_i32 : i32 to index
    %c0_163 = arith.constant 0 : index
    %c256_164 = arith.constant 256 : index
    %355 = vector.load %arg2[%354, %c0_163, %c256_164] : memref<8x8x512xbf16, #tpu.memory_space<vmem>>, vector<1x8x128xbf16>
    %356 = vector.shape_cast %355 : vector<1x8x128xbf16> to vector<8x128xbf16>
    %357 = arith.extf %356 : vector<8x128xbf16> to vector<8x128xf32>
    %c0_165 = arith.constant 0 : index
    %c256_166 = arith.constant 256 : index
    %358 = vector.load %arg3[%c0_165, %c256_166] : memref<128x512xbf16, #tpu.memory_space<vmem>>, vector<128x128xbf16>
    %cst_167 = arith.constant dense<0.000000e+00> : vector<8x128xf32>
    %359 = tpu.matmul %329, %358, %cst_167 {dimension_numbers = #tpu.dot_dimension_numbers<[1], [0], [0], [1], [0, 0, 1, 1], [], []>} : vector<8x128xbf16>, vector<128x128xbf16>, vector<8x128xf32> -> vector<8x128xf32>
    %360 = arith.addf %357, %359 : vector<8x128xf32>
    %361 = math.tanh %360 : vector<8x128xf32>
    %362 = arith.index_cast %c6_i32 : i32 to index
    %c0_168 = arith.constant 0 : index
    %c384_169 = arith.constant 384 : index
    %363 = vector.load %arg2[%362, %c0_168, %c384_169] : memref<8x8x512xbf16, #tpu.memory_space<vmem>>, vector<1x8x128xbf16>
    %364 = vector.shape_cast %363 : vector<1x8x128xbf16> to vector<8x128xbf16>
    %365 = arith.extf %364 : vector<8x128xbf16> to vector<8x128xf32>
    %c0_170 = arith.constant 0 : index
    %c384_171 = arith.constant 384 : index
    %366 = vector.load %arg3[%c0_170, %c384_171] : memref<128x512xbf16, #tpu.memory_space<vmem>>, vector<128x128xbf16>
    %cst_172 = arith.constant dense<0.000000e+00> : vector<8x128xf32>
    %367 = tpu.matmul %329, %366, %cst_172 {dimension_numbers = #tpu.dot_dimension_numbers<[1], [0], [0], [1], [0, 0, 1, 1], [], []>} : vector<8x128xbf16>, vector<128x128xbf16>, vector<8x128xf32> -> vector<8x128xf32>
    %368 = arith.addf %365, %367 : vector<8x128xf32>
    %369 = arith.negf %368 : vector<8x128xf32>
    %370 = math.exp %369 : vector<8x128xf32>
    %cst_173 = arith.constant 1.000000e+00 : f32
    %371 = vector.broadcast %cst_173 : f32 to vector<8x128xf32>
    %372 = arith.addf %371, %370 : vector<8x128xf32>
    %373 = arith.divf %371, %372 : vector<8x128xf32>
    %374 = arith.mulf %353, %322 : vector<8x128xf32>
    %375 = arith.mulf %341, %361 : vector<8x128xf32>
    %376 = arith.addf %374, %375 : vector<8x128xf32>
    %377 = math.tanh %376 : vector<8x128xf32>
    %378 = arith.mulf %373, %377 : vector<8x128xf32>
    %379 = arith.index_cast %c6_i32 : i32 to index
    %c0_174 = arith.constant 0 : index
    %c0_175 = arith.constant 0 : index
    %380 = vector.load %arg6[%379, %c0_174, %c0_175] : memref<8x8x128xf32, #tpu.memory_space<vmem>>, vector<1x8x128xf32>
    %381 = vector.shape_cast %380 : vector<1x8x128xf32> to vector<8x128xf32>
    %382 = vector.shape_cast %378 : vector<8x128xf32> to vector<1x8x128xf32>
    tpu.vector_store %arg6[%379, %c0_174, %c0_175], %382 {strides = array<i32>} : memref<8x8x128xf32, #tpu.memory_space<vmem>>, vector<1x8x128xf32>,
    %c7_i32 = arith.constant 7 : i32
    %383 = arith.truncf %378 : vector<8x128xf32> to vector<8x128xbf16>
    %384 = arith.index_cast %c7_i32 : i32 to index
    %c0_176 = arith.constant 0 : index
    %c0_177 = arith.constant 0 : index
    %385 = vector.load %arg2[%384, %c0_176, %c0_177] : memref<8x8x512xbf16, #tpu.memory_space<vmem>>, vector<1x8x128xbf16>
    %386 = vector.shape_cast %385 : vector<1x8x128xbf16> to vector<8x128xbf16>
    %387 = arith.extf %386 : vector<8x128xbf16> to vector<8x128xf32>
    %c0_178 = arith.constant 0 : index
    %c0_179 = arith.constant 0 : index
    %388 = vector.load %arg3[%c0_178, %c0_179] : memref<128x512xbf16, #tpu.memory_space<vmem>>, vector<128x128xbf16>
    %cst_180 = arith.constant dense<0.000000e+00> : vector<8x128xf32>
    %389 = tpu.matmul %383, %388, %cst_180 {dimension_numbers = #tpu.dot_dimension_numbers<[1], [0], [0], [1], [0, 0, 1, 1], [], []>} : vector<8x128xbf16>, vector<128x128xbf16>, vector<8x128xf32> -> vector<8x128xf32>
    %390 = arith.addf %387, %389 : vector<8x128xf32>
    %391 = arith.negf %390 : vector<8x128xf32>
    %392 = math.exp %391 : vector<8x128xf32>
    %cst_181 = arith.constant 1.000000e+00 : f32
    %393 = vector.broadcast %cst_181 : f32 to vector<8x128xf32>
    %394 = arith.addf %393, %392 : vector<8x128xf32>
    %395 = arith.divf %393, %394 : vector<8x128xf32>
    %396 = arith.index_cast %c7_i32 : i32 to index
    %c0_182 = arith.constant 0 : index
    %c128_183 = arith.constant 128 : index
    %397 = vector.load %arg2[%396, %c0_182, %c128_183] : memref<8x8x512xbf16, #tpu.memory_space<vmem>>, vector<1x8x128xbf16>
    %398 = vector.shape_cast %397 : vector<1x8x128xbf16> to vector<8x128xbf16>
    %399 = arith.extf %398 : vector<8x128xbf16> to vector<8x128xf32>
    %c0_184 = arith.constant 0 : index
    %c128_185 = arith.constant 128 : index
    %400 = vector.load %arg3[%c0_184, %c128_185] : memref<128x512xbf16, #tpu.memory_space<vmem>>, vector<128x128xbf16>
    %cst_186 = arith.constant dense<0.000000e+00> : vector<8x128xf32>
    %401 = tpu.matmul %383, %400, %cst_186 {dimension_numbers = #tpu.dot_dimension_numbers<[1], [0], [0], [1], [0, 0, 1, 1], [], []>} : vector<8x128xbf16>, vector<128x128xbf16>, vector<8x128xf32> -> vector<8x128xf32>
    %402 = arith.addf %399, %401 : vector<8x128xf32>
    %403 = arith.negf %402 : vector<8x128xf32>
    %404 = math.exp %403 : vector<8x128xf32>
    %cst_187 = arith.constant 1.000000e+00 : f32
    %405 = vector.broadcast %cst_187 : f32 to vector<8x128xf32>
    %406 = arith.addf %405, %404 : vector<8x128xf32>
    %407 = arith.divf %405, %406 : vector<8x128xf32>
    %408 = arith.index_cast %c7_i32 : i32 to index
    %c0_188 = arith.constant 0 : index
    %c256_189 = arith.constant 256 : index
    %409 = vector.load %arg2[%408, %c0_188, %c256_189] : memref<8x8x512xbf16, #tpu.memory_space<vmem>>, vector<1x8x128xbf16>
    %410 = vector.shape_cast %409 : vector<1x8x128xbf16> to vector<8x128xbf16>
    %411 = arith.extf %410 : vector<8x128xbf16> to vector<8x128xf32>
    %c0_190 = arith.constant 0 : index
    %c256_191 = arith.constant 256 : index
    %412 = vector.load %arg3[%c0_190, %c256_191] : memref<128x512xbf16, #tpu.memory_space<vmem>>, vector<128x128xbf16>
    %cst_192 = arith.constant dense<0.000000e+00> : vector<8x128xf32>
    %413 = tpu.matmul %383, %412, %cst_192 {dimension_numbers = #tpu.dot_dimension_numbers<[1], [0], [0], [1], [0, 0, 1, 1], [], []>} : vector<8x128xbf16>, vector<128x128xbf16>, vector<8x128xf32> -> vector<8x128xf32>
    %414 = arith.addf %411, %413 : vector<8x128xf32>
    %415 = math.tanh %414 : vector<8x128xf32>
    %416 = arith.index_cast %c7_i32 : i32 to index
    %c0_193 = arith.constant 0 : index
    %c384_194 = arith.constant 384 : index
    %417 = vector.load %arg2[%416, %c0_193, %c384_194] : memref<8x8x512xbf16, #tpu.memory_space<vmem>>, vector<1x8x128xbf16>
    %418 = vector.shape_cast %417 : vector<1x8x128xbf16> to vector<8x128xbf16>
    %419 = arith.extf %418 : vector<8x128xbf16> to vector<8x128xf32>
    %c0_195 = arith.constant 0 : index
    %c384_196 = arith.constant 384 : index
    %420 = vector.load %arg3[%c0_195, %c384_196] : memref<128x512xbf16, #tpu.memory_space<vmem>>, vector<128x128xbf16>
    %cst_197 = arith.constant dense<0.000000e+00> : vector<8x128xf32>
    %421 = tpu.matmul %383, %420, %cst_197 {dimension_numbers = #tpu.dot_dimension_numbers<[1], [0], [0], [1], [0, 0, 1, 1], [], []>} : vector<8x128xbf16>, vector<128x128xbf16>, vector<8x128xf32> -> vector<8x128xf32>
    %422 = arith.addf %419, %421 : vector<8x128xf32>
    %423 = arith.negf %422 : vector<8x128xf32>
    %424 = math.exp %423 : vector<8x128xf32>
    %cst_198 = arith.constant 1.000000e+00 : f32
    %425 = vector.broadcast %cst_198 : f32 to vector<8x128xf32>
    %426 = arith.addf %425, %424 : vector<8x128xf32>
    %427 = arith.divf %425, %426 : vector<8x128xf32>
    %428 = arith.mulf %407, %376 : vector<8x128xf32>
    %429 = arith.mulf %395, %415 : vector<8x128xf32>
    %430 = arith.addf %428, %429 : vector<8x128xf32>
    %431 = math.tanh %430 : vector<8x128xf32>
    %432 = arith.mulf %427, %431 : vector<8x128xf32>
    %433 = arith.index_cast %c7_i32 : i32 to index
    %c0_199 = arith.constant 0 : index
    %c0_200 = arith.constant 0 : index
    %434 = vector.load %arg6[%433, %c0_199, %c0_200] : memref<8x8x128xf32, #tpu.memory_space<vmem>>, vector<1x8x128xf32>
    %435 = vector.shape_cast %434 : vector<1x8x128xf32> to vector<8x128xf32>
    %436 = vector.shape_cast %432 : vector<8x128xf32> to vector<1x8x128xf32>
    tpu.vector_store %arg6[%433, %c0_199, %c0_200], %436 {strides = array<i32>} : memref<8x8x128xf32, #tpu.memory_space<vmem>>, vector<1x8x128xf32>,
    %c8_i32 = arith.constant 8 : i32
    %c0_201 = arith.constant 0 : index
    %c0_202 = arith.constant 0 : index
    %437 = vector.load %arg9[%c0_201, %c0_202] : memref<8x128xf32, #tpu.memory_space<vmem>>, vector<8x128xf32>
    tpu.vector_store %arg9[%c0_201, %c0_202], %432 {strides = array<i32>} : memref<8x128xf32, #tpu.memory_space<vmem>>, vector<8x128xf32>,
    %c0_203 = arith.constant 0 : index
    %c0_204 = arith.constant 0 : index
    %438 = vector.load %arg10[%c0_203, %c0_204] : memref<8x128xf32, #tpu.memory_space<vmem>>, vector<8x128xf32>
    tpu.vector_store %arg10[%c0_203, %c0_204], %430 {strides = array<i32>} : memref<8x128xf32, #tpu.memory_space<vmem>>, vector<8x128xf32>,
    %c0_205 = arith.constant 0 : index
    %c0_206 = arith.constant 0 : index
    %439 = vector.load %arg7[%c0_205, %c0_206] : memref<8x128xf32, #tpu.memory_space<vmem>>, vector<8x128xf32>
    tpu.vector_store %arg7[%c0_205, %c0_206], %432 {strides = array<i32>} : memref<8x128xf32, #tpu.memory_space<vmem>>, vector<8x128xf32>,
    %c0_207 = arith.constant 0 : index
    %c0_208 = arith.constant 0 : index
    %440 = vector.load %arg8[%c0_207, %c0_208] : memref<8x128xf32, #tpu.memory_space<vmem>>, vector<8x128xf32>
    tpu.vector_store %arg8[%c0_207, %c0_208], %430 {strides = array<i32>} : memref<8x128xf32, #tpu.memory_space<vmem>>, vector<8x128xf32>,
    return
  }
  func.func @transform_0(%arg0: i32, %arg1: i32) -> (i32, i32, i32) {
    %c0_i32 = arith.constant 0 : i32
    %c0_i32_0 = arith.constant 0 : i32
    return %arg1, %arg0, %c0_i32 : i32, i32, i32
  }
  func.func @transform_1(%arg0: i32, %arg1: i32) -> (i32, i32) {
    %c0_i32 = arith.constant 0 : i32
    %c0_i32_0 = arith.constant 0 : i32
    %c0_i32_1 = arith.constant 0 : i32
    return %c0_i32, %c0_i32_0 : i32, i32
  }
  func.func @transform_2(%arg0: i32, %arg1: i32) -> (i32, i32) {
    %c0_i32 = arith.constant 0 : i32
    %c0_i32_0 = arith.constant 0 : i32
    return %arg0, %c0_i32 : i32, i32
  }
  func.func @transform_3(%arg0: i32, %arg1: i32) -> (i32, i32) {
    %c0_i32 = arith.constant 0 : i32
    %c0_i32_0 = arith.constant 0 : i32
    return %arg0, %c0_i32 : i32, i32
  }
  func.func @transform_4(%arg0: i32, %arg1: i32) -> (i32, i32, i32) {
    %c0_i32 = arith.constant 0 : i32
    %c0_i32_0 = arith.constant 0 : i32
    return %arg1, %arg0, %c0_i32 : i32, i32, i32
  }
  func.func @transform_5(%arg0: i32, %arg1: i32) -> (i32, i32) {
    %c0_i32 = arith.constant 0 : i32
    %c0_i32_0 = arith.constant 0 : i32
    return %arg0, %c0_i32 : i32, i32
  }
  func.func @transform_6(%arg0: i32, %arg1: i32) -> (i32, i32) {
    %c0_i32 = arith.constant 0 : i32
    %c0_i32_0 = arith.constant 0 : i32
    return %arg0, %c0_i32 : i32, i32
  }
}

</mosaic_0001>

<bundles_post_ra>
// kernel: rnn_model_forward.9
= control target key start
LH: loop header
LB: loop body
LE: loop exit
PB: predicated region body
PF: predicated region fallthrough
CT: control target
= control target key end

     0   :  { %s339_s1 = inlined_call_operand.vmem [shape: bf16[128,128], index: 1, kind: input, shape index: {}]   ;;  %s340_s0 = inlined_call_operand.vmem [shape: f32[64,128], index: 0, kind: input, shape index: {}]   ;;  %s341_s2 = inlined_call_operand.vmem [shape: f32[1,128], index: 2, kind: input, shape index: {}]   ;;  %s342_s3 = inlined_call_operand.vmem [shape: f32[64,128], index: 3, kind: output, shape index: {}]  }
   0x1   :  { %v236_v0 = vld [vmem:[%s339_s1] sm:$0xff]   ;;  %v237_v1 = vld [vmem:[%s339_s1 + $0x8] sm:$0xff]   ;;  %v238_v2 = vld [vmem:[%s339_s1 + $0x10] sm:$0xff]  }
   0x2   :  { %196 = vmatprep.subr.bf16.mxu0 %v236_v0  ;;  %220 = vmatprep.subr.bf16.mxu1 %v236_v0  ;;  %v239_v3 = vld [vmem:[%s339_s1 + $0x18] sm:$0xff]   ;;  %v15_v4 = vld [vmem:[%s340_s0] sm:$0xff]  ;;  %v16_v5 = vld [vmem:[%s340_s0 + $0x8] sm:$0xff] }
   0x3   :  { %197 = vmatpush3.bf16.msra.mxu0 %v236_v0  ;;  %228 = vmatpush3.bf16.msra.mxu1 %v236_v0  ;;  %v19_v6 = vld [vmem:[%s340_s0 + $0x20] sm:$0xff]  ;;  %v23_v7 = vpack.c.bf16 %v16_v5, %v15_v4  ;;  %v20_v8 = vld [vmem:[%s340_s0 + $0x28] sm:$0xff]  ;;  %v242_v12 = vld [vmem:[%s339_s1 + $0x30] sm:$0xff]  }
   0x4   :  { %198 = vmatprep.subr.bf16.mxu0 %v237_v1  ;;  %221 = vmatprep.subr.bf16.mxu1 %v237_v1  ;;  %v25_v9 = vpack.c.bf16 %v20_v8, %v19_v6  ;;  %v240_v10 = vld [vmem:[%s339_s1 + $0x20] sm:$0xff]   ;;  %v241_v11 = vld [vmem:[%s339_s1 + $0x28] sm:$0xff]   ;;  %v243_v13 = vld [vmem:[%s339_s1 + $0x38] sm:$0xff]  }
   0x5   :  { %212 = vmatprep.mubr.bf16.mxu0 %v23_v7  ;;  %v17_v14 = vld [vmem:[%s340_s0 + $0x10] sm:$0xff]  ;;  %v18_v15 = vld [vmem:[%s340_s0 + $0x18] sm:$0xff]  ;;  %v175_v20 = vld [vmem:[%s341_s2] ss:$0 sm:$0xff] }
   0x6   :  { %216 = vmatprep.mubr.bf16.mxu1 %v25_v9  ;;  %v21_v16 = vld [vmem:[%s340_s0 + $0x30] sm:$0xff]  ;;  %v22_v17 = vld [vmem:[%s340_s0 + $0x38] sm:$0xff]  ;;  %v24_v18 = vpack.c.bf16 %v18_v15, %v17_v14 }
   0x7   :  { %199 = vmatpush3.bf16.msra.mxu0 %v237_v1  ;;  %229 = vmatpush3.bf16.msra.mxu1 %v237_v1  ;;  %v26_v19 = vpack.c.bf16 %v22_v17, %v21_v16 }
   0x8   :  { %200 = vmatprep.subr.bf16.mxu0 %v238_v2  ;;  %222 = vmatprep.subr.bf16.mxu1 %v238_v2 }
   0xb   :  { %201 = vmatpush3.bf16.msra.mxu0 %v238_v2  ;;  %230 = vmatpush3.bf16.msra.mxu1 %v238_v2 }
   0xc   :  { %202 = vmatprep.subr.bf16.mxu0 %v239_v3  ;;  %223 = vmatprep.subr.bf16.mxu1 %v239_v3 }
   0xf   :  { %203 = vmatpush3.bf16.msra.mxu0 %v239_v3  ;;  %231 = vmatpush3.bf16.msra.mxu1 %v239_v3 }
  0x10   :  { %204 = vmatprep.subr.bf16.mxu0 %v240_v10  ;;  %224 = vmatprep.subr.bf16.mxu1 %v240_v10 }
  0x13   :  { %205 = vmatpush3.bf16.msra.mxu0 %v240_v10  ;;  %232 = vmatpush3.bf16.msra.mxu1 %v240_v10 }
  0x14   :  { %206 = vmatprep.subr.bf16.mxu0 %v241_v11  ;;  %225 = vmatprep.subr.bf16.mxu1 %v241_v11 }
  0x17   :  { %207 = vmatpush3.bf16.msra.mxu0 %v241_v11  ;;  %233 = vmatpush3.bf16.msra.mxu1 %v241_v11 }
  0x18   :  { %208 = vmatprep.subr.bf16.mxu0 %v242_v12  ;;  %226 = vmatprep.subr.bf16.mxu1 %v242_v12 }
  0x1b   :  { %209 = vmatpush3.bf16.msra.mxu0 %v242_v12  ;;  %234 = vmatpush3.bf16.msra.mxu1 %v242_v12 }
  0x1c   :  { %210 = vmatprep.subr.bf16.mxu0 %v243_v13  ;;  %227 = vmatprep.subr.bf16.mxu1 %v243_v13 }
  0x1f   :  { %211 = vmatpush3.bf16.msra.mxu0 %v243_v13  ;;  %235 = vmatpush3.bf16.msra.mxu1 %v243_v13 }
  0x22   :  { %213 = vmatmul.mubr.bf16.vlgmr.msra.gmra.mrb[0].mxu0 %v24_v18  ;;  %217 = vmatmul.mubr.bf16.vlgmr.msra.gmra.mrb[0].mxu1 %v26_v19 }
  0xf5   :  { %v214_v21 = vpop.f32.mrb[0].mxu0  ;;  %v218_v22 = vpop.f32.mrb[0].mxu1 }
  0xf6   :  { %v141_v23 = vadd.f32 %v214_v21, %v175_v20  ;;  %v157_v24 = vadd.f32 %v218_v22, %v175_v20  ;;  %v132_v25 = vpop.f32.mrb[1].mxu0  ;;  %v148_v26 = vpop.f32.mrb[1].mxu1 }
  0xf7   :  { %v133_v27 = vadd.f32 %v175_v20, %v132_v25  ;;  %v149_v28 = vadd.f32 %v175_v20, %v148_v26  ;;  %v215_v29 = vpop.f32.mrb[2].mxu0  ;;  %v219_v30 = vpop.f32.mrb[2].mxu1 }
  0xf8   :  { %165 = vst [vmem:[%s342_s3 + $0x10] sm:$0xff] %v141_v23  ;;  %169 = vst [vmem:[%s342_s3 + $0x30] sm:$0xff] %v157_v24  ;;  %v144_v31 = vadd.f32 %v215_v29, %v175_v20  ;;  %v160_v32 = vadd.f32 %v219_v30, %v175_v20  ;;  %v135_v33 = vpop.f32.mrb[3].mxu0  ;;  %v151_v34 = vpop.f32.mrb[3].mxu1 }
  0xf9   :  { %163 = vst [vmem:[%s342_s3] sm:$0xff] %v133_v27  ;;  %167 = vst [vmem:[%s342_s3 + $0x20] sm:$0xff] %v149_v28  ;;  %v136_v35 = vadd.f32 %v175_v20, %v135_v33  ;;  %v152_v36 = vadd.f32 %v175_v20, %v151_v34 }
  0xfa   :  { %166 = vst [vmem:[%s342_s3 + $0x18] sm:$0xff] %v144_v31  ;;  %170 = vst [vmem:[%s342_s3 + $0x38] sm:$0xff] %v160_v32 }
  0xfb   :  { %164 = vst [vmem:[%s342_s3 + $0x8] sm:$0xff] %v136_v35  ;;  %168 = vst [vmem:[%s342_s3 + $0x28] sm:$0xff] %v152_v36 }

// kernel: rnn_model_forward.5
= control target key start
LH: loop header
LB: loop body
LE: loop exit
PB: predicated region body
PF: predicated region fallthrough
CT: control target
= control target key end

     0   :  { %v433_v1 = vmov 0   ;;  %vm97_vm0 = vcmask 261120   ;;  %v37_v21 = vlaneseq  ;;  %s601_s1 = inlined_call_operand.vmem [shape: bf16[32,512], index: 1, kind: input, shape index: {}]   ;;  %s602_s0 = inlined_call_operand.vmem [shape: f32[64,32], index: 0, kind: input, shape index: {}]   ;;  %s603_s2 = inlined_call_operand.vmem [shape: f32[1,512], index: 2, kind: input, shape index: {}]   ;;  %s604_s3 = inlined_call_operand.vmem [shape: bf16[64,512], index: 3, kind: output, shape index: {}]  }
   0x1   :  { %v421_v0 = vld [vmem:[%s601_s1 + $0x4] ss:$16 sps:$4 sm:$0xff]   ;;  %142 = vmatprep.mubr.bf16.mxu0 %v433_v1  ;;  %215 = vmatprep.mubr.bf16.mxu1 %v433_v1  ;;  %v423_v2 = vld [vmem:[%s601_s1 + $0xc] ss:$16 sps:$4 sm:$0xff]   ;;  %v425_v3 = vld [vmem:[%s601_s1] ss:$16 sps:$4 sm:$0xff]  }
   0x2   :  { %110 = vmatprep.subr.bf16.mxu0 %v421_v0  ;;  %v426_v4 = vld [vmem:[%s601_s1 + $0x8] ss:$16 sps:$4 sm:$0xff]   ;;  %183 = vmatprep.subr.bf16.mxu1 %v423_v2  ;;  %v427_v5 = vld [vmem:[%s601_s1 + $0x24] ss:$16 sps:$4 sm:$0xff]   ;;  %v429_v6 = vld [vmem:[%s601_s1 + $0x2c] ss:$16 sps:$4 sm:$0xff]  }
   0x3   :  { %111 = vmatpush1.bf16.msra.mxu0 %v425_v3  ;;  %184 = vmatpush1.bf16.msra.mxu1 %v426_v4  ;;  %v431_v7 = vld [vmem:[%s601_s1 + $0x20] ss:$16 sps:$4 sm:$0xff]   ;;  %v432_v8 = vld [vmem:[%s601_s1 + $0x28] ss:$16 sps:$4 sm:$0xff]   ;;  %v38_v22 = vshrl.u32 %v37_v21, 7 }
   0x4   :  { %112 = vmatprep.subr.bf16.mxu0 %v427_v5  ;;  %v15_v9 = vld [vmem:[%s602_s0] sm:$0xff]  ;;  %v16_v10 = vld [vmem:[%s602_s0 + $0x8] sm:$0xff]  ;;  %185 = vmatprep.subr.bf16.mxu1 %v429_v6  ;;  %v17_v12 = vld [vmem:[%s602_s0 + $0x10] sm:$0xff] }
   0x5   :  { %v23_v11 = vpack.c.bf16 %v16_v10, %v15_v9  ;;  %v18_v13 = vld [vmem:[%s602_s0 + $0x18] sm:$0xff]  ;;  %v19_v15 = vld [vmem:[%s602_s0 + $0x20] sm:$0xff]  ;;  %v20_v16 = vld [vmem:[%s602_s0 + $0x28] sm:$0xff]  ;;  %v39_v23 = vsub.s32 0, %v38_v22  ;;  %v47_v24 = vsub.s32 2, %v38_v22  ;;  %v43_v26 = vsub.s32 1, %v38_v22 }
   0x6   :  { %v24_v14 = vpack.c.bf16 %v18_v13, %v17_v12  ;;  %v25_v17 = vpack.c.bf16 %v20_v16, %v19_v15  ;;  %v21_v18 = vld [vmem:[%s602_s0 + $0x30] sm:$0xff]  ;;  %v22_v19 = vld [vmem:[%s602_s0 + $0x38] sm:$0xff]  ;;  %v35_v25 = vld [vmem:[%s603_s2] sm:$0xf]  ;;  %v51_v27 = vsub.s32 3, %v38_v22 }
   0x7   :  { %113 = vmatpush1.bf16.msra.mxu0 %v431_v7  ;;  %186 = vmatpush1.bf16.msra.mxu1 %v432_v8  ;;  %v26_v20 = vpack.c.bf16 %v22_v19, %v21_v18  ;;  %v513_v28 = vrot.slane %v35_v25, %v39_v23  ;;  %v515_v29 = vrot.slane %v35_v25, %v47_v24 }
   0x8   :  { %v517_v30 = vrot.slane %v35_v25, %v43_v26  ;;  %v519_v31 = vrot.slane %v35_v25, %v51_v27 }
   0xa   :  { %380 = vmatmul.mubr.msk.bf16.vlgmr.msra.gmra.mrb[0].mxu0 %vm97_vm0, %v23_v11  ;;  %384 = vmatmul.mubr.msk.bf16.vlgmr.msra.gmra.mrb[0].mxu1 %vm97_vm0, %v23_v11 }
   0xb   :  { %152 = vmatprep.mubr.bf16.mxu0 %v433_v1  ;;  %225 = vmatprep.mubr.bf16.mxu1 %v433_v1 }
  0x12   :  { %381 = vmatmul.mubr.msk.bf16.gmra.mrb[4].mxu0 %vm97_vm0, %v24_v14  ;;  %385 = vmatmul.mubr.msk.bf16.gmra.mrb[4].mxu1 %vm97_vm0, %v24_v14 }
  0x13   :  { %162 = vmatprep.mubr.bf16.mxu0 %v433_v1  ;;  %235 = vmatprep.mubr.bf16.mxu1 %v433_v1 }
  0x1a   :  { %382 = vmatmul.mubr.msk.bf16.gmra.mrb[8].mxu0 %vm97_vm0, %v25_v17  ;;  %386 = vmatmul.mubr.msk.bf16.gmra.mrb[8].mxu1 %vm97_vm0, %v25_v17 }
  0x1b   :  { %172 = vmatprep.mubr.bf16.mxu0 %v433_v1  ;;  %245 = vmatprep.mubr.bf16.mxu1 %v433_v1 }
  0x22   :  { %383 = vmatmul.mubr.msk.bf16.gmra.mrb[12].mxu0 %vm97_vm0, %v26_v20  ;;  %387 = vmatmul.mubr.msk.bf16.gmra.mrb[12].mxu1 %vm97_vm0, %v26_v20 }
  0xdd   :  { %v144_v32 = vpop.f32.mrb[0].mxu0  ;;  %v217_v33 = vpop.f32.mrb[0].mxu1 }
  0xde   :  { %v145_v34 = vadd.f32 %v144_v32, %v513_v28  ;;  %v218_v35 = vadd.f32 %v217_v33, %v515_v29  ;;  %v146_v36 = vpop.f32.mrb[1].mxu0  ;;  %v219_v37 = vpop.f32.mrb[1].mxu1 }
  0xdf   :  { %v147_v38 = vadd.f32 %v146_v36, %v517_v30  ;;  %v220_v39 = vadd.f32 %v219_v37, %v519_v31  ;;  %v148_v40 = vpop.f32.mrb[2].mxu0  ;;  %v221_v41 = vpop.f32.mrb[2].mxu1 }
  0xe0   :  { %v149_v42 = vadd.f32 %v148_v40, %v513_v28  ;;  %v222_v43 = vadd.f32 %v221_v41, %v515_v29  ;;  %v150_v44 = vpop.f32.mrb[3].mxu0  ;;  %v223_v45 = vpop.f32.mrb[3].mxu1 }
  0xe1   :  { %v404_v46 = vpack.c.bf16 %v147_v38, %v145_v34  ;;  %v405_v47 = vpack.c.bf16 %v220_v39, %v218_v35  ;;  %v151_v48 = vadd.f32 %v150_v44, %v517_v30  ;;  %v224_v49 = vadd.f32 %v223_v45, %v519_v31 }
  0xe3   :  { %352 = vst [vmem:[%s604_s3] sm:$0xff] %v404_v46  ;;  %353 = vst [vmem:[%s604_s3 + $0x8] sm:$0xff] %v405_v47  ;;  %v406_v50 = vpack.c.bf16 %v151_v48, %v149_v42  ;;  %v407_v51 = vpack.c.bf16 %v224_v49, %v222_v43 }
  0xe5   :  { %354 = vst [vmem:[%s604_s3 + $0x10] sm:$0xff] %v406_v50  ;;  %355 = vst [vmem:[%s604_s3 + $0x18] sm:$0xff] %v407_v51  ;;  %v154_v52 = vpop.f32.mrb[4].mxu0  ;;  %v227_v53 = vpop.f32.mrb[4].mxu1 }
  0xe6   :  { %v155_v54 = vadd.f32 %v154_v52, %v513_v28  ;;  %v228_v55 = vadd.f32 %v227_v53, %v515_v29  ;;  %v156_v56 = vpop.f32.mrb[5].mxu0  ;;  %v229_v57 = vpop.f32.mrb[5].mxu1 }
  0xe7   :  { %v157_v58 = vadd.f32 %v156_v56, %v517_v30  ;;  %v230_v59 = vadd.f32 %v229_v57, %v519_v31  ;;  %v158_v60 = vpop.f32.mrb[6].mxu0  ;;  %v231_v61 = vpop.f32.mrb[6].mxu1 }
  0xe8   :  { %v159_v62 = vadd.f32 %v158_v60, %v513_v28  ;;  %v232_v63 = vadd.f32 %v231_v61, %v515_v29  ;;  %v160_v0 = vpop.f32.mrb[7].mxu0  ;;  %v233_v1 = vpop.f32.mrb[7].mxu1 }
  0xe9   :  { %v408_v2 = vpack.c.bf16 %v157_v58, %v155_v54  ;;  %v409_v3 = vpack.c.bf16 %v230_v59, %v228_v55  ;;  %v161_v4 = vadd.f32 %v160_v0, %v517_v30  ;;  %v234_v5 = vadd.f32 %v233_v1, %v519_v31 }
  0xeb   :  { %356 = vst [vmem:[%s604_s3 + $0x20] sm:$0xff] %v408_v2  ;;  %357 = vst [vmem:[%s604_s3 + $0x28] sm:$0xff] %v409_v3  ;;  %v410_v6 = vpack.c.bf16 %v161_v4, %v159_v62  ;;  %v411_v7 = vpack.c.bf16 %v234_v5, %v232_v63 }
  0xed   :  { %358 = vst [vmem:[%s604_s3 + $0x30] sm:$0xff] %v410_v6  ;;  %359 = vst [vmem:[%s604_s3 + $0x38] sm:$0xff] %v411_v7  ;;  %v164_v8 = vpop.f32.mrb[8].mxu0  ;;  %v237_v9 = vpop.f32.mrb[8].mxu1 }
  0xee   :  { %v165_v10 = vadd.f32 %v164_v8, %v513_v28  ;;  %v238_v11 = vadd.f32 %v237_v9, %v515_v29  ;;  %v166_v12 = vpop.f32.mrb[9].mxu0  ;;  %v239_v13 = vpop.f32.mrb[9].mxu1 }
  0xef   :  { %v167_v14 = vadd.f32 %v166_v12, %v517_v30  ;;  %v240_v15 = vadd.f32 %v239_v13, %v519_v31  ;;  %v168_v16 = vpop.f32.mrb[10].mxu0  ;;  %v241_v17 = vpop.f32.mrb[10].mxu1 }
  0xf0   :  { %v169_v18 = vadd.f32 %v168_v16, %v513_v28  ;;  %v242_v19 = vadd.f32 %v241_v17, %v515_v29  ;;  %v170_v20 = vpop.f32.mrb[11].mxu0  ;;  %v243_v21 = vpop.f32.mrb[11].mxu1 }
  0xf1   :  { %v412_v22 = vpack.c.bf16 %v167_v14, %v165_v10  ;;  %v413_v23 = vpack.c.bf16 %v240_v15, %v238_v11  ;;  %v171_v24 = vadd.f32 %v170_v20, %v517_v30  ;;  %v244_v25 = vadd.f32 %v243_v21, %v519_v31 }
  0xf3   :  { %360 = vst [vmem:[%s604_s3 + $0x40] sm:$0xff] %v412_v22  ;;  %361 = vst [vmem:[%s604_s3 + $0x48] sm:$0xff] %v413_v23  ;;  %v414_v26 = vpack.c.bf16 %v171_v24, %v169_v18  ;;  %v415_v27 = vpack.c.bf16 %v244_v25, %v242_v19 }
  0xf5   :  { %362 = vst [vmem:[%s604_s3 + $0x50] sm:$0xff] %v414_v26  ;;  %363 = vst [vmem:[%s604_s3 + $0x58] sm:$0xff] %v415_v27  ;;  %v174_v32 = vpop.f32.mrb[12].mxu0  ;;  %v247_v33 = vpop.f32.mrb[12].mxu1 }
  0xf6   :  { %v175_v34 = vadd.f32 %v174_v32, %v513_v28  ;;  %v248_v35 = vadd.f32 %v247_v33, %v515_v29  ;;  %v176_v36 = vpop.f32.mrb[13].mxu0  ;;  %v249_v37 = vpop.f32.mrb[13].mxu1 }
  0xf7   :  { %v177_v38 = vadd.f32 %v176_v36, %v517_v30  ;;  %v250_v39 = vadd.f32 %v249_v37, %v519_v31  ;;  %v178_v40 = vpop.f32.mrb[14].mxu0  ;;  %v251_v41 = vpop.f32.mrb[14].mxu1 }
  0xf8   :  { %v179_v42 = vadd.f32 %v178_v40, %v513_v28  ;;  %v252_v43 = vadd.f32 %v251_v41, %v515_v29  ;;  %v180_v44 = vpop.f32.mrb[15].mxu0  ;;  %v253_v45 = vpop.f32.mrb[15].mxu1 }
  0xf9   :  { %v416_v46 = vpack.c.bf16 %v177_v38, %v175_v34  ;;  %v417_v47 = vpack.c.bf16 %v250_v39, %v248_v35  ;;  %v181_v48 = vadd.f32 %v180_v44, %v517_v30  ;;  %v254_v49 = vadd.f32 %v253_v45, %v519_v31 }
  0xfb   :  { %364 = vst [vmem:[%s604_s3 + $0x60] sm:$0xff] %v416_v46  ;;  %365 = vst [vmem:[%s604_s3 + $0x68] sm:$0xff] %v417_v47  ;;  %v418_v50 = vpack.c.bf16 %v181_v48, %v179_v42  ;;  %v419_v28 = vpack.c.bf16 %v254_v49, %v252_v43 }
  0xfd   :  { %366 = vst [vmem:[%s604_s3 + $0x70] sm:$0xff] %v418_v50  ;;  %367 = vst [vmem:[%s604_s3 + $0x78] sm:$0xff] %v419_v28 }

// kernel: rnn_model_forward.7
= control target key start
LH: loop header
LB: loop body
LE: loop exit
PB: predicated region body
PF: predicated region fallthrough
CT: control target
= control target key end

     0   :  { %v616_v1 = vmov 0   ;;  %v61_v45 = vlaneseq  ;;  %s856_s1 = inlined_call_operand.vmem [shape: bf16[128,512], index: 1, kind: input, shape index: {}]   ;;  %s857_s0 = inlined_call_operand.vmem [shape: f32[64,128], index: 0, kind: input, shape index: {}]   ;;  %s858_s2 = inlined_call_operand.vmem [shape: f32[1,512], index: 2, kind: input, shape index: {}]   ;;  %s859_s3 = inlined_call_operand.vmem [shape: bf16[64,512], index: 3, kind: output, shape index: {}]  }
   0x1   :  { %v568_v0 = vld [vmem:[%s856_s1 + $0x4] ss:$16 sps:$4 sm:$0xff]   ;;  %273 = vmatprep.mubr.bf16.mxu0 %v616_v1  ;;  %346 = vmatprep.mubr.bf16.mxu1 %v616_v1  ;;  %v570_v2 = vld [vmem:[%s856_s1 + $0xc] ss:$16 sps:$4 sm:$0xff]   ;;  %v572_v3 = vld [vmem:[%s856_s1] ss:$16 sps:$4 sm:$0xff]  }
   0x2   :  { %241 = vmatprep.subr.bf16.mxu0 %v568_v0  ;;  %v573_v4 = vld [vmem:[%s856_s1 + $0x8] ss:$16 sps:$4 sm:$0xff]   ;;  %314 = vmatprep.subr.bf16.mxu1 %v570_v2  ;;  %v574_v5 = vld [vmem:[%s856_s1 + $0x24] ss:$16 sps:$4 sm:$0xff]   ;;  %v576_v6 = vld [vmem:[%s856_s1 + $0x2c] ss:$16 sps:$4 sm:$0xff]  }
   0x3   :  { %242 = vmatpush1.bf16.msra.mxu0 %v572_v3  ;;  %315 = vmatpush1.bf16.msra.mxu1 %v573_v4  ;;  %v578_v7 = vld [vmem:[%s856_s1 + $0x20] ss:$16 sps:$4 sm:$0xff]   ;;  %v579_v8 = vld [vmem:[%s856_s1 + $0x28] ss:$16 sps:$4 sm:$0xff]   ;;  %v580_v9 = vld [vmem:[%s856_s1 + $0x44] ss:$16 sps:$4 sm:$0xff]  }
   0x4   :  { %243 = vmatprep.subr.bf16.mxu0 %v574_v5  ;;  %316 = vmatprep.subr.bf16.mxu1 %v576_v6  ;;  %v582_v10 = vld [vmem:[%s856_s1 + $0x4c] ss:$16 sps:$4 sm:$0xff]   ;;  %v584_v11 = vld [vmem:[%s856_s1 + $0x40] ss:$16 sps:$4 sm:$0xff]   ;;  %v585_v12 = vld [vmem:[%s856_s1 + $0x48] ss:$16 sps:$4 sm:$0xff]  }
   0x5   :  { %v586_v13 = vld [vmem:[%s856_s1 + $0x64] ss:$16 sps:$4 sm:$0xff]   ;;  %v588_v14 = vld [vmem:[%s856_s1 + $0x6c] ss:$16 sps:$4 sm:$0xff]   ;;  %v590_v15 = vld [vmem:[%s856_s1 + $0x60] ss:$16 sps:$4 sm:$0xff]  }
   0x6   :  { %v591_v16 = vld [vmem:[%s856_s1 + $0x68] ss:$16 sps:$4 sm:$0xff]   ;;  %v592_v17 = vld [vmem:[%s856_s1 + $0x84] ss:$16 sps:$4 sm:$0xff]   ;;  %v594_v18 = vld [vmem:[%s856_s1 + $0x8c] ss:$16 sps:$4 sm:$0xff]  }
   0x7   :  { %244 = vmatpush1.bf16.msra.mxu0 %v578_v7  ;;  %317 = vmatpush1.bf16.msra.mxu1 %v579_v8  ;;  %v596_v19 = vld [vmem:[%s856_s1 + $0x80] ss:$16 sps:$4 sm:$0xff]   ;;  %v597_v20 = vld [vmem:[%s856_s1 + $0x88] ss:$16 sps:$4 sm:$0xff]   ;;  %v598_v21 = vld [vmem:[%s856_s1 + $0xa4] ss:$16 sps:$4 sm:$0xff]  }
   0x8   :  { %245 = vmatprep.subr.bf16.mxu0 %v580_v9  ;;  %318 = vmatprep.subr.bf16.mxu1 %v582_v10  ;;  %v600_v22 = vld [vmem:[%s856_s1 + $0xac] ss:$16 sps:$4 sm:$0xff]   ;;  %v602_v23 = vld [vmem:[%s856_s1 + $0xa0] ss:$16 sps:$4 sm:$0xff]   ;;  %v603_v24 = vld [vmem:[%s856_s1 + $0xa8] ss:$16 sps:$4 sm:$0xff]  }
   0x9   :  { %v604_v25 = vld [vmem:[%s856_s1 + $0xc4] ss:$16 sps:$4 sm:$0xff]   ;;  %v606_v26 = vld [vmem:[%s856_s1 + $0xcc] ss:$16 sps:$4 sm:$0xff]   ;;  %v608_v27 = vld [vmem:[%s856_s1 + $0xc0] ss:$16 sps:$4 sm:$0xff]  }
   0xa   :  { %v609_v28 = vld [vmem:[%s856_s1 + $0xc8] ss:$16 sps:$4 sm:$0xff]   ;;  %v610_v29 = vld [vmem:[%s856_s1 + $0xe4] ss:$16 sps:$4 sm:$0xff]   ;;  %v612_v30 = vld [vmem:[%s856_s1 + $0xec] ss:$16 sps:$4 sm:$0xff]  }
   0xb   :  { %246 = vmatpush1.bf16.msra.mxu0 %v584_v11  ;;  %319 = vmatpush1.bf16.msra.mxu1 %v585_v12  ;;  %v614_v31 = vld [vmem:[%s856_s1 + $0xe0] ss:$16 sps:$4 sm:$0xff]   ;;  %v615_v32 = vld [vmem:[%s856_s1 + $0xe8] ss:$16 sps:$4 sm:$0xff]   ;;  %v62_v46 = vshrl.u32 %v61_v45, 7 }
   0xc   :  { %247 = vmatprep.subr.bf16.mxu0 %v586_v13  ;;  %320 = vmatprep.subr.bf16.mxu1 %v588_v14  ;;  %v15_v33 = vld [vmem:[%s857_s0] sm:$0xff]  ;;  %v16_v34 = vld [vmem:[%s857_s0 + $0x8] sm:$0xff]  ;;  %v17_v36 = vld [vmem:[%s857_s0 + $0x10] sm:$0xff] }
   0xd   :  { %v23_v35 = vpack.c.bf16 %v16_v34, %v15_v33  ;;  %v18_v37 = vld [vmem:[%s857_s0 + $0x18] sm:$0xff]  ;;  %v19_v39 = vld [vmem:[%s857_s0 + $0x20] sm:$0xff]  ;;  %v20_v40 = vld [vmem:[%s857_s0 + $0x28] sm:$0xff]  ;;  %v63_v47 = vsub.s32 0, %v62_v46  ;;  %v71_v48 = vsub.s32 2, %v62_v46  ;;  %v67_v50 = vsub.s32 1, %v62_v46 }
   0xe   :  { %v24_v38 = vpack.c.bf16 %v18_v37, %v17_v36  ;;  %v25_v41 = vpack.c.bf16 %v20_v40, %v19_v39  ;;  %v21_v42 = vld [vmem:[%s857_s0 + $0x30] sm:$0xff]  ;;  %v22_v43 = vld [vmem:[%s857_s0 + $0x38] sm:$0xff]  ;;  %v59_v49 = vld [vmem:[%s858_s2] sm:$0xf]  ;;  %v75_v51 = vsub.s32 3, %v62_v46 }
   0xf   :  { %248 = vmatpush1.bf16.msra.mxu0 %v590_v15  ;;  %321 = vmatpush1.bf16.msra.mxu1 %v591_v16  ;;  %v26_v44 = vpack.c.bf16 %v22_v43, %v21_v42  ;;  %v768_v52 = vrot.slane %v59_v49, %v63_v47  ;;  %v770_v53 = vrot.slane %v59_v49, %v71_v48 }
  0x10   :  { %249 = vmatprep.subr.bf16.mxu0 %v592_v17  ;;  %322 = vmatprep.subr.bf16.mxu1 %v594_v18  ;;  %v772_v54 = vrot.slane %v59_v49, %v67_v50  ;;  %v774_v55 = vrot.slane %v59_v49, %v75_v51 }
  0x13   :  { %250 = vmatpush1.bf16.msra.mxu0 %v596_v19  ;;  %323 = vmatpush1.bf16.msra.mxu1 %v597_v20 }
  0x14   :  { %251 = vmatprep.subr.bf16.mxu0 %v598_v21  ;;  %324 = vmatprep.subr.bf16.mxu1 %v600_v22 }
  0x17   :  { %252 = vmatpush1.bf16.msra.mxu0 %v602_v23  ;;  %325 = vmatpush1.bf16.msra.mxu1 %v603_v24 }
  0x18   :  { %253 = vmatprep.subr.bf16.mxu0 %v604_v25  ;;  %326 = vmatprep.subr.bf16.mxu1 %v606_v26 }
  0x1b   :  { %254 = vmatpush1.bf16.msra.mxu0 %v608_v27  ;;  %327 = vmatpush1.bf16.msra.mxu1 %v609_v28 }
  0x1c   :  { %255 = vmatprep.subr.bf16.mxu0 %v610_v29  ;;  %328 = vmatprep.subr.bf16.mxu1 %v612_v30 }
  0x1f   :  { %256 = vmatpush1.bf16.msra.mxu0 %v614_v31  ;;  %329 = vmatpush1.bf16.msra.mxu1 %v615_v32 }
  0x22   :  { %274 = vmatmul.mubr.bf16.vlgmr.msra.gmra.mrb[0].mxu0 %v23_v35  ;;  %347 = vmatmul.mubr.bf16.vlgmr.msra.gmra.mrb[0].mxu1 %v23_v35 }
  0x23   :  { %283 = vmatprep.mubr.bf16.mxu0 %v616_v1  ;;  %356 = vmatprep.mubr.bf16.mxu1 %v616_v1 }
  0x2a   :  { %284 = vmatmul.mubr.bf16.gmra.mrb[4].mxu0 %v24_v38  ;;  %357 = vmatmul.mubr.bf16.gmra.mrb[4].mxu1 %v24_v38 }
  0x2b   :  { %293 = vmatprep.mubr.bf16.mxu0 %v616_v1  ;;  %366 = vmatprep.mubr.bf16.mxu1 %v616_v1 }
  0x32   :  { %294 = vmatmul.mubr.bf16.gmra.mrb[8].mxu0 %v25_v41  ;;  %367 = vmatmul.mubr.bf16.gmra.mrb[8].mxu1 %v25_v41 }
  0x33   :  { %303 = vmatprep.mubr.bf16.mxu0 %v616_v1  ;;  %376 = vmatprep.mubr.bf16.mxu1 %v616_v1 }
  0x3a   :  { %304 = vmatmul.mubr.bf16.gmra.mrb[12].mxu0 %v26_v44  ;;  %377 = vmatmul.mubr.bf16.gmra.mrb[12].mxu1 %v26_v44 }
  0xf5   :  { %v275_v56 = vpop.f32.mrb[0].mxu0  ;;  %v348_v57 = vpop.f32.mrb[0].mxu1 }
  0xf6   :  { %v276_v58 = vadd.f32 %v275_v56, %v768_v52  ;;  %v349_v59 = vadd.f32 %v348_v57, %v770_v53  ;;  %v277_v60 = vpop.f32.mrb[1].mxu0  ;;  %v350_v61 = vpop.f32.mrb[1].mxu1 }
  0xf7   :  { %v278_v62 = vadd.f32 %v277_v60, %v772_v54  ;;  %v351_v63 = vadd.f32 %v350_v61, %v774_v55  ;;  %v279_v0 = vpop.f32.mrb[2].mxu0  ;;  %v352_v1 = vpop.f32.mrb[2].mxu1 }
  0xf8   :  { %v280_v2 = vadd.f32 %v279_v0, %v768_v52  ;;  %v353_v3 = vadd.f32 %v352_v1, %v770_v53  ;;  %v281_v4 = vpop.f32.mrb[3].mxu0  ;;  %v354_v5 = vpop.f32.mrb[3].mxu1 }
  0xf9   :  { %v551_v6 = vpack.c.bf16 %v278_v62, %v276_v58  ;;  %v552_v7 = vpack.c.bf16 %v351_v63, %v349_v59  ;;  %v282_v8 = vadd.f32 %v281_v4, %v772_v54  ;;  %v355_v9 = vadd.f32 %v354_v5, %v774_v55 }
  0xfb   :  { %483 = vst [vmem:[%s859_s3] sm:$0xff] %v551_v6  ;;  %484 = vst [vmem:[%s859_s3 + $0x8] sm:$0xff] %v552_v7  ;;  %v553_v10 = vpack.c.bf16 %v282_v8, %v280_v2  ;;  %v554_v11 = vpack.c.bf16 %v355_v9, %v353_v3 }
  0xfd   :  { %485 = vst [vmem:[%s859_s3 + $0x10] sm:$0xff] %v553_v10  ;;  %486 = vst [vmem:[%s859_s3 + $0x18] sm:$0xff] %v554_v11  ;;  %v285_v12 = vpop.f32.mrb[4].mxu0  ;;  %v358_v13 = vpop.f32.mrb[4].mxu1 }
  0xfe   :  { %v286_v14 = vadd.f32 %v285_v12, %v768_v52  ;;  %v359_v15 = vadd.f32 %v358_v13, %v770_v53  ;;  %v287_v16 = vpop.f32.mrb[5].mxu0  ;;  %v360_v17 = vpop.f32.mrb[5].mxu1 }
  0xff   :  { %v288_v18 = vadd.f32 %v287_v16, %v772_v54  ;;  %v361_v19 = vadd.f32 %v360_v17, %v774_v55  ;;  %v289_v20 = vpop.f32.mrb[6].mxu0  ;;  %v362_v21 = vpop.f32.mrb[6].mxu1 }
 0x100   :  { %v290_v22 = vadd.f32 %v289_v20, %v768_v52  ;;  %v363_v23 = vadd.f32 %v362_v21, %v770_v53  ;;  %v291_v24 = vpop.f32.mrb[7].mxu0  ;;  %v364_v25 = vpop.f32.mrb[7].mxu1 }
 0x101   :  { %v555_v26 = vpack.c.bf16 %v288_v18, %v286_v14  ;;  %v556_v27 = vpack.c.bf16 %v361_v19, %v359_v15  ;;  %v292_v28 = vadd.f32 %v291_v24, %v772_v54  ;;  %v365_v29 = vadd.f32 %v364_v25, %v774_v55 }
 0x103   :  { %487 = vst [vmem:[%s859_s3 + $0x20] sm:$0xff] %v555_v26  ;;  %488 = vst [vmem:[%s859_s3 + $0x28] sm:$0xff] %v556_v27  ;;  %v557_v30 = vpack.c.bf16 %v292_v28, %v290_v22  ;;  %v558_v31 = vpack.c.bf16 %v365_v29, %v363_v23 }
 0x105   :  { %489 = vst [vmem:[%s859_s3 + $0x30] sm:$0xff] %v557_v30  ;;  %490 = vst [vmem:[%s859_s3 + $0x38] sm:$0xff] %v558_v31  ;;  %v295_v32 = vpop.f32.mrb[8].mxu0  ;;  %v368_v33 = vpop.f32.mrb[8].mxu1 }
 0x106   :  { %v296_v34 = vadd.f32 %v295_v32, %v768_v52  ;;  %v369_v35 = vadd.f32 %v368_v33, %v770_v53  ;;  %v297_v36 = vpop.f32.mrb[9].mxu0  ;;  %v370_v37 = vpop.f32.mrb[9].mxu1 }
 0x107   :  { %v298_v38 = vadd.f32 %v297_v36, %v772_v54  ;;  %v371_v39 = vadd.f32 %v370_v37, %v774_v55  ;;  %v299_v40 = vpop.f32.mrb[10].mxu0  ;;  %v372_v41 = vpop.f32.mrb[10].mxu1 }
 0x108   :  { %v300_v42 = vadd.f32 %v299_v40, %v768_v52  ;;  %v373_v43 = vadd.f32 %v372_v41, %v770_v53  ;;  %v301_v44 = vpop.f32.mrb[11].mxu0  ;;  %v374_v45 = vpop.f32.mrb[11].mxu1 }
 0x109   :  { %v559_v46 = vpack.c.bf16 %v298_v38, %v296_v34  ;;  %v560_v47 = vpack.c.bf16 %v371_v39, %v369_v35  ;;  %v302_v48 = vadd.f32 %v301_v44, %v772_v54  ;;  %v375_v49 = vadd.f32 %v374_v45, %v774_v55 }
 0x10b   :  { %491 = vst [vmem:[%s859_s3 + $0x40] sm:$0xff] %v559_v46  ;;  %492 = vst [vmem:[%s859_s3 + $0x48] sm:$0xff] %v560_v47  ;;  %v561_v50 = vpack.c.bf16 %v302_v48, %v300_v42  ;;  %v562_v51 = vpack.c.bf16 %v375_v49, %v373_v43 }
 0x10d   :  { %493 = vst [vmem:[%s859_s3 + $0x50] sm:$0xff] %v561_v50  ;;  %494 = vst [vmem:[%s859_s3 + $0x58] sm:$0xff] %v562_v51  ;;  %v305_v56 = vpop.f32.mrb[12].mxu0  ;;  %v378_v57 = vpop.f32.mrb[12].mxu1 }
 0x10e   :  { %v306_v58 = vadd.f32 %v305_v56, %v768_v52  ;;  %v379_v59 = vadd.f32 %v378_v57, %v770_v53  ;;  %v307_v60 = vpop.f32.mrb[13].mxu0  ;;  %v380_v61 = vpop.f32.mrb[13].mxu1 }
 0x10f   :  { %v308_v62 = vadd.f32 %v307_v60, %v772_v54  ;;  %v381_v63 = vadd.f32 %v380_v61, %v774_v55  ;;  %v309_v0 = vpop.f32.mrb[14].mxu0  ;;  %v382_v1 = vpop.f32.mrb[14].mxu1 }
 0x110   :  { %v310_v2 = vadd.f32 %v309_v0, %v768_v52  ;;  %v383_v3 = vadd.f32 %v382_v1, %v770_v53  ;;  %v311_v4 = vpop.f32.mrb[15].mxu0  ;;  %v384_v5 = vpop.f32.mrb[15].mxu1 }
 0x111   :  { %v563_v6 = vpack.c.bf16 %v308_v62, %v306_v58  ;;  %v564_v7 = vpack.c.bf16 %v381_v63, %v379_v59  ;;  %v312_v8 = vadd.f32 %v311_v4, %v772_v54  ;;  %v385_v9 = vadd.f32 %v384_v5, %v774_v55 }
 0x113   :  { %495 = vst [vmem:[%s859_s3 + $0x60] sm:$0xff] %v563_v6  ;;  %496 = vst [vmem:[%s859_s3 + $0x68] sm:$0xff] %v564_v7  ;;  %v565_v10 = vpack.c.bf16 %v312_v8, %v310_v2  ;;  %v566_v52 = vpack.c.bf16 %v385_v9, %v383_v3 }
 0x115   :  { %497 = vst [vmem:[%s859_s3 + $0x70] sm:$0xff] %v565_v10  ;;  %498 = vst [vmem:[%s859_s3 + $0x78] sm:$0xff] %v566_v52 }

// kernel: rnn_model_forward.6
= control target key start
LH: loop header
LB: loop body
LE: loop exit
PB: predicated region body
PF: predicated region fallthrough
CT: control target
= control target key end

     0   :  { %v5322_v0 = vmov 0.0   ;;  %vm5323_vm0 = vmmov 0   ;;  %s6565_s1 = inlined_call_operand.vmem [shape: bf16[128,512], index: 1, kind: input, shape index: {}]   ;;  %s6566_s2 = inlined_call_operand.vmem [shape: f32[8,128], index: 2, kind: input, shape index: {}]   ;;  %s6567_s0 = inlined_call_operand.vmem [shape: bf16[8,8,512], index: 0, kind: input, shape index: {}]   ;;  %s6568_s3 = inlined_call_operand.vmem [shape: f32[8,128], index: 3, kind: input, shape index: {}]   ;;  %s6569_s4 = inlined_call_operand.vmem [shape: f32[8,8,128], index: 4, kind: output, shape index: {0}]   ;;  %s6570_s6 = inlined_call_operand.vmem [shape: f32[8,128], index: 6, kind: output, shape index: {2}]   ;;  %s6571_s5 = inlined_call_operand.vmem [shape: f32[8,128], index: 5, kind: output, shape index: {1}]  }
   0x1   :  { %4296 = vmatprep.subr.bf16.mxu0 %v5322_v0  ;;  %4316 = vmatprep.subr.bf16.mxu1 %v5322_v0  ;;  %v4938_v1 = vld [vmem:[%s6565_s1] ss:$16 sps:$4 sm:$0xff]   ;;  %v4939_v2 = vld [vmem:[%s6565_s1 + $0x4] ss:$16 sps:$4 sm:$0xff]   ;;  %v4954_v19 = vld [vmem:[%s6565_s1 + $0x8] ss:$16 sps:$4 sm:$0xff]  }
   0x2   :  { %4312 = vmatprep.mubr.msk.bf16.mxu0 %vm5323_vm0, %v5322_v0  ;;  %4332 = vmatprep.mubr.msk.bf16.mxu1 %vm5323_vm0, %v5322_v0  ;;  %v4940_v3 = vld [vmem:[%s6565_s1 + $0x20] ss:$16 sps:$4 sm:$0xff]   ;;  %v4941_v4 = vld [vmem:[%s6565_s1 + $0x24] ss:$16 sps:$4 sm:$0xff]   ;;  %v4955_v20 = vld [vmem:[%s6565_s1 + $0xc] ss:$16 sps:$4 sm:$0xff]  }
   0x3   :  { %4297 = vmatpush3.bf16.msra.mxu0 %v4938_v1  ;;  %4317 = vmatpush3.bf16.msra.mxu1 %v4939_v2  ;;  %v4942_v5 = vld [vmem:[%s6565_s1 + $0x40] ss:$16 sps:$4 sm:$0xff]   ;;  %v4943_v6 = vld [vmem:[%s6565_s1 + $0x44] ss:$16 sps:$4 sm:$0xff]   ;;  %v4956_v21 = vld [vmem:[%s6565_s1 + $0x28] ss:$16 sps:$4 sm:$0xff]  }
   0x4   :  { %4298 = vmatprep.subr.bf16.mxu0 %v5322_v0  ;;  %4318 = vmatprep.subr.bf16.mxu1 %v5322_v0  ;;  %v4944_v7 = vld [vmem:[%s6565_s1 + $0x60] ss:$16 sps:$4 sm:$0xff]   ;;  %v4945_v8 = vld [vmem:[%s6565_s1 + $0x64] ss:$16 sps:$4 sm:$0xff]   ;;  %v4957_v22 = vld [vmem:[%s6565_s1 + $0x2c] ss:$16 sps:$4 sm:$0xff]  }
   0x5   :  { %v4946_v9 = vld [vmem:[%s6565_s1 + $0x80] ss:$16 sps:$4 sm:$0xff]   ;;  %v4947_v10 = vld [vmem:[%s6565_s1 + $0x84] ss:$16 sps:$4 sm:$0xff]   ;;  %v4958_v23 = vld [vmem:[%s6565_s1 + $0x48] ss:$16 sps:$4 sm:$0xff]  }
   0x6   :  { %v4948_v11 = vld [vmem:[%s6565_s1 + $0xa0] ss:$16 sps:$4 sm:$0xff]   ;;  %v4949_v12 = vld [vmem:[%s6565_s1 + $0xa4] ss:$16 sps:$4 sm:$0xff]   ;;  %v4959_v24 = vld [vmem:[%s6565_s1 + $0x4c] ss:$16 sps:$4 sm:$0xff]  }
   0x7   :  { %4299 = vmatpush3.bf16.msra.mxu0 %v4940_v3  ;;  %4319 = vmatpush3.bf16.msra.mxu1 %v4941_v4  ;;  %v4950_v13 = vld [vmem:[%s6565_s1 + $0xc0] ss:$16 sps:$4 sm:$0xff]   ;;  %v4951_v14 = vld [vmem:[%s6565_s1 + $0xc4] ss:$16 sps:$4 sm:$0xff]   ;;  %v4960_v25 = vld [vmem:[%s6565_s1 + $0x68] ss:$16 sps:$4 sm:$0xff]  }
   0x8   :  { %4300 = vmatprep.subr.bf16.mxu0 %v5322_v0  ;;  %4320 = vmatprep.subr.bf16.mxu1 %v5322_v0  ;;  %v4952_v15 = vld [vmem:[%s6565_s1 + $0xe0] ss:$16 sps:$4 sm:$0xff]   ;;  %v4953_v17 = vld [vmem:[%s6565_s1 + $0xe4] ss:$16 sps:$4 sm:$0xff]   ;;  %v4961_v26 = vld [vmem:[%s6565_s1 + $0x6c] ss:$16 sps:$4 sm:$0xff]  }
   0x9   :  { %v25_v16 = vld [vmem:[%s6566_s2] sm:$0xff]  ;;  %v4962_v27 = vld [vmem:[%s6565_s1 + $0x88] ss:$16 sps:$4 sm:$0xff]   ;;  %v4963_v28 = vld [vmem:[%s6565_s1 + $0x8c] ss:$16 sps:$4 sm:$0xff]  }
   0xa   :  { %v31_v18 = vpack.c.bf16 %v25_v16, %v25_v16  ;;  %v4964_v29 = vld [vmem:[%s6565_s1 + $0xa8] ss:$16 sps:$4 sm:$0xff]   ;;  %v4965_v30 = vld [vmem:[%s6565_s1 + $0xac] ss:$16 sps:$4 sm:$0xff]   ;;  %v4970_v35 = vld [vmem:[%s6565_s1] ss:$16 sps:$4 sm:$0xff]  }
   0xb   :  { %4301 = vmatpush3.bf16.msra.mxu0 %v4942_v5  ;;  %4321 = vmatpush3.bf16.msra.mxu1 %v4943_v6  ;;  %v4966_v31 = vld [vmem:[%s6565_s1 + $0xc8] ss:$16 sps:$4 sm:$0xff]   ;;  %v4967_v32 = vld [vmem:[%s6565_s1 + $0xcc] ss:$16 sps:$4 sm:$0xff]   ;;  %v4971_v36 = vld [vmem:[%s6565_s1 + $0x4] ss:$16 sps:$4 sm:$0xff]  }
   0xc   :  { %4302 = vmatprep.subr.bf16.mxu0 %v5322_v0  ;;  %4322 = vmatprep.subr.bf16.mxu1 %v5322_v0  ;;  %v4968_v33 = vld [vmem:[%s6565_s1 + $0xe8] ss:$16 sps:$4 sm:$0xff]   ;;  %v4969_v34 = vld [vmem:[%s6565_s1 + $0xec] ss:$16 sps:$4 sm:$0xff]   ;;  %v4972_v37 = vld [vmem:[%s6565_s1 + $0x20] ss:$16 sps:$4 sm:$0xff]  }
   0xd   :  { %v4973_v38 = vld [vmem:[%s6565_s1 + $0x24] ss:$16 sps:$4 sm:$0xff]   ;;  %v4974_v39 = vld [vmem:[%s6565_s1 + $0x40] ss:$16 sps:$4 sm:$0xff]   ;;  %v366_v6 = vld [vmem:[%s6567_s0 + $0xc] sm:$0xf] }
   0xe   :  { %v4975_v40 = vld [vmem:[%s6565_s1 + $0x44] ss:$16 sps:$4 sm:$0xff]   ;;  %v4976_v41 = vld [vmem:[%s6565_s1 + $0x60] ss:$16 sps:$4 sm:$0xff]  }
   0xf   :  { %4303 = vmatpush3.bf16.msra.mxu0 %v4944_v7  ;;  %4323 = vmatpush3.bf16.msra.mxu1 %v4945_v8  ;;  %v4977_v42 = vld [vmem:[%s6565_s1 + $0x64] ss:$16 sps:$4 sm:$0xff]   ;;  %v4978_v43 = vld [vmem:[%s6565_s1 + $0x80] ss:$16 sps:$4 sm:$0xff]  }
  0x10   :  { %4304 = vmatprep.subr.bf16.mxu0 %v5322_v0  ;;  %4324 = vmatprep.subr.bf16.mxu1 %v5322_v0  ;;  %v4979_v44 = vld [vmem:[%s6565_s1 + $0x84] ss:$16 sps:$4 sm:$0xff]   ;;  %v4980_v45 = vld [vmem:[%s6565_s1 + $0xa0] ss:$16 sps:$4 sm:$0xff]  }
  0x11   :  { %v4981_v46 = vld [vmem:[%s6565_s1 + $0xa4] ss:$16 sps:$4 sm:$0xff]   ;;  %v4982_v47 = vld [vmem:[%s6565_s1 + $0xc0] ss:$16 sps:$4 sm:$0xff]  }
  0x12   :  { %v4983_v48 = vld [vmem:[%s6565_s1 + $0xc4] ss:$16 sps:$4 sm:$0xff]   ;;  %v4984_v49 = vld [vmem:[%s6565_s1 + $0xe0] ss:$16 sps:$4 sm:$0xff]  }
  0x13   :  { %4305 = vmatpush3.bf16.msra.mxu0 %v4946_v9  ;;  %4325 = vmatpush3.bf16.msra.mxu1 %v4947_v10  ;;  %v4985_v50 = vld [vmem:[%s6565_s1 + $0xe4] ss:$16 sps:$4 sm:$0xff]   ;;  %v32_v55 = vld [vmem:[%s6567_s0] sm:$0xf]  ;;  %v367_v10 = vunpack.c.l.bf16 %v366_v6 }
  0x14   :  { %4306 = vmatprep.subr.bf16.mxu0 %v5322_v0  ;;  %4326 = vmatprep.subr.bf16.mxu1 %v5322_v0  ;;  %v145_v52 = vld [vmem:[%s6567_s0 + $0x4] sm:$0xff]   ;;  %v33_v62 = vunpack.c.l.bf16 %v32_v55  ;;  %v5006_v55 = vld [vmem:[%s6565_s1 + $0x40] ss:$16 sps:$4 sm:$0xff]  }
  0x15   :  { %v146_v60 = vunpack.c.l.bf16 %v145_v52  ;;  %v259_v8 = vunpack.c.h.bf16 %v145_v52  ;;  %v5003_v52 = vld [vmem:[%s6565_s1 + $0x4] ss:$16 sps:$4 sm:$0xff]  }
  0x16   :  { %v3728_v6 = vld [vmem:[%s6567_s0 + $0x10] sm:$0xff]  }
  0x17   :  { %4307 = vmatpush3.bf16.msra.mxu0 %v4948_v11  ;;  %4327 = vmatpush3.bf16.msra.mxu1 %v4949_v12 }
  0x18   :  { %4308 = vmatprep.subr.bf16.mxu0 %v5322_v0  ;;  %4328 = vmatprep.subr.bf16.mxu1 %v5322_v0 }
  0x1b   :  { %4309 = vmatpush3.bf16.msra.mxu0 %v4950_v13  ;;  %4329 = vmatpush3.bf16.msra.mxu1 %v4951_v14 }
  0x1c   :  { %4310 = vmatprep.subr.bf16.mxu0 %v5322_v0  ;;  %4330 = vmatprep.subr.bf16.mxu1 %v5322_v0 }
  0x1f   :  { %4311 = vmatpush3.bf16.msra.mxu0 %v4952_v15  ;;  %4331 = vmatpush3.bf16.msra.mxu1 %v4953_v17 }
  0x20   :  { %4336 = vmatprep.subr.bf16.mxu0 %v5322_v0  ;;  %4356 = vmatprep.subr.bf16.mxu1 %v5322_v0 }
  0x22   :  { %4313 = vmatmul.mubr.bf16.vlgmr.msra.gmra.mrb[0].mxu0 %v31_v18  ;;  %4333 = vmatmul.mubr.bf16.vlgmr.msra.gmra.mrb[0].mxu1 %v31_v18 }
  0x23   :  { %4337 = vmatpush3.bf16.msra.mxu0 %v4954_v19  ;;  %4357 = vmatpush3.bf16.msra.mxu1 %v4955_v20 }
  0x24   :  { %4338 = vmatprep.subr.bf16.mxu0 %v5322_v0  ;;  %4358 = vmatprep.subr.bf16.mxu1 %v5322_v0 }
  0x25   :  { %4352 = vmatprep.mubr.msk.bf16.mxu0 %vm5323_vm0, %v5322_v0  ;;  %4372 = vmatprep.mubr.msk.bf16.mxu1 %vm5323_vm0, %v5322_v0 }
  0x27   :  { %4339 = vmatpush3.bf16.msra.mxu0 %v4956_v21  ;;  %4359 = vmatpush3.bf16.msra.mxu1 %v4957_v22 }
  0x28   :  { %4340 = vmatprep.subr.bf16.mxu0 %v5322_v0  ;;  %4360 = vmatprep.subr.bf16.mxu1 %v5322_v0 }
  0x2b   :  { %4341 = vmatpush3.bf16.msra.mxu0 %v4958_v23  ;;  %4361 = vmatpush3.bf16.msra.mxu1 %v4959_v24  ;;  %v27_v23 = vld [vmem:[%s6568_s3] sm:$0xff] }
  0x2c   :  { %4342 = vmatprep.subr.bf16.mxu0 %v5322_v0  ;;  %4362 = vmatprep.subr.bf16.mxu1 %v5322_v0 }
  0x2f   :  { %4343 = vmatpush3.bf16.msra.mxu0 %v4960_v25  ;;  %4363 = vmatpush3.bf16.msra.mxu1 %v4961_v26 }
  0x30   :  { %4344 = vmatprep.subr.bf16.mxu0 %v5322_v0  ;;  %4364 = vmatprep.subr.bf16.mxu1 %v5322_v0 }
  0x33   :  { %4345 = vmatpush3.bf16.msra.mxu0 %v4962_v27  ;;  %4365 = vmatpush3.bf16.msra.mxu1 %v4963_v28 }
  0x34   :  { %4346 = vmatprep.subr.bf16.mxu0 %v5322_v0  ;;  %4366 = vmatprep.subr.bf16.mxu1 %v5322_v0 }
  0x37   :  { %4347 = vmatpush3.bf16.msra.mxu0 %v4964_v29  ;;  %4367 = vmatpush3.bf16.msra.mxu1 %v4965_v30 }
  0x38   :  { %4348 = vmatprep.subr.bf16.mxu0 %v5322_v0  ;;  %4368 = vmatprep.subr.bf16.mxu1 %v5322_v0 }
  0x3b   :  { %4349 = vmatpush3.bf16.msra.mxu0 %v4966_v31  ;;  %4369 = vmatpush3.bf16.msra.mxu1 %v4967_v32 }
  0x3c   :  { %4350 = vmatprep.subr.bf16.mxu0 %v5322_v0  ;;  %4370 = vmatprep.subr.bf16.mxu1 %v5322_v0 }
  0x3f   :  { %4351 = vmatpush3.bf16.msra.mxu0 %v4968_v33  ;;  %4371 = vmatpush3.bf16.msra.mxu1 %v4969_v34  ;;  %v4986_v34 = vld [vmem:[%s6565_s1 + $0x8] ss:$16 sps:$4 sm:$0xff]  }
  0x40   :  { %4376 = vmatprep.subr.bf16.mxu0 %v5322_v0  ;;  %4396 = vmatprep.subr.bf16.mxu1 %v5322_v0 }
  0x42   :  { %4353 = vmatmul.mubr.bf16.vlgmr.msra.gmra.mrb[4].mxu0 %v31_v18  ;;  %4373 = vmatmul.mubr.bf16.vlgmr.msra.gmra.mrb[4].mxu1 %v31_v18 }
  0x43   :  { %4392 = vmatprep.mubr.msk.bf16.mxu0 %vm5323_vm0, %v5322_v0  ;;  %4412 = vmatprep.mubr.msk.bf16.mxu1 %vm5323_vm0, %v5322_v0 }
  0x44   :  { %4377 = vmatpush3.bf16.msra.mxu0 %v4970_v35  ;;  %4397 = vmatpush3.bf16.msra.mxu1 %v4971_v36  ;;  %v4987_v35 = vld [vmem:[%s6565_s1 + $0xc] ss:$16 sps:$4 sm:$0xff]  }
  0x45   :  { %4378 = vmatprep.subr.bf16.mxu0 %v5322_v0  ;;  %4398 = vmatprep.subr.bf16.mxu1 %v5322_v0 }
  0x48   :  { %4379 = vmatpush3.bf16.msra.mxu0 %v4972_v37  ;;  %4399 = vmatpush3.bf16.msra.mxu1 %v4973_v38  ;;  %v4988_v37 = vld [vmem:[%s6565_s1 + $0x28] ss:$16 sps:$4 sm:$0xff]   ;;  %v4989_v38 = vld [vmem:[%s6565_s1 + $0x2c] ss:$16 sps:$4 sm:$0xff]  }
  0x49   :  { %4380 = vmatprep.subr.bf16.mxu0 %v5322_v0  ;;  %4400 = vmatprep.subr.bf16.mxu1 %v5322_v0 }
  0x4c   :  { %4381 = vmatpush3.bf16.msra.mxu0 %v4974_v39  ;;  %4401 = vmatpush3.bf16.msra.mxu1 %v4975_v40  ;;  %v4990_v39 = vld [vmem:[%s6565_s1 + $0x48] ss:$16 sps:$4 sm:$0xff]   ;;  %v4991_v40 = vld [vmem:[%s6565_s1 + $0x4c] ss:$16 sps:$4 sm:$0xff]  }
  0x4d   :  { %4382 = vmatprep.subr.bf16.mxu0 %v5322_v0  ;;  %4402 = vmatprep.subr.bf16.mxu1 %v5322_v0 }
  0x50   :  { %4383 = vmatpush3.bf16.msra.mxu0 %v4976_v41  ;;  %4403 = vmatpush3.bf16.msra.mxu1 %v4977_v42  ;;  %v4992_v41 = vld [vmem:[%s6565_s1 + $0x68] ss:$16 sps:$4 sm:$0xff]   ;;  %v4993_v42 = vld [vmem:[%s6565_s1 + $0x6c] ss:$16 sps:$4 sm:$0xff]  }
  0x51   :  { %4384 = vmatprep.subr.bf16.mxu0 %v5322_v0  ;;  %4404 = vmatprep.subr.bf16.mxu1 %v5322_v0 }
  0x54   :  { %4385 = vmatpush3.bf16.msra.mxu0 %v4978_v43  ;;  %4405 = vmatpush3.bf16.msra.mxu1 %v4979_v44  ;;  %v4994_v43 = vld [vmem:[%s6565_s1 + $0x88] ss:$16 sps:$4 sm:$0xff]   ;;  %v4995_v44 = vld [vmem:[%s6565_s1 + $0x8c] ss:$16 sps:$4 sm:$0xff]  }
  0x55   :  { %4386 = vmatprep.subr.bf16.mxu0 %v5322_v0  ;;  %4406 = vmatprep.subr.bf16.mxu1 %v5322_v0 }
  0x58   :  { %4387 = vmatpush3.bf16.msra.mxu0 %v4980_v45  ;;  %4407 = vmatpush3.bf16.msra.mxu1 %v4981_v46  ;;  %v4996_v45 = vld [vmem:[%s6565_s1 + $0xa8] ss:$16 sps:$4 sm:$0xff]   ;;  %v4997_v46 = vld [vmem:[%s6565_s1 + $0xac] ss:$16 sps:$4 sm:$0xff]  }
  0x59   :  { %4388 = vmatprep.subr.bf16.mxu0 %v5322_v0  ;;  %4408 = vmatprep.subr.bf16.mxu1 %v5322_v0 }
  0x5c   :  { %4389 = vmatpush3.bf16.msra.mxu0 %v4982_v47  ;;  %4409 = vmatpush3.bf16.msra.mxu1 %v4983_v48  ;;  %v4998_v47 = vld [vmem:[%s6565_s1 + $0xc8] ss:$16 sps:$4 sm:$0xff]   ;;  %v4999_v48 = vld [vmem:[%s6565_s1 + $0xcc] ss:$16 sps:$4 sm:$0xff]  }
  0x5d   :  { %4390 = vmatprep.subr.bf16.mxu0 %v5322_v0  ;;  %4410 = vmatprep.subr.bf16.mxu1 %v5322_v0 }
  0x60   :  { %4391 = vmatpush3.bf16.msra.mxu0 %v4984_v49  ;;  %4411 = vmatpush3.bf16.msra.mxu1 %v4985_v50  ;;  %v5000_v49 = vld [vmem:[%s6565_s1 + $0xe8] ss:$16 sps:$4 sm:$0xff]   ;;  %v5001_v50 = vld [vmem:[%s6565_s1 + $0xec] ss:$16 sps:$4 sm:$0xff]  }
  0x61   :  { %4416 = vmatprep.subr.bf16.mxu0 %v5322_v0  ;;  %4436 = vmatprep.subr.bf16.mxu1 %v5322_v0 }
  0xf5   :  { %v132_v51 = vpop.f32.mrb[0].mxu0  ;;  %v245_v53 = vpop.f32.mrb[0].mxu1 }
  0xf6   :  { %v4314_v54 = vpop.f32.mrb[1].mxu0  ;;  %v4334_v56 = vpop.f32.mrb[1].mxu1  ;;  %v251_v63 = vadd.f32 %v245_v53, %v146_v60  ;;  %v138_v1 = vadd.f32 %v132_v51, %v33_v62  ;;  %v5002_v51 = vld [vmem:[%s6565_s1] ss:$16 sps:$4 sm:$0xff]   ;;  %v5011_v60 = vld [vmem:[%s6565_s1 + $0x84] ss:$16 sps:$4 sm:$0xff]  }
  0xf7   :  { %v135_v57 = vpop.f32.mrb[2].mxu0  ;;  %v248_v58 = vpop.f32.mrb[2].mxu1  ;;  %v5004_v53 = vld [vmem:[%s6565_s1 + $0x20] ss:$16 sps:$4 sm:$0xff]   ;;  %v5005_v54 = vld [vmem:[%s6565_s1 + $0x24] ss:$16 sps:$4 sm:$0xff]  }
  0xf8   :  { %v4315_v59 = vpop.f32.mrb[3].mxu0  ;;  %v4335_v61 = vpop.f32.mrb[3].mxu1  ;;  %v3710_v2 = vmul.f32 -1.442695, %v251_v63  ;;  %v3701_v3 = vmul.f32 -1.442695, %v138_v1 }
  0xf9   :  { %v5007_v56 = vld [vmem:[%s6565_s1 + $0x44] ss:$16 sps:$4 sm:$0xff]   ;;  %v5008_v57 = vld [vmem:[%s6565_s1 + $0x60] ss:$16 sps:$4 sm:$0xff]  }
  0xfa   :  { %5194 = vpow2.f32 %v3710_v2  ;;  %v5009_v58 = vld [vmem:[%s6565_s1 + $0x64] ss:$16 sps:$4 sm:$0xff]   ;;  %v5010_v59 = vld [vmem:[%s6565_s1 + $0x80] ss:$16 sps:$4 sm:$0xff]  }
  0xfb   :  { %5196 = vpow2.f32 %v3701_v3  ;;  %v5012_v61 = vld [vmem:[%s6565_s1 + $0xa0] ss:$16 sps:$4 sm:$0xff]   ;;  %v5013_v62 = vld [vmem:[%s6565_s1 + $0xa4] ss:$16 sps:$4 sm:$0xff]  }
  0xfc   :  { %v5014_v63 = vld [vmem:[%s6565_s1 + $0xc0] ss:$16 sps:$4 sm:$0xff]   ;;  %v5015_v1 = vld [vmem:[%s6565_s1 + $0xc4] ss:$16 sps:$4 sm:$0xff]  }
  0xfd   :  { %v5016_v2 = vld [vmem:[%s6565_s1 + $0xe0] ss:$16 sps:$4 sm:$0xff]   ;;  %v5017_v3 = vld [vmem:[%s6565_s1 + $0xe4] ss:$16 sps:$4 sm:$0xff]  }
 0x104   :  { %v5195_v4 = vpop.eup %5194 }
 0x105   :  { %v5197_v5 = vpop.eup %5196  ;;  %v255_v7 = vadd.f32 1.0, %v5195_v4 }
 0x106   :  { %v142_v9 = vadd.f32 1.0, %v5197_v5 }
 0x107   :  { %5198 = vrcp.f32 %v255_v7 }
 0x108   :  { %5200 = vrcp.f32 %v142_v9 }
 0x111   :  { %v5199_v22 = vpop.eup %5198 }
 0x112   :  { %v5201_v24 = vpop.eup %5200  ;;  %v479_v26 = vmul.f32 %v5199_v22, %v27_v23 }
 0x115   :  { %v358_v11 = vpop.f32.mrb[4].mxu0  ;;  %v466_v13 = vpop.f32.mrb[4].mxu1 }
 0x116   :  { %v364_v12 = vadd.f32 %v358_v11, %v259_v8  ;;  %v4354_v14 = vpop.f32.mrb[5].mxu0  ;;  %v472_v15 = vadd.f32 %v466_v13, %v367_v10  ;;  %v4374_v16 = vpop.f32.mrb[5].mxu1  ;;  %v601_v13 = vunpack.c.h.bf16 %v3728_v6 }
 0x117   :  { %v361_v17 = vpop.f32.mrb[6].mxu0  ;;  %v469_v18 = vpop.f32.mrb[6].mxu1  ;;  %v488_v14 = vunpack.c.l.bf16 %v3728_v6  ;;  %v5038_v6 = vld [vmem:[%s6565_s1 + $0x40] ss:$16 sps:$4 sm:$0xff]  }
 0x118   :  { %5202 = vtanh.f32 %v364_v12  ;;  %v4355_v19 = vpop.f32.mrb[7].mxu0  ;;  %v3727_v20 = vmul.f32 -1.442695, %v472_v15  ;;  %v4375_v21 = vpop.f32.mrb[7].mxu1 }
 0x11a   :  { %5204 = vpow2.f32 %v3727_v20  ;;  %v3748_v20 = vld [vmem:[%s6567_s0 + $0x18] sm:$0xff]  }
 0x11b   :  { %v714_v23 = vunpack.c.l.bf16 %v3748_v20 }
 0x122   :  { %v5203_v25 = vpop.eup %5202 }
 0x123   :  { %v480_v27 = vmul.f32 %v5203_v25, %v5201_v24  ;;  %v822_v24 = vunpack.c.h.bf16 %v3748_v20  ;;  %v3768_v20 = vld [vmem:[%s6567_s0 + $0x20] sm:$0xff]  }
 0x124   :  { %v5205_v28 = vpop.eup %5204 }
 0x125   :  { %v5580_v29 = vadd.f32 %v480_v27, %v479_v26  ;;  %v476_v30 = vadd.f32 1.0, %v5205_v28 }
 0x127   :  { %5206 = vtanh.f32 %v5580_v29 }
 0x128   :  { %5208 = vrcp.f32 %v476_v30 }
 0x131   :  { %v5207_v31 = vpop.eup %5206 }
 0x132   :  { %v5209_v32 = vpop.eup %5208 }
 0x133   :  { %v483_v33 = vmul.f32 %v5209_v32, %v5207_v31 }
 0x135   :  { %484 = vst [vmem:[%s6569_s4] sm:$0xff] %v483_v33  ;;  %v485_v36 = vpack.c.bf16 %v483_v33, %v483_v33 }
 0x137   :  { %4393 = vmatmul.mubr.bf16.vlgmr.msra.gmra.mrb[8].mxu0 %v485_v36  ;;  %4413 = vmatmul.mubr.bf16.vlgmr.msra.gmra.mrb[8].mxu1 %v485_v36 }
 0x138   :  { %4417 = vmatpush3.bf16.msra.mxu0 %v4986_v34  ;;  %4437 = vmatpush3.bf16.msra.mxu1 %v4987_v35 }
 0x139   :  { %4418 = vmatprep.subr.bf16.mxu0 %v5322_v0  ;;  %4438 = vmatprep.subr.bf16.mxu1 %v5322_v0 }
 0x13a   :  { %4432 = vmatprep.mubr.msk.bf16.mxu0 %vm5323_vm0, %v5322_v0  ;;  %4452 = vmatprep.mubr.msk.bf16.mxu1 %vm5323_vm0, %v5322_v0 }
 0x13c   :  { %4419 = vmatpush3.bf16.msra.mxu0 %v4988_v37  ;;  %4439 = vmatpush3.bf16.msra.mxu1 %v4989_v38 }
 0x13d   :  { %4420 = vmatprep.subr.bf16.mxu0 %v5322_v0  ;;  %4440 = vmatprep.subr.bf16.mxu1 %v5322_v0 }
 0x140   :  { %4421 = vmatpush3.bf16.msra.mxu0 %v4990_v39  ;;  %4441 = vmatpush3.bf16.msra.mxu1 %v4991_v40 }
 0x141   :  { %4422 = vmatprep.subr.bf16.mxu0 %v5322_v0  ;;  %4442 = vmatprep.subr.bf16.mxu1 %v5322_v0 }
 0x144   :  { %4423 = vmatpush3.bf16.msra.mxu0 %v4992_v41  ;;  %4443 = vmatpush3.bf16.msra.mxu1 %v4993_v42 }
 0x145   :  { %4424 = vmatprep.subr.bf16.mxu0 %v5322_v0  ;;  %4444 = vmatprep.subr.bf16.mxu1 %v5322_v0 }
 0x148   :  { %4425 = vmatpush3.bf16.msra.mxu0 %v4994_v43  ;;  %4445 = vmatpush3.bf16.msra.mxu1 %v4995_v44 }
 0x149   :  { %4426 = vmatprep.subr.bf16.mxu0 %v5322_v0  ;;  %4446 = vmatprep.subr.bf16.mxu1 %v5322_v0 }
 0x14c   :  { %4427 = vmatpush3.bf16.msra.mxu0 %v4996_v45  ;;  %4447 = vmatpush3.bf16.msra.mxu1 %v4997_v46 }
 0x14d   :  { %4428 = vmatprep.subr.bf16.mxu0 %v5322_v0  ;;  %4448 = vmatprep.subr.bf16.mxu1 %v5322_v0 }
 0x150   :  { %4429 = vmatpush3.bf16.msra.mxu0 %v4998_v47  ;;  %4449 = vmatpush3.bf16.msra.mxu1 %v4999_v48 }
 0x151   :  { %4430 = vmatprep.subr.bf16.mxu0 %v5322_v0  ;;  %4450 = vmatprep.subr.bf16.mxu1 %v5322_v0 }
 0x154   :  { %4431 = vmatpush3.bf16.msra.mxu0 %v5000_v49  ;;  %4451 = vmatpush3.bf16.msra.mxu1 %v5001_v50  ;;  %v5018_v49 = vld [vmem:[%s6565_s1 + $0x8] ss:$16 sps:$4 sm:$0xff]   ;;  %v5019_v50 = vld [vmem:[%s6565_s1 + $0xc] ss:$16 sps:$4 sm:$0xff]  }
 0x155   :  { %4456 = vmatprep.subr.bf16.mxu0 %v5322_v0  ;;  %4476 = vmatprep.subr.bf16.mxu1 %v5322_v0 }
 0x157   :  { %4433 = vmatmul.mubr.bf16.vlgmr.msra.gmra.mrb[12].mxu0 %v485_v36  ;;  %4453 = vmatmul.mubr.bf16.vlgmr.msra.gmra.mrb[12].mxu1 %v485_v36 }
 0x158   :  { %4472 = vmatprep.mubr.msk.bf16.mxu0 %vm5323_vm0, %v5322_v0  ;;  %4492 = vmatprep.mubr.msk.bf16.mxu1 %vm5323_vm0, %v5322_v0 }
 0x159   :  { %4457 = vmatpush3.bf16.msra.mxu0 %v5002_v51  ;;  %4477 = vmatpush3.bf16.msra.mxu1 %v5003_v52  ;;  %v5020_v51 = vld [vmem:[%s6565_s1 + $0x28] ss:$16 sps:$4 sm:$0xff]   ;;  %v5021_v52 = vld [vmem:[%s6565_s1 + $0x2c] ss:$16 sps:$4 sm:$0xff]  }
 0x15a   :  { %4458 = vmatprep.subr.bf16.mxu0 %v5322_v0  ;;  %4478 = vmatprep.subr.bf16.mxu1 %v5322_v0 }
 0x15d   :  { %4459 = vmatpush3.bf16.msra.mxu0 %v5004_v53  ;;  %4479 = vmatpush3.bf16.msra.mxu1 %v5005_v54  ;;  %v5022_v53 = vld [vmem:[%s6565_s1 + $0x48] ss:$16 sps:$4 sm:$0xff]   ;;  %v5023_v54 = vld [vmem:[%s6565_s1 + $0x4c] ss:$16 sps:$4 sm:$0xff]  }
 0x15e   :  { %4460 = vmatprep.subr.bf16.mxu0 %v5322_v0  ;;  %4480 = vmatprep.subr.bf16.mxu1 %v5322_v0 }
 0x161   :  { %4461 = vmatpush3.bf16.msra.mxu0 %v5006_v55  ;;  %4481 = vmatpush3.bf16.msra.mxu1 %v5007_v56  ;;  %v5024_v55 = vld [vmem:[%s6565_s1 + $0x68] ss:$16 sps:$4 sm:$0xff]   ;;  %v5025_v56 = vld [vmem:[%s6565_s1 + $0x6c] ss:$16 sps:$4 sm:$0xff]  }
 0x162   :  { %4462 = vmatprep.subr.bf16.mxu0 %v5322_v0  ;;  %4482 = vmatprep.subr.bf16.mxu1 %v5322_v0 }
 0x165   :  { %4463 = vmatpush3.bf16.msra.mxu0 %v5008_v57  ;;  %4483 = vmatpush3.bf16.msra.mxu1 %v5009_v58  ;;  %v5026_v57 = vld [vmem:[%s6565_s1 + $0x88] ss:$16 sps:$4 sm:$0xff]   ;;  %v5027_v58 = vld [vmem:[%s6565_s1 + $0x8c] ss:$16 sps:$4 sm:$0xff]  }
 0x166   :  { %4464 = vmatprep.subr.bf16.mxu0 %v5322_v0  ;;  %4484 = vmatprep.subr.bf16.mxu1 %v5322_v0 }
 0x169   :  { %4465 = vmatpush3.bf16.msra.mxu0 %v5010_v59  ;;  %4485 = vmatpush3.bf16.msra.mxu1 %v5011_v60  ;;  %v5028_v59 = vld [vmem:[%s6565_s1 + $0xa8] ss:$16 sps:$4 sm:$0xff]   ;;  %v5029_v60 = vld [vmem:[%s6565_s1 + $0xac] ss:$16 sps:$4 sm:$0xff]  }
 0x16a   :  { %4466 = vmatprep.subr.bf16.mxu0 %v5322_v0  ;;  %4486 = vmatprep.subr.bf16.mxu1 %v5322_v0 }
 0x16d   :  { %4467 = vmatpush3.bf16.msra.mxu0 %v5012_v61  ;;  %4487 = vmatpush3.bf16.msra.mxu1 %v5013_v62  ;;  %v5030_v61 = vld [vmem:[%s6565_s1 + $0xc8] ss:$16 sps:$4 sm:$0xff]   ;;  %v5031_v62 = vld [vmem:[%s6565_s1 + $0xcc] ss:$16 sps:$4 sm:$0xff]  }
 0x16e   :  { %4468 = vmatprep.subr.bf16.mxu0 %v5322_v0  ;;  %4488 = vmatprep.subr.bf16.mxu1 %v5322_v0 }
 0x171   :  { %4469 = vmatpush3.bf16.msra.mxu0 %v5014_v63  ;;  %4489 = vmatpush3.bf16.msra.mxu1 %v5015_v1  ;;  %v5032_v63 = vld [vmem:[%s6565_s1 + $0xe8] ss:$16 sps:$4 sm:$0xff]   ;;  %v5033_v1 = vld [vmem:[%s6565_s1 + $0xec] ss:$16 sps:$4 sm:$0xff]  }
 0x172   :  { %4470 = vmatprep.subr.bf16.mxu0 %v5322_v0  ;;  %4490 = vmatprep.subr.bf16.mxu1 %v5322_v0 }
 0x175   :  { %4471 = vmatpush3.bf16.msra.mxu0 %v5016_v2  ;;  %4491 = vmatpush3.bf16.msra.mxu1 %v5017_v3  ;;  %v5034_v2 = vld [vmem:[%s6565_s1] ss:$16 sps:$4 sm:$0xff]   ;;  %v5035_v3 = vld [vmem:[%s6565_s1 + $0x4] ss:$16 sps:$4 sm:$0xff]  }
 0x176   :  { %4496 = vmatprep.subr.bf16.mxu0 %v5322_v0  ;;  %4516 = vmatprep.subr.bf16.mxu1 %v5322_v0 }
 0x20a   :  { %v587_v4 = vpop.f32.mrb[8].mxu0  ;;  %v700_v5 = vpop.f32.mrb[8].mxu1 }
 0x20b   :  { %v4394_v7 = vpop.f32.mrb[9].mxu0  ;;  %v4414_v8 = vpop.f32.mrb[9].mxu1  ;;  %v706_v15 = vadd.f32 %v700_v5, %v601_v13  ;;  %v593_v16 = vadd.f32 %v587_v4, %v488_v14  ;;  %v5036_v4 = vld [vmem:[%s6565_s1 + $0x20] ss:$16 sps:$4 sm:$0xff]   ;;  %v5037_v5 = vld [vmem:[%s6565_s1 + $0x24] ss:$16 sps:$4 sm:$0xff]  }
 0x20c   :  { %v590_v9 = vpop.f32.mrb[10].mxu0  ;;  %v703_v10 = vpop.f32.mrb[10].mxu1  ;;  %v5039_v7 = vld [vmem:[%s6565_s1 + $0x44] ss:$16 sps:$4 sm:$0xff]   ;;  %v5040_v8 = vld [vmem:[%s6565_s1 + $0x60] ss:$16 sps:$4 sm:$0xff]  }
 0x20d   :  { %v4395_v11 = vpop.f32.mrb[11].mxu0  ;;  %v4415_v12 = vpop.f32.mrb[11].mxu1  ;;  %v3747_v17 = vmul.f32 -1.442695, %v706_v15  ;;  %v3737_v18 = vmul.f32 -1.442695, %v593_v16 }
 0x20e   :  { %v5041_v9 = vld [vmem:[%s6565_s1 + $0x64] ss:$16 sps:$4 sm:$0xff]   ;;  %v5042_v10 = vld [vmem:[%s6565_s1 + $0x80] ss:$16 sps:$4 sm:$0xff]  }
 0x20f   :  { %5210 = vpow2.f32 %v3747_v17  ;;  %v5043_v11 = vld [vmem:[%s6565_s1 + $0x84] ss:$16 sps:$4 sm:$0xff]   ;;  %v5044_v12 = vld [vmem:[%s6565_s1 + $0xa0] ss:$16 sps:$4 sm:$0xff]  }
 0x210   :  { %5212 = vpow2.f32 %v3737_v18  ;;  %v5045_v13 = vld [vmem:[%s6565_s1 + $0xa4] ss:$16 sps:$4 sm:$0xff]   ;;  %v5046_v14 = vld [vmem:[%s6565_s1 + $0xc0] ss:$16 sps:$4 sm:$0xff]  }
 0x211   :  { %v5047_v15 = vld [vmem:[%s6565_s1 + $0xc4] ss:$16 sps:$4 sm:$0xff]   ;;  %v5048_v16 = vld [vmem:[%s6565_s1 + $0xe0] ss:$16 sps:$4 sm:$0xff]  }
 0x212   :  { %v5049_v17 = vld [vmem:[%s6565_s1 + $0xe4] ss:$16 sps:$4 sm:$0xff]  }
 0x219   :  { %v5211_v19 = vpop.eup %5210 }
 0x21a   :  { %v5213_v21 = vpop.eup %5212  ;;  %v710_v22 = vadd.f32 1.0, %v5211_v19 }
 0x21b   :  { %v597_v25 = vadd.f32 1.0, %v5213_v21 }
 0x21c   :  { %5214 = vrcp.f32 %v710_v22 }
 0x21d   :  { %5216 = vrcp.f32 %v597_v25 }
 0x226   :  { %v5215_v38 = vpop.eup %5214 }
 0x227   :  { %v5217_v39 = vpop.eup %5216  ;;  %v934_v41 = vmul.f32 %v5215_v38, %v5580_v29 }
 0x22a   :  { %v813_v26 = vpop.f32.mrb[12].mxu0  ;;  %v921_v27 = vpop.f32.mrb[12].mxu1 }
 0x22b   :  { %v819_v28 = vadd.f32 %v813_v26, %v714_v23  ;;  %v927_v30 = vadd.f32 %v921_v27, %v822_v24  ;;  %v4434_v31 = vpop.f32.mrb[13].mxu0  ;;  %v4454_v32 = vpop.f32.mrb[13].mxu1  ;;  %v1057_v27 = vunpack.c.h.bf16 %v3768_v20 }
 0x22c   :  { %v816_v33 = vpop.f32.mrb[14].mxu0  ;;  %v924_v34 = vpop.f32.mrb[14].mxu1 }
 0x22d   :  { %5218 = vtanh.f32 %v819_v28  ;;  %v3766_v35 = vmul.f32 -1.442695, %v927_v30  ;;  %v4435_v36 = vpop.f32.mrb[15].mxu0  ;;  %v4455_v37 = vpop.f32.mrb[15].mxu1  ;;  %v944_v28 = vunpack.c.l.bf16 %v3768_v20  ;;  %v5070_v20 = vld [vmem:[%s6565_s1 + $0x40] ss:$16 sps:$4 sm:$0xff]  }
 0x22f   :  { %5220 = vpow2.f32 %v3766_v35  ;;  %v3788_v35 = vld [vmem:[%s6567_s0 + $0x28] sm:$0xff]  }
 0x230   :  { %v1170_v38 = vunpack.c.l.bf16 %v3788_v35 }
 0x237   :  { %v5219_v40 = vpop.eup %5218 }
 0x238   :  { %v935_v42 = vmul.f32 %v5219_v40, %v5217_v39  ;;  %v1278_v39 = vunpack.c.h.bf16 %v3788_v35  ;;  %v3808_v35 = vld [vmem:[%s6567_s0 + $0x30] sm:$0xff]  }
 0x239   :  { %v5221_v43 = vpop.eup %5220 }
 0x23a   :  { %v5729_v44 = vadd.f32 %v935_v42, %v934_v41  ;;  %v931_v45 = vadd.f32 1.0, %v5221_v43 }
 0x23c   :  { %5222 = vtanh.f32 %v5729_v44 }
 0x23d   :  { %5224 = vrcp.f32 %v931_v45 }
 0x246   :  { %v5223_v46 = vpop.eup %5222 }
 0x247   :  { %v5225_v47 = vpop.eup %5224 }
 0x248   :  { %v938_v48 = vmul.f32 %v5225_v47, %v5223_v46 }
 0x24a   :  { %3767 = vst [vmem:[%s6569_s4 + $0x8] sm:$0xff] %v938_v48  ;;  %v941_v29 = vpack.c.bf16 %v938_v48, %v938_v48 }
 0x24c   :  { %4473 = vmatmul.mubr.bf16.vlgmr.msra.gmra.mrb[16].mxu0 %v941_v29  ;;  %4493 = vmatmul.mubr.bf16.vlgmr.msra.gmra.mrb[16].mxu1 %v941_v29 }
 0x24d   :  { %4497 = vmatpush3.bf16.msra.mxu0 %v5018_v49  ;;  %4517 = vmatpush3.bf16.msra.mxu1 %v5019_v50 }
 0x24e   :  { %4498 = vmatprep.subr.bf16.mxu0 %v5322_v0  ;;  %4518 = vmatprep.subr.bf16.mxu1 %v5322_v0 }
 0x24f   :  { %4512 = vmatprep.mubr.msk.bf16.mxu0 %vm5323_vm0, %v5322_v0  ;;  %4532 = vmatprep.mubr.msk.bf16.mxu1 %vm5323_vm0, %v5322_v0 }
 0x251   :  { %4499 = vmatpush3.bf16.msra.mxu0 %v5020_v51  ;;  %4519 = vmatpush3.bf16.msra.mxu1 %v5021_v52 }
 0x252   :  { %4500 = vmatprep.subr.bf16.mxu0 %v5322_v0  ;;  %4520 = vmatprep.subr.bf16.mxu1 %v5322_v0 }
 0x255   :  { %4501 = vmatpush3.bf16.msra.mxu0 %v5022_v53  ;;  %4521 = vmatpush3.bf16.msra.mxu1 %v5023_v54 }
 0x256   :  { %4502 = vmatprep.subr.bf16.mxu0 %v5322_v0  ;;  %4522 = vmatprep.subr.bf16.mxu1 %v5322_v0 }
 0x259   :  { %4503 = vmatpush3.bf16.msra.mxu0 %v5024_v55  ;;  %4523 = vmatpush3.bf16.msra.mxu1 %v5025_v56 }
 0x25a   :  { %4504 = vmatprep.subr.bf16.mxu0 %v5322_v0  ;;  %4524 = vmatprep.subr.bf16.mxu1 %v5322_v0 }
 0x25d   :  { %4505 = vmatpush3.bf16.msra.mxu0 %v5026_v57  ;;  %4525 = vmatpush3.bf16.msra.mxu1 %v5027_v58 }
 0x25e   :  { %4506 = vmatprep.subr.bf16.mxu0 %v5322_v0  ;;  %4526 = vmatprep.subr.bf16.mxu1 %v5322_v0 }
 0x261   :  { %4507 = vmatpush3.bf16.msra.mxu0 %v5028_v59  ;;  %4527 = vmatpush3.bf16.msra.mxu1 %v5029_v60 }
 0x262   :  { %4508 = vmatprep.subr.bf16.mxu0 %v5322_v0  ;;  %4528 = vmatprep.subr.bf16.mxu1 %v5322_v0 }
 0x265   :  { %4509 = vmatpush3.bf16.msra.mxu0 %v5030_v61  ;;  %4529 = vmatpush3.bf16.msra.mxu1 %v5031_v62 }
 0x266   :  { %4510 = vmatprep.subr.bf16.mxu0 %v5322_v0  ;;  %4530 = vmatprep.subr.bf16.mxu1 %v5322_v0 }
 0x269   :  { %4511 = vmatpush3.bf16.msra.mxu0 %v5032_v63  ;;  %4531 = vmatpush3.bf16.msra.mxu1 %v5033_v1  ;;  %v5050_v63 = vld [vmem:[%s6565_s1 + $0x8] ss:$16 sps:$4 sm:$0xff]   ;;  %v5051_v1 = vld [vmem:[%s6565_s1 + $0xc] ss:$16 sps:$4 sm:$0xff]  }
 0x26a   :  { %4536 = vmatprep.subr.bf16.mxu0 %v5322_v0  ;;  %4556 = vmatprep.subr.bf16.mxu1 %v5322_v0 }
 0x26c   :  { %4513 = vmatmul.mubr.bf16.vlgmr.msra.gmra.mrb[20].mxu0 %v941_v29  ;;  %4533 = vmatmul.mubr.bf16.vlgmr.msra.gmra.mrb[20].mxu1 %v941_v29 }
 0x26d   :  { %4552 = vmatprep.mubr.msk.bf16.mxu0 %vm5323_vm0, %v5322_v0  ;;  %4572 = vmatprep.mubr.msk.bf16.mxu1 %vm5323_vm0, %v5322_v0 }
 0x26e   :  { %4537 = vmatpush3.bf16.msra.mxu0 %v5034_v2  ;;  %4557 = vmatpush3.bf16.msra.mxu1 %v5035_v3  ;;  %v5052_v2 = vld [vmem:[%s6565_s1 + $0x28] ss:$16 sps:$4 sm:$0xff]   ;;  %v5053_v3 = vld [vmem:[%s6565_s1 + $0x2c] ss:$16 sps:$4 sm:$0xff]  }
 0x26f   :  { %4538 = vmatprep.subr.bf16.mxu0 %v5322_v0  ;;  %4558 = vmatprep.subr.bf16.mxu1 %v5322_v0 }
 0x272   :  { %4539 = vmatpush3.bf16.msra.mxu0 %v5036_v4  ;;  %4559 = vmatpush3.bf16.msra.mxu1 %v5037_v5  ;;  %v5054_v4 = vld [vmem:[%s6565_s1 + $0x48] ss:$16 sps:$4 sm:$0xff]   ;;  %v5055_v5 = vld [vmem:[%s6565_s1 + $0x4c] ss:$16 sps:$4 sm:$0xff]  }
 0x273   :  { %4540 = vmatprep.subr.bf16.mxu0 %v5322_v0  ;;  %4560 = vmatprep.subr.bf16.mxu1 %v5322_v0 }
 0x276   :  { %4541 = vmatpush3.bf16.msra.mxu0 %v5038_v6  ;;  %4561 = vmatpush3.bf16.msra.mxu1 %v5039_v7  ;;  %v5056_v6 = vld [vmem:[%s6565_s1 + $0x68] ss:$16 sps:$4 sm:$0xff]   ;;  %v5057_v7 = vld [vmem:[%s6565_s1 + $0x6c] ss:$16 sps:$4 sm:$0xff]  }
 0x277   :  { %4542 = vmatprep.subr.bf16.mxu0 %v5322_v0  ;;  %4562 = vmatprep.subr.bf16.mxu1 %v5322_v0 }
 0x27a   :  { %4543 = vmatpush3.bf16.msra.mxu0 %v5040_v8  ;;  %4563 = vmatpush3.bf16.msra.mxu1 %v5041_v9  ;;  %v5058_v8 = vld [vmem:[%s6565_s1 + $0x88] ss:$16 sps:$4 sm:$0xff]   ;;  %v5059_v9 = vld [vmem:[%s6565_s1 + $0x8c] ss:$16 sps:$4 sm:$0xff]  }
 0x27b   :  { %4544 = vmatprep.subr.bf16.mxu0 %v5322_v0  ;;  %4564 = vmatprep.subr.bf16.mxu1 %v5322_v0 }
 0x27e   :  { %4545 = vmatpush3.bf16.msra.mxu0 %v5042_v10  ;;  %4565 = vmatpush3.bf16.msra.mxu1 %v5043_v11  ;;  %v5060_v10 = vld [vmem:[%s6565_s1 + $0xa8] ss:$16 sps:$4 sm:$0xff]   ;;  %v5061_v11 = vld [vmem:[%s6565_s1 + $0xac] ss:$16 sps:$4 sm:$0xff]  }
 0x27f   :  { %4546 = vmatprep.subr.bf16.mxu0 %v5322_v0  ;;  %4566 = vmatprep.subr.bf16.mxu1 %v5322_v0 }
 0x282   :  { %4547 = vmatpush3.bf16.msra.mxu0 %v5044_v12  ;;  %4567 = vmatpush3.bf16.msra.mxu1 %v5045_v13  ;;  %v5062_v12 = vld [vmem:[%s6565_s1 + $0xc8] ss:$16 sps:$4 sm:$0xff]   ;;  %v5063_v13 = vld [vmem:[%s6565_s1 + $0xcc] ss:$16 sps:$4 sm:$0xff]  }
 0x283   :  { %4548 = vmatprep.subr.bf16.mxu0 %v5322_v0  ;;  %4568 = vmatprep.subr.bf16.mxu1 %v5322_v0 }
 0x286   :  { %4549 = vmatpush3.bf16.msra.mxu0 %v5046_v14  ;;  %4569 = vmatpush3.bf16.msra.mxu1 %v5047_v15  ;;  %v5064_v14 = vld [vmem:[%s6565_s1 + $0xe8] ss:$16 sps:$4 sm:$0xff]   ;;  %v5065_v15 = vld [vmem:[%s6565_s1 + $0xec] ss:$16 sps:$4 sm:$0xff]  }
 0x287   :  { %4550 = vmatprep.subr.bf16.mxu0 %v5322_v0  ;;  %4570 = vmatprep.subr.bf16.mxu1 %v5322_v0 }
 0x28a   :  { %4551 = vmatpush3.bf16.msra.mxu0 %v5048_v16  ;;  %4571 = vmatpush3.bf16.msra.mxu1 %v5049_v17  ;;  %v5066_v16 = vld [vmem:[%s6565_s1] ss:$16 sps:$4 sm:$0xff]   ;;  %v5067_v17 = vld [vmem:[%s6565_s1 + $0x4] ss:$16 sps:$4 sm:$0xff]  }
 0x28b   :  { %4576 = vmatprep.subr.bf16.mxu0 %v5322_v0  ;;  %4596 = vmatprep.subr.bf16.mxu1 %v5322_v0 }
 0x31f   :  { %v1043_v18 = vpop.f32.mrb[16].mxu0  ;;  %v1156_v19 = vpop.f32.mrb[16].mxu1 }
 0x320   :  { %v4474_v21 = vpop.f32.mrb[17].mxu0  ;;  %v4494_v22 = vpop.f32.mrb[17].mxu1  ;;  %v1162_v30 = vadd.f32 %v1156_v19, %v1057_v27  ;;  %v1049_v31 = vadd.f32 %v1043_v18, %v944_v28  ;;  %v5068_v18 = vld [vmem:[%s6565_s1 + $0x20] ss:$16 sps:$4 sm:$0xff]   ;;  %v5069_v19 = vld [vmem:[%s6565_s1 + $0x24] ss:$16 sps:$4 sm:$0xff]  }
 0x321   :  { %v1046_v23 = vpop.f32.mrb[18].mxu0  ;;  %v1159_v24 = vpop.f32.mrb[18].mxu1  ;;  %v5071_v21 = vld [vmem:[%s6565_s1 + $0x44] ss:$16 sps:$4 sm:$0xff]   ;;  %v5072_v22 = vld [vmem:[%s6565_s1 + $0x60] ss:$16 sps:$4 sm:$0xff]  }
 0x322   :  { %v4475_v25 = vpop.f32.mrb[19].mxu0  ;;  %v4495_v26 = vpop.f32.mrb[19].mxu1  ;;  %v3787_v32 = vmul.f32 -1.442695, %v1162_v30  ;;  %v3777_v33 = vmul.f32 -1.442695, %v1049_v31 }
 0x323   :  { %v5073_v23 = vld [vmem:[%s6565_s1 + $0x64] ss:$16 sps:$4 sm:$0xff]   ;;  %v5074_v24 = vld [vmem:[%s6565_s1 + $0x80] ss:$16 sps:$4 sm:$0xff]  }
 0x324   :  { %5226 = vpow2.f32 %v3787_v32  ;;  %v5075_v25 = vld [vmem:[%s6565_s1 + $0x84] ss:$16 sps:$4 sm:$0xff]   ;;  %v5076_v26 = vld [vmem:[%s6565_s1 + $0xa0] ss:$16 sps:$4 sm:$0xff]  }
 0x325   :  { %5228 = vpow2.f32 %v3777_v33  ;;  %v5077_v27 = vld [vmem:[%s6565_s1 + $0xa4] ss:$16 sps:$4 sm:$0xff]   ;;  %v5078_v28 = vld [vmem:[%s6565_s1 + $0xc0] ss:$16 sps:$4 sm:$0xff]  }
 0x326   :  { %v5079_v30 = vld [vmem:[%s6565_s1 + $0xc4] ss:$16 sps:$4 sm:$0xff]   ;;  %v5080_v31 = vld [vmem:[%s6565_s1 + $0xe0] ss:$16 sps:$4 sm:$0xff]  }
 0x327   :  { %v5081_v32 = vld [vmem:[%s6565_s1 + $0xe4] ss:$16 sps:$4 sm:$0xff]  }
 0x32e   :  { %v5227_v34 = vpop.eup %5226 }
 0x32f   :  { %v5229_v36 = vpop.eup %5228  ;;  %v1166_v37 = vadd.f32 1.0, %v5227_v34 }
 0x330   :  { %v1053_v40 = vadd.f32 1.0, %v5229_v36 }
 0x331   :  { %5230 = vrcp.f32 %v1166_v37 }
 0x332   :  { %5232 = vrcp.f32 %v1053_v40 }
 0x33b   :  { %v5231_v52 = vpop.eup %5230 }
 0x33c   :  { %v5233_v53 = vpop.eup %5232  ;;  %v1390_v55 = vmul.f32 %v5231_v52, %v5729_v44 }
 0x33f   :  { %v1269_v41 = vpop.f32.mrb[20].mxu0  ;;  %v1377_v42 = vpop.f32.mrb[20].mxu1 }
 0x340   :  { %v1275_v43 = vadd.f32 %v1269_v41, %v1170_v38  ;;  %v1383_v45 = vadd.f32 %v1377_v42, %v1278_v39  ;;  %v4514_v46 = vpop.f32.mrb[21].mxu0  ;;  %v4534_v47 = vpop.f32.mrb[21].mxu1  ;;  %v1513_v42 = vunpack.c.h.bf16 %v3808_v35 }
 0x341   :  { %v1272_v48 = vpop.f32.mrb[22].mxu0  ;;  %v1380_v49 = vpop.f32.mrb[22].mxu1 }
 0x342   :  { %5234 = vtanh.f32 %v1275_v43  ;;  %v3806_v50 = vmul.f32 -1.442695, %v1383_v45  ;;  %v4515_v29 = vpop.f32.mrb[23].mxu0  ;;  %v4535_v51 = vpop.f32.mrb[23].mxu1  ;;  %v1400_v43 = vunpack.c.l.bf16 %v3808_v35  ;;  %v5102_v35 = vld [vmem:[%s6565_s1 + $0x40] ss:$16 sps:$4 sm:$0xff]  }
 0x344   :  { %5236 = vpow2.f32 %v3806_v50  ;;  %v3828_v50 = vld [vmem:[%s6567_s0 + $0x38] sm:$0xff]  }
 0x345   :  { %v1626_v52 = vunpack.c.l.bf16 %v3828_v50 }
 0x34c   :  { %v5235_v54 = vpop.eup %5234 }
 0x34d   :  { %v1391_v56 = vmul.f32 %v5235_v54, %v5233_v53  ;;  %v1734_v53 = vunpack.c.h.bf16 %v3828_v50  ;;  %v3848_v50 = vld [vmem:[%s6567_s0 + $0x40] sm:$0xff]  }
 0x34e   :  { %v5237_v57 = vpop.eup %5236 }
 0x34f   :  { %v5878_v58 = vadd.f32 %v1391_v56, %v1390_v55  ;;  %v1387_v59 = vadd.f32 1.0, %v5237_v57 }
 0x351   :  { %5238 = vtanh.f32 %v5878_v58 }
 0x352   :  { %5240 = vrcp.f32 %v1387_v59 }
 0x35b   :  { %v5239_v60 = vpop.eup %5238 }
 0x35c   :  { %v5241_v61 = vpop.eup %5240 }
 0x35d   :  { %v1394_v62 = vmul.f32 %v5241_v61, %v5239_v60 }
 0x35f   :  { %3807 = vst [vmem:[%s6569_s4 + $0x10] sm:$0xff] %v1394_v62  ;;  %v1397_v44 = vpack.c.bf16 %v1394_v62, %v1394_v62 }
 0x361   :  { %4553 = vmatmul.mubr.bf16.vlgmr.msra.gmra.mrb[24].mxu0 %v1397_v44  ;;  %4573 = vmatmul.mubr.bf16.vlgmr.msra.gmra.mrb[24].mxu1 %v1397_v44 }
 0x362   :  { %4577 = vmatpush3.bf16.msra.mxu0 %v5050_v63  ;;  %4597 = vmatpush3.bf16.msra.mxu1 %v5051_v1 }
 0x363   :  { %4578 = vmatprep.subr.bf16.mxu0 %v5322_v0  ;;  %4598 = vmatprep.subr.bf16.mxu1 %v5322_v0 }
 0x364   :  { %4592 = vmatprep.mubr.msk.bf16.mxu0 %vm5323_vm0, %v5322_v0  ;;  %4612 = vmatprep.mubr.msk.bf16.mxu1 %vm5323_vm0, %v5322_v0 }
 0x366   :  { %4579 = vmatpush3.bf16.msra.mxu0 %v5052_v2  ;;  %4599 = vmatpush3.bf16.msra.mxu1 %v5053_v3 }
 0x367   :  { %4580 = vmatprep.subr.bf16.mxu0 %v5322_v0  ;;  %4600 = vmatprep.subr.bf16.mxu1 %v5322_v0 }
 0x36a   :  { %4581 = vmatpush3.bf16.msra.mxu0 %v5054_v4  ;;  %4601 = vmatpush3.bf16.msra.mxu1 %v5055_v5 }
 0x36b   :  { %4582 = vmatprep.subr.bf16.mxu0 %v5322_v0  ;;  %4602 = vmatprep.subr.bf16.mxu1 %v5322_v0 }
 0x36e   :  { %4583 = vmatpush3.bf16.msra.mxu0 %v5056_v6  ;;  %4603 = vmatpush3.bf16.msra.mxu1 %v5057_v7 }
 0x36f   :  { %4584 = vmatprep.subr.bf16.mxu0 %v5322_v0  ;;  %4604 = vmatprep.subr.bf16.mxu1 %v5322_v0 }
 0x372   :  { %4585 = vmatpush3.bf16.msra.mxu0 %v5058_v8  ;;  %4605 = vmatpush3.bf16.msra.mxu1 %v5059_v9 }
 0x373   :  { %4586 = vmatprep.subr.bf16.mxu0 %v5322_v0  ;;  %4606 = vmatprep.subr.bf16.mxu1 %v5322_v0 }
 0x376   :  { %4587 = vmatpush3.bf16.msra.mxu0 %v5060_v10  ;;  %4607 = vmatpush3.bf16.msra.mxu1 %v5061_v11 }
 0x377   :  { %4588 = vmatprep.subr.bf16.mxu0 %v5322_v0  ;;  %4608 = vmatprep.subr.bf16.mxu1 %v5322_v0 }
 0x37a   :  { %4589 = vmatpush3.bf16.msra.mxu0 %v5062_v12  ;;  %4609 = vmatpush3.bf16.msra.mxu1 %v5063_v13 }
 0x37b   :  { %4590 = vmatprep.subr.bf16.mxu0 %v5322_v0  ;;  %4610 = vmatprep.subr.bf16.mxu1 %v5322_v0 }
 0x37e   :  { %4591 = vmatpush3.bf16.msra.mxu0 %v5064_v14  ;;  %4611 = vmatpush3.bf16.msra.mxu1 %v5065_v15  ;;  %v5082_v14 = vld [vmem:[%s6565_s1 + $0x8] ss:$16 sps:$4 sm:$0xff]   ;;  %v5083_v15 = vld [vmem:[%s6565_s1 + $0xc] ss:$16 sps:$4 sm:$0xff]  }
 0x37f   :  { %4616 = vmatprep.subr.bf16.mxu0 %v5322_v0  ;;  %4636 = vmatprep.subr.bf16.mxu1 %v5322_v0 }
 0x381   :  { %4593 = vmatmul.mubr.bf16.vlgmr.msra.gmra.mrb[28].mxu0 %v1397_v44  ;;  %4613 = vmatmul.mubr.bf16.vlgmr.msra.gmra.mrb[28].mxu1 %v1397_v44 }
 0x382   :  { %4632 = vmatprep.mubr.msk.bf16.mxu0 %vm5323_vm0, %v5322_v0  ;;  %4652 = vmatprep.mubr.msk.bf16.mxu1 %vm5323_vm0, %v5322_v0 }
 0x383   :  { %4617 = vmatpush3.bf16.msra.mxu0 %v5066_v16  ;;  %4637 = vmatpush3.bf16.msra.mxu1 %v5067_v17  ;;  %v5084_v16 = vld [vmem:[%s6565_s1 + $0x28] ss:$16 sps:$4 sm:$0xff]   ;;  %v5085_v17 = vld [vmem:[%s6565_s1 + $0x2c] ss:$16 sps:$4 sm:$0xff]  }
 0x384   :  { %4618 = vmatprep.subr.bf16.mxu0 %v5322_v0  ;;  %4638 = vmatprep.subr.bf16.mxu1 %v5322_v0 }
 0x387   :  { %4619 = vmatpush3.bf16.msra.mxu0 %v5068_v18  ;;  %4639 = vmatpush3.bf16.msra.mxu1 %v5069_v19  ;;  %v5086_v18 = vld [vmem:[%s6565_s1 + $0x48] ss:$16 sps:$4 sm:$0xff]   ;;  %v5087_v19 = vld [vmem:[%s6565_s1 + $0x4c] ss:$16 sps:$4 sm:$0xff]  }
 0x388   :  { %4620 = vmatprep.subr.bf16.mxu0 %v5322_v0  ;;  %4640 = vmatprep.subr.bf16.mxu1 %v5322_v0 }
 0x38b   :  { %4621 = vmatpush3.bf16.msra.mxu0 %v5070_v20  ;;  %4641 = vmatpush3.bf16.msra.mxu1 %v5071_v21  ;;  %v5088_v20 = vld [vmem:[%s6565_s1 + $0x68] ss:$16 sps:$4 sm:$0xff]   ;;  %v5089_v21 = vld [vmem:[%s6565_s1 + $0x6c] ss:$16 sps:$4 sm:$0xff]  }
 0x38c   :  { %4622 = vmatprep.subr.bf16.mxu0 %v5322_v0  ;;  %4642 = vmatprep.subr.bf16.mxu1 %v5322_v0 }
 0x38f   :  { %4623 = vmatpush3.bf16.msra.mxu0 %v5072_v22  ;;  %4643 = vmatpush3.bf16.msra.mxu1 %v5073_v23  ;;  %v5090_v22 = vld [vmem:[%s6565_s1 + $0x88] ss:$16 sps:$4 sm:$0xff]   ;;  %v5091_v23 = vld [vmem:[%s6565_s1 + $0x8c] ss:$16 sps:$4 sm:$0xff]  }
 0x390   :  { %4624 = vmatprep.subr.bf16.mxu0 %v5322_v0  ;;  %4644 = vmatprep.subr.bf16.mxu1 %v5322_v0 }
 0x393   :  { %4625 = vmatpush3.bf16.msra.mxu0 %v5074_v24  ;;  %4645 = vmatpush3.bf16.msra.mxu1 %v5075_v25  ;;  %v5092_v24 = vld [vmem:[%s6565_s1 + $0xa8] ss:$16 sps:$4 sm:$0xff]   ;;  %v5093_v25 = vld [vmem:[%s6565_s1 + $0xac] ss:$16 sps:$4 sm:$0xff]  }
 0x394   :  { %4626 = vmatprep.subr.bf16.mxu0 %v5322_v0  ;;  %4646 = vmatprep.subr.bf16.mxu1 %v5322_v0 }
 0x397   :  { %4627 = vmatpush3.bf16.msra.mxu0 %v5076_v26  ;;  %4647 = vmatpush3.bf16.msra.mxu1 %v5077_v27  ;;  %v5094_v26 = vld [vmem:[%s6565_s1 + $0xc8] ss:$16 sps:$4 sm:$0xff]   ;;  %v5095_v27 = vld [vmem:[%s6565_s1 + $0xcc] ss:$16 sps:$4 sm:$0xff]  }
 0x398   :  { %4628 = vmatprep.subr.bf16.mxu0 %v5322_v0  ;;  %4648 = vmatprep.subr.bf16.mxu1 %v5322_v0 }
 0x39b   :  { %4629 = vmatpush3.bf16.msra.mxu0 %v5078_v28  ;;  %4649 = vmatpush3.bf16.msra.mxu1 %v5079_v30  ;;  %v5096_v28 = vld [vmem:[%s6565_s1 + $0xe8] ss:$16 sps:$4 sm:$0xff]   ;;  %v5097_v30 = vld [vmem:[%s6565_s1 + $0xec] ss:$16 sps:$4 sm:$0xff]  }
 0x39c   :  { %4630 = vmatprep.subr.bf16.mxu0 %v5322_v0  ;;  %4650 = vmatprep.subr.bf16.mxu1 %v5322_v0 }
 0x39f   :  { %4631 = vmatpush3.bf16.msra.mxu0 %v5080_v31  ;;  %4651 = vmatpush3.bf16.msra.mxu1 %v5081_v32  ;;  %v5098_v31 = vld [vmem:[%s6565_s1] ss:$16 sps:$4 sm:$0xff]   ;;  %v5099_v32 = vld [vmem:[%s6565_s1 + $0x4] ss:$16 sps:$4 sm:$0xff]  }
 0x3a0   :  { %4656 = vmatprep.subr.bf16.mxu0 %v5322_v0  ;;  %4676 = vmatprep.subr.bf16.mxu1 %v5322_v0 }
 0x434   :  { %v1499_v33 = vpop.f32.mrb[24].mxu0  ;;  %v1612_v34 = vpop.f32.mrb[24].mxu1 }
 0x435   :  { %v4554_v36 = vpop.f32.mrb[25].mxu0  ;;  %v4574_v37 = vpop.f32.mrb[25].mxu1  ;;  %v1618_v45 = vadd.f32 %v1612_v34, %v1513_v42  ;;  %v1505_v46 = vadd.f32 %v1499_v33, %v1400_v43  ;;  %v5100_v33 = vld [vmem:[%s6565_s1 + $0x20] ss:$16 sps:$4 sm:$0xff]   ;;  %v5101_v34 = vld [vmem:[%s6565_s1 + $0x24] ss:$16 sps:$4 sm:$0xff]  }
 0x436   :  { %v1502_v38 = vpop.f32.mrb[26].mxu0  ;;  %v1615_v39 = vpop.f32.mrb[26].mxu1  ;;  %v5103_v36 = vld [vmem:[%s6565_s1 + $0x44] ss:$16 sps:$4 sm:$0xff]   ;;  %v5104_v37 = vld [vmem:[%s6565_s1 + $0x60] ss:$16 sps:$4 sm:$0xff]  }
 0x437   :  { %v4555_v40 = vpop.f32.mrb[27].mxu0  ;;  %v4575_v41 = vpop.f32.mrb[27].mxu1  ;;  %v3827_v47 = vmul.f32 -1.442695, %v1618_v45  ;;  %v3817_v48 = vmul.f32 -1.442695, %v1505_v46 }
 0x438   :  { %v5105_v38 = vld [vmem:[%s6565_s1 + $0x64] ss:$16 sps:$4 sm:$0xff]   ;;  %v5106_v39 = vld [vmem:[%s6565_s1 + $0x80] ss:$16 sps:$4 sm:$0xff]  }
 0x439   :  { %5242 = vpow2.f32 %v3827_v47  ;;  %v5107_v40 = vld [vmem:[%s6565_s1 + $0x84] ss:$16 sps:$4 sm:$0xff]   ;;  %v5108_v41 = vld [vmem:[%s6565_s1 + $0xa0] ss:$16 sps:$4 sm:$0xff]  }
 0x43a   :  { %5244 = vpow2.f32 %v3817_v48  ;;  %v5109_v42 = vld [vmem:[%s6565_s1 + $0xa4] ss:$16 sps:$4 sm:$0xff]   ;;  %v5110_v43 = vld [vmem:[%s6565_s1 + $0xc0] ss:$16 sps:$4 sm:$0xff]  }
 0x43b   :  { %v5111_v45 = vld [vmem:[%s6565_s1 + $0xc4] ss:$16 sps:$4 sm:$0xff]   ;;  %v5112_v46 = vld [vmem:[%s6565_s1 + $0xe0] ss:$16 sps:$4 sm:$0xff]  }
 0x43c   :  { %v5113_v47 = vld [vmem:[%s6565_s1 + $0xe4] ss:$16 sps:$4 sm:$0xff]  }
 0x443   :  { %v5243_v49 = vpop.eup %5242 }
 0x444   :  { %v5245_v29 = vpop.eup %5244  ;;  %v1622_v51 = vadd.f32 1.0, %v5243_v49 }
 0x445   :  { %v1509_v54 = vadd.f32 1.0, %v5245_v29 }
 0x446   :  { %5246 = vrcp.f32 %v1622_v51 }
 0x447   :  { %5248 = vrcp.f32 %v1509_v54 }
 0x450   :  { %v5247_v3 = vpop.eup %5246 }
 0x451   :  { %v5249_v4 = vpop.eup %5248  ;;  %v1846_v6 = vmul.f32 %v5247_v3, %v5878_v58 }
 0x454   :  { %v1725_v55 = vpop.f32.mrb[28].mxu0  ;;  %v1833_v56 = vpop.f32.mrb[28].mxu1 }
 0x455   :  { %v1731_v57 = vadd.f32 %v1725_v55, %v1626_v52  ;;  %v1839_v59 = vadd.f32 %v1833_v56, %v1734_v53  ;;  %v4594_v60 = vpop.f32.mrb[29].mxu0  ;;  %v4614_v61 = vpop.f32.mrb[29].mxu1  ;;  %v1969_v56 = vunpack.c.h.bf16 %v3848_v50 }
 0x456   :  { %v1728_v62 = vpop.f32.mrb[30].mxu0  ;;  %v1836_v63 = vpop.f32.mrb[30].mxu1 }
 0x457   :  { %5250 = vtanh.f32 %v1731_v57  ;;  %v3846_v1 = vmul.f32 -1.442695, %v1839_v59  ;;  %v4595_v44 = vpop.f32.mrb[31].mxu0  ;;  %v4615_v2 = vpop.f32.mrb[31].mxu1  ;;  %v1856_v57 = vunpack.c.l.bf16 %v3848_v50  ;;  %v5134_v50 = vld [vmem:[%s6565_s1 + $0x40] ss:$16 sps:$4 sm:$0xff]  }
 0x459   :  { %5252 = vpow2.f32 %v3846_v1  ;;  %v3868_v1 = vld [vmem:[%s6567_s0 + $0x48] sm:$0xff]  }
 0x45a   :  { %v2082_v3 = vunpack.c.l.bf16 %v3868_v1 }
 0x461   :  { %v5251_v5 = vpop.eup %5250 }
 0x462   :  { %v1847_v7 = vmul.f32 %v5251_v5, %v5249_v4  ;;  %v2190_v4 = vunpack.c.h.bf16 %v3868_v1  ;;  %v3888_v1 = vld [vmem:[%s6567_s0 + $0x50] sm:$0xff]  }
 0x463   :  { %v5253_v8 = vpop.eup %5252 }
 0x464   :  { %v6027_v9 = vadd.f32 %v1847_v7, %v1846_v6  ;;  %v1843_v10 = vadd.f32 1.0, %v5253_v8 }
 0x466   :  { %5254 = vtanh.f32 %v6027_v9 }
 0x467   :  { %5256 = vrcp.f32 %v1843_v10 }
 0x470   :  { %v5255_v11 = vpop.eup %5254 }
 0x471   :  { %v5257_v12 = vpop.eup %5256 }
 0x472   :  { %v1850_v13 = vmul.f32 %v5257_v12, %v5255_v11 }
 0x474   :  { %3847 = vst [vmem:[%s6569_s4 + $0x18] sm:$0xff] %v1850_v13  ;;  %v1853_v58 = vpack.c.bf16 %v1850_v13, %v1850_v13 }
 0x476   :  { %4633 = vmatmul.mubr.bf16.vlgmr.msra.gmra.mrb[32].mxu0 %v1853_v58  ;;  %4653 = vmatmul.mubr.bf16.vlgmr.msra.gmra.mrb[32].mxu1 %v1853_v58 }
 0x477   :  { %4657 = vmatpush3.bf16.msra.mxu0 %v5082_v14  ;;  %4677 = vmatpush3.bf16.msra.mxu1 %v5083_v15 }
 0x478   :  { %4658 = vmatprep.subr.bf16.mxu0 %v5322_v0  ;;  %4678 = vmatprep.subr.bf16.mxu1 %v5322_v0 }
 0x479   :  { %4672 = vmatprep.mubr.msk.bf16.mxu0 %vm5323_vm0, %v5322_v0  ;;  %4692 = vmatprep.mubr.msk.bf16.mxu1 %vm5323_vm0, %v5322_v0 }
 0x47b   :  { %4659 = vmatpush3.bf16.msra.mxu0 %v5084_v16  ;;  %4679 = vmatpush3.bf16.msra.mxu1 %v5085_v17 }
 0x47c   :  { %4660 = vmatprep.subr.bf16.mxu0 %v5322_v0  ;;  %4680 = vmatprep.subr.bf16.mxu1 %v5322_v0 }
 0x47f   :  { %4661 = vmatpush3.bf16.msra.mxu0 %v5086_v18  ;;  %4681 = vmatpush3.bf16.msra.mxu1 %v5087_v19 }
 0x480   :  { %4662 = vmatprep.subr.bf16.mxu0 %v5322_v0  ;;  %4682 = vmatprep.subr.bf16.mxu1 %v5322_v0 }
 0x483   :  { %4663 = vmatpush3.bf16.msra.mxu0 %v5088_v20  ;;  %4683 = vmatpush3.bf16.msra.mxu1 %v5089_v21 }
 0x484   :  { %4664 = vmatprep.subr.bf16.mxu0 %v5322_v0  ;;  %4684 = vmatprep.subr.bf16.mxu1 %v5322_v0 }
 0x487   :  { %4665 = vmatpush3.bf16.msra.mxu0 %v5090_v22  ;;  %4685 = vmatpush3.bf16.msra.mxu1 %v5091_v23 }
 0x488   :  { %4666 = vmatprep.subr.bf16.mxu0 %v5322_v0  ;;  %4686 = vmatprep.subr.bf16.mxu1 %v5322_v0 }
 0x48b   :  { %4667 = vmatpush3.bf16.msra.mxu0 %v5092_v24  ;;  %4687 = vmatpush3.bf16.msra.mxu1 %v5093_v25 }
 0x48c   :  { %4668 = vmatprep.subr.bf16.mxu0 %v5322_v0  ;;  %4688 = vmatprep.subr.bf16.mxu1 %v5322_v0 }
 0x48f   :  { %4669 = vmatpush3.bf16.msra.mxu0 %v5094_v26  ;;  %4689 = vmatpush3.bf16.msra.mxu1 %v5095_v27 }
 0x490   :  { %4670 = vmatprep.subr.bf16.mxu0 %v5322_v0  ;;  %4690 = vmatprep.subr.bf16.mxu1 %v5322_v0 }
 0x493   :  { %4671 = vmatpush3.bf16.msra.mxu0 %v5096_v28  ;;  %4691 = vmatpush3.bf16.msra.mxu1 %v5097_v30  ;;  %v5114_v28 = vld [vmem:[%s6565_s1 + $0x8] ss:$16 sps:$4 sm:$0xff]   ;;  %v5115_v30 = vld [vmem:[%s6565_s1 + $0xc] ss:$16 sps:$4 sm:$0xff]  }
 0x494   :  { %4696 = vmatprep.subr.bf16.mxu0 %v5322_v0  ;;  %4716 = vmatprep.subr.bf16.mxu1 %v5322_v0 }
 0x496   :  { %4673 = vmatmul.mubr.bf16.vlgmr.msra.gmra.mrb[36].mxu0 %v1853_v58  ;;  %4693 = vmatmul.mubr.bf16.vlgmr.msra.gmra.mrb[36].mxu1 %v1853_v58 }
 0x497   :  { %4712 = vmatprep.mubr.msk.bf16.mxu0 %vm5323_vm0, %v5322_v0  ;;  %4732 = vmatprep.mubr.msk.bf16.mxu1 %vm5323_vm0, %v5322_v0 }
 0x498   :  { %4697 = vmatpush3.bf16.msra.mxu0 %v5098_v31  ;;  %4717 = vmatpush3.bf16.msra.mxu1 %v5099_v32  ;;  %v5116_v31 = vld [vmem:[%s6565_s1 + $0x28] ss:$16 sps:$4 sm:$0xff]   ;;  %v5117_v32 = vld [vmem:[%s6565_s1 + $0x2c] ss:$16 sps:$4 sm:$0xff]  }
 0x499   :  { %4698 = vmatprep.subr.bf16.mxu0 %v5322_v0  ;;  %4718 = vmatprep.subr.bf16.mxu1 %v5322_v0 }
 0x49c   :  { %4699 = vmatpush3.bf16.msra.mxu0 %v5100_v33  ;;  %4719 = vmatpush3.bf16.msra.mxu1 %v5101_v34  ;;  %v5118_v33 = vld [vmem:[%s6565_s1 + $0x48] ss:$16 sps:$4 sm:$0xff]   ;;  %v5119_v34 = vld [vmem:[%s6565_s1 + $0x4c] ss:$16 sps:$4 sm:$0xff]  }
 0x49d   :  { %4700 = vmatprep.subr.bf16.mxu0 %v5322_v0  ;;  %4720 = vmatprep.subr.bf16.mxu1 %v5322_v0 }
 0x4a0   :  { %4701 = vmatpush3.bf16.msra.mxu0 %v5102_v35  ;;  %4721 = vmatpush3.bf16.msra.mxu1 %v5103_v36  ;;  %v5120_v35 = vld [vmem:[%s6565_s1 + $0x68] ss:$16 sps:$4 sm:$0xff]   ;;  %v5121_v36 = vld [vmem:[%s6565_s1 + $0x6c] ss:$16 sps:$4 sm:$0xff]  }
 0x4a1   :  { %4702 = vmatprep.subr.bf16.mxu0 %v5322_v0  ;;  %4722 = vmatprep.subr.bf16.mxu1 %v5322_v0 }
 0x4a4   :  { %4703 = vmatpush3.bf16.msra.mxu0 %v5104_v37  ;;  %4723 = vmatpush3.bf16.msra.mxu1 %v5105_v38  ;;  %v5122_v37 = vld [vmem:[%s6565_s1 + $0x88] ss:$16 sps:$4 sm:$0xff]   ;;  %v5123_v38 = vld [vmem:[%s6565_s1 + $0x8c] ss:$16 sps:$4 sm:$0xff]  }
 0x4a5   :  { %4704 = vmatprep.subr.bf16.mxu0 %v5322_v0  ;;  %4724 = vmatprep.subr.bf16.mxu1 %v5322_v0 }
 0x4a8   :  { %4705 = vmatpush3.bf16.msra.mxu0 %v5106_v39  ;;  %4725 = vmatpush3.bf16.msra.mxu1 %v5107_v40  ;;  %v5124_v39 = vld [vmem:[%s6565_s1 + $0xa8] ss:$16 sps:$4 sm:$0xff]   ;;  %v5125_v40 = vld [vmem:[%s6565_s1 + $0xac] ss:$16 sps:$4 sm:$0xff]  }
 0x4a9   :  { %4706 = vmatprep.subr.bf16.mxu0 %v5322_v0  ;;  %4726 = vmatprep.subr.bf16.mxu1 %v5322_v0 }
 0x4ac   :  { %4707 = vmatpush3.bf16.msra.mxu0 %v5108_v41  ;;  %4727 = vmatpush3.bf16.msra.mxu1 %v5109_v42  ;;  %v5126_v41 = vld [vmem:[%s6565_s1 + $0xc8] ss:$16 sps:$4 sm:$0xff]   ;;  %v5127_v42 = vld [vmem:[%s6565_s1 + $0xcc] ss:$16 sps:$4 sm:$0xff]  }
 0x4ad   :  { %4708 = vmatprep.subr.bf16.mxu0 %v5322_v0  ;;  %4728 = vmatprep.subr.bf16.mxu1 %v5322_v0 }
 0x4b0   :  { %4709 = vmatpush3.bf16.msra.mxu0 %v5110_v43  ;;  %4729 = vmatpush3.bf16.msra.mxu1 %v5111_v45  ;;  %v5128_v43 = vld [vmem:[%s6565_s1 + $0xe8] ss:$16 sps:$4 sm:$0xff]   ;;  %v5129_v45 = vld [vmem:[%s6565_s1 + $0xec] ss:$16 sps:$4 sm:$0xff]  }
 0x4b1   :  { %4710 = vmatprep.subr.bf16.mxu0 %v5322_v0  ;;  %4730 = vmatprep.subr.bf16.mxu1 %v5322_v0 }
 0x4b4   :  { %4711 = vmatpush3.bf16.msra.mxu0 %v5112_v46  ;;  %4731 = vmatpush3.bf16.msra.mxu1 %v5113_v47  ;;  %v5130_v46 = vld [vmem:[%s6565_s1] ss:$16 sps:$4 sm:$0xff]   ;;  %v5131_v47 = vld [vmem:[%s6565_s1 + $0x4] ss:$16 sps:$4 sm:$0xff]  }
 0x4b5   :  { %4736 = vmatprep.subr.bf16.mxu0 %v5322_v0  ;;  %4756 = vmatprep.subr.bf16.mxu1 %v5322_v0 }
 0x549   :  { %v1955_v48 = vpop.f32.mrb[32].mxu0  ;;  %v2068_v49 = vpop.f32.mrb[32].mxu1 }
 0x54a   :  { %v4634_v29 = vpop.f32.mrb[33].mxu0  ;;  %v4654_v51 = vpop.f32.mrb[33].mxu1  ;;  %v2074_v59 = vadd.f32 %v2068_v49, %v1969_v56  ;;  %v1961_v60 = vadd.f32 %v1955_v48, %v1856_v57  ;;  %v5132_v48 = vld [vmem:[%s6565_s1 + $0x20] ss:$16 sps:$4 sm:$0xff]   ;;  %v5133_v49 = vld [vmem:[%s6565_s1 + $0x24] ss:$16 sps:$4 sm:$0xff]  }
 0x54b   :  { %v1958_v52 = vpop.f32.mrb[34].mxu0  ;;  %v2071_v53 = vpop.f32.mrb[34].mxu1  ;;  %v5135_v29 = vld [vmem:[%s6565_s1 + $0x44] ss:$16 sps:$4 sm:$0xff]   ;;  %v5136_v51 = vld [vmem:[%s6565_s1 + $0x60] ss:$16 sps:$4 sm:$0xff]  }
 0x54c   :  { %v4635_v54 = vpop.f32.mrb[35].mxu0  ;;  %v4655_v55 = vpop.f32.mrb[35].mxu1  ;;  %v3867_v61 = vmul.f32 -1.442695, %v2074_v59  ;;  %v3857_v62 = vmul.f32 -1.442695, %v1961_v60 }
 0x54d   :  { %v5137_v52 = vld [vmem:[%s6565_s1 + $0x64] ss:$16 sps:$4 sm:$0xff]   ;;  %v5138_v53 = vld [vmem:[%s6565_s1 + $0x80] ss:$16 sps:$4 sm:$0xff]  }
 0x54e   :  { %5258 = vpow2.f32 %v3867_v61  ;;  %v5139_v54 = vld [vmem:[%s6565_s1 + $0x84] ss:$16 sps:$4 sm:$0xff]   ;;  %v5140_v55 = vld [vmem:[%s6565_s1 + $0xa0] ss:$16 sps:$4 sm:$0xff]  }
 0x54f   :  { %5260 = vpow2.f32 %v3857_v62  ;;  %v5141_v56 = vld [vmem:[%s6565_s1 + $0xa4] ss:$16 sps:$4 sm:$0xff]   ;;  %v5142_v57 = vld [vmem:[%s6565_s1 + $0xc0] ss:$16 sps:$4 sm:$0xff]  }
 0x550   :  { %v5143_v59 = vld [vmem:[%s6565_s1 + $0xc4] ss:$16 sps:$4 sm:$0xff]   ;;  %v5144_v60 = vld [vmem:[%s6565_s1 + $0xe0] ss:$16 sps:$4 sm:$0xff]  }
 0x551   :  { %v5145_v61 = vld [vmem:[%s6565_s1 + $0xe4] ss:$16 sps:$4 sm:$0xff]  }
 0x558   :  { %v5259_v63 = vpop.eup %5258 }
 0x559   :  { %v5261_v44 = vpop.eup %5260  ;;  %v2078_v2 = vadd.f32 1.0, %v5259_v63 }
 0x55a   :  { %v1965_v5 = vadd.f32 1.0, %v5261_v44 }
 0x55b   :  { %5262 = vrcp.f32 %v2078_v2 }
 0x55c   :  { %5264 = vrcp.f32 %v1965_v5 }
 0x565   :  { %v5263_v17 = vpop.eup %5262 }
 0x566   :  { %v5265_v18 = vpop.eup %5264  ;;  %v2302_v20 = vmul.f32 %v5263_v17, %v6027_v9 }
 0x569   :  { %v2181_v6 = vpop.f32.mrb[36].mxu0  ;;  %v2289_v7 = vpop.f32.mrb[36].mxu1 }
 0x56a   :  { %v2187_v8 = vadd.f32 %v2181_v6, %v2082_v3  ;;  %v2295_v10 = vadd.f32 %v2289_v7, %v2190_v4  ;;  %v4674_v11 = vpop.f32.mrb[37].mxu0  ;;  %v4694_v12 = vpop.f32.mrb[37].mxu1  ;;  %v2425_v7 = vunpack.c.h.bf16 %v3888_v1 }
 0x56b   :  { %v2184_v13 = vpop.f32.mrb[38].mxu0  ;;  %v2292_v14 = vpop.f32.mrb[38].mxu1 }
 0x56c   :  { %5266 = vtanh.f32 %v2187_v8  ;;  %v3886_v15 = vmul.f32 -1.442695, %v2295_v10  ;;  %v4675_v58 = vpop.f32.mrb[39].mxu0  ;;  %v4695_v16 = vpop.f32.mrb[39].mxu1  ;;  %v2312_v8 = vunpack.c.l.bf16 %v3888_v1  ;;  %v5166_v1 = vld [vmem:[%s6565_s1 + $0x40] ss:$16 sps:$4 sm:$0xff]  }
 0x56e   :  { %5268 = vpow2.f32 %v3886_v15  ;;  %v3908_v15 = vld [vmem:[%s6567_s0 + $0x58] sm:$0xff]  }
 0x56f   :  { %v2538_v17 = vunpack.c.l.bf16 %v3908_v15 }
 0x576   :  { %v5267_v19 = vpop.eup %5266 }
 0x577   :  { %v2303_v21 = vmul.f32 %v5267_v19, %v5265_v18  ;;  %v2646_v18 = vunpack.c.h.bf16 %v3908_v15  ;;  %v3928_v15 = vld [vmem:[%s6567_s0 + $0x60] sm:$0xff]  }
 0x578   :  { %v5269_v22 = vpop.eup %5268 }
 0x579   :  { %v6176_v23 = vadd.f32 %v2303_v21, %v2302_v20  ;;  %v2299_v24 = vadd.f32 1.0, %v5269_v22 }
 0x57b   :  { %5270 = vtanh.f32 %v6176_v23 }
 0x57c   :  { %5272 = vrcp.f32 %v2299_v24 }
 0x585   :  { %v5271_v25 = vpop.eup %5270 }
 0x586   :  { %v5273_v26 = vpop.eup %5272 }
 0x587   :  { %v2306_v27 = vmul.f32 %v5273_v26, %v5271_v25 }
 0x589   :  { %3887 = vst [vmem:[%s6569_s4 + $0x20] sm:$0xff] %v2306_v27  ;;  %v2309_v9 = vpack.c.bf16 %v2306_v27, %v2306_v27 }
 0x58b   :  { %4713 = vmatmul.mubr.bf16.vlgmr.msra.gmra.mrb[40].mxu0 %v2309_v9  ;;  %4733 = vmatmul.mubr.bf16.vlgmr.msra.gmra.mrb[40].mxu1 %v2309_v9 }
 0x58c   :  { %4737 = vmatpush3.bf16.msra.mxu0 %v5114_v28  ;;  %4757 = vmatpush3.bf16.msra.mxu1 %v5115_v30 }
 0x58d   :  { %4738 = vmatprep.subr.bf16.mxu0 %v5322_v0  ;;  %4758 = vmatprep.subr.bf16.mxu1 %v5322_v0 }
 0x58e   :  { %4752 = vmatprep.mubr.msk.bf16.mxu0 %vm5323_vm0, %v5322_v0  ;;  %4772 = vmatprep.mubr.msk.bf16.mxu1 %vm5323_vm0, %v5322_v0 }
 0x590   :  { %4739 = vmatpush3.bf16.msra.mxu0 %v5116_v31  ;;  %4759 = vmatpush3.bf16.msra.mxu1 %v5117_v32 }
 0x591   :  { %4740 = vmatprep.subr.bf16.mxu0 %v5322_v0  ;;  %4760 = vmatprep.subr.bf16.mxu1 %v5322_v0 }
 0x594   :  { %4741 = vmatpush3.bf16.msra.mxu0 %v5118_v33  ;;  %4761 = vmatpush3.bf16.msra.mxu1 %v5119_v34 }
 0x595   :  { %4742 = vmatprep.subr.bf16.mxu0 %v5322_v0  ;;  %4762 = vmatprep.subr.bf16.mxu1 %v5322_v0 }
 0x598   :  { %4743 = vmatpush3.bf16.msra.mxu0 %v5120_v35  ;;  %4763 = vmatpush3.bf16.msra.mxu1 %v5121_v36 }
 0x599   :  { %4744 = vmatprep.subr.bf16.mxu0 %v5322_v0  ;;  %4764 = vmatprep.subr.bf16.mxu1 %v5322_v0 }
 0x59c   :  { %4745 = vmatpush3.bf16.msra.mxu0 %v5122_v37  ;;  %4765 = vmatpush3.bf16.msra.mxu1 %v5123_v38 }
 0x59d   :  { %4746 = vmatprep.subr.bf16.mxu0 %v5322_v0  ;;  %4766 = vmatprep.subr.bf16.mxu1 %v5322_v0 }
 0x5a0   :  { %4747 = vmatpush3.bf16.msra.mxu0 %v5124_v39  ;;  %4767 = vmatpush3.bf16.msra.mxu1 %v5125_v40 }
 0x5a1   :  { %4748 = vmatprep.subr.bf16.mxu0 %v5322_v0  ;;  %4768 = vmatprep.subr.bf16.mxu1 %v5322_v0 }
 0x5a4   :  { %4749 = vmatpush3.bf16.msra.mxu0 %v5126_v41  ;;  %4769 = vmatpush3.bf16.msra.mxu1 %v5127_v42 }
 0x5a5   :  { %4750 = vmatprep.subr.bf16.mxu0 %v5322_v0  ;;  %4770 = vmatprep.subr.bf16.mxu1 %v5322_v0 }
 0x5a8   :  { %4751 = vmatpush3.bf16.msra.mxu0 %v5128_v43  ;;  %4771 = vmatpush3.bf16.msra.mxu1 %v5129_v45  ;;  %v5146_v43 = vld [vmem:[%s6565_s1 + $0x8] ss:$16 sps:$4 sm:$0xff]   ;;  %v5147_v45 = vld [vmem:[%s6565_s1 + $0xc] ss:$16 sps:$4 sm:$0xff]  }
 0x5a9   :  { %4776 = vmatprep.subr.bf16.mxu0 %v5322_v0  ;;  %4796 = vmatprep.subr.bf16.mxu1 %v5322_v0 }
 0x5ab   :  { %4753 = vmatmul.mubr.bf16.vlgmr.msra.gmra.mrb[44].mxu0 %v2309_v9  ;;  %4773 = vmatmul.mubr.bf16.vlgmr.msra.gmra.mrb[44].mxu1 %v2309_v9 }
 0x5ac   :  { %4792 = vmatprep.mubr.msk.bf16.mxu0 %vm5323_vm0, %v5322_v0  ;;  %4812 = vmatprep.mubr.msk.bf16.mxu1 %vm5323_vm0, %v5322_v0 }
 0x5ad   :  { %4777 = vmatpush3.bf16.msra.mxu0 %v5130_v46  ;;  %4797 = vmatpush3.bf16.msra.mxu1 %v5131_v47  ;;  %v5148_v46 = vld [vmem:[%s6565_s1 + $0x28] ss:$16 sps:$4 sm:$0xff]   ;;  %v5149_v47 = vld [vmem:[%s6565_s1 + $0x2c] ss:$16 sps:$4 sm:$0xff]  }
 0x5ae   :  { %4778 = vmatprep.subr.bf16.mxu0 %v5322_v0  ;;  %4798 = vmatprep.subr.bf16.mxu1 %v5322_v0 }
 0x5b1   :  { %4779 = vmatpush3.bf16.msra.mxu0 %v5132_v48  ;;  %4799 = vmatpush3.bf16.msra.mxu1 %v5133_v49  ;;  %v5150_v48 = vld [vmem:[%s6565_s1 + $0x48] ss:$16 sps:$4 sm:$0xff]   ;;  %v5151_v49 = vld [vmem:[%s6565_s1 + $0x4c] ss:$16 sps:$4 sm:$0xff]  }
 0x5b2   :  { %4780 = vmatprep.subr.bf16.mxu0 %v5322_v0  ;;  %4800 = vmatprep.subr.bf16.mxu1 %v5322_v0 }
 0x5b5   :  { %4781 = vmatpush3.bf16.msra.mxu0 %v5134_v50  ;;  %4801 = vmatpush3.bf16.msra.mxu1 %v5135_v29  ;;  %v5152_v50 = vld [vmem:[%s6565_s1 + $0x68] ss:$16 sps:$4 sm:$0xff]   ;;  %v5153_v29 = vld [vmem:[%s6565_s1 + $0x6c] ss:$16 sps:$4 sm:$0xff]  }
 0x5b6   :  { %4782 = vmatprep.subr.bf16.mxu0 %v5322_v0  ;;  %4802 = vmatprep.subr.bf16.mxu1 %v5322_v0 }
 0x5b9   :  { %4783 = vmatpush3.bf16.msra.mxu0 %v5136_v51  ;;  %4803 = vmatpush3.bf16.msra.mxu1 %v5137_v52  ;;  %v5154_v51 = vld [vmem:[%s6565_s1 + $0x88] ss:$16 sps:$4 sm:$0xff]   ;;  %v5155_v52 = vld [vmem:[%s6565_s1 + $0x8c] ss:$16 sps:$4 sm:$0xff]  }
 0x5ba   :  { %4784 = vmatprep.subr.bf16.mxu0 %v5322_v0  ;;  %4804 = vmatprep.subr.bf16.mxu1 %v5322_v0 }
 0x5bd   :  { %4785 = vmatpush3.bf16.msra.mxu0 %v5138_v53  ;;  %4805 = vmatpush3.bf16.msra.mxu1 %v5139_v54  ;;  %v5156_v53 = vld [vmem:[%s6565_s1 + $0xa8] ss:$16 sps:$4 sm:$0xff]   ;;  %v5157_v54 = vld [vmem:[%s6565_s1 + $0xac] ss:$16 sps:$4 sm:$0xff]  }
 0x5be   :  { %4786 = vmatprep.subr.bf16.mxu0 %v5322_v0  ;;  %4806 = vmatprep.subr.bf16.mxu1 %v5322_v0 }
 0x5c1   :  { %4787 = vmatpush3.bf16.msra.mxu0 %v5140_v55  ;;  %4807 = vmatpush3.bf16.msra.mxu1 %v5141_v56  ;;  %v5158_v55 = vld [vmem:[%s6565_s1 + $0xc8] ss:$16 sps:$4 sm:$0xff]   ;;  %v5159_v56 = vld [vmem:[%s6565_s1 + $0xcc] ss:$16 sps:$4 sm:$0xff]  }
 0x5c2   :  { %4788 = vmatprep.subr.bf16.mxu0 %v5322_v0  ;;  %4808 = vmatprep.subr.bf16.mxu1 %v5322_v0 }
 0x5c5   :  { %4789 = vmatpush3.bf16.msra.mxu0 %v5142_v57  ;;  %4809 = vmatpush3.bf16.msra.mxu1 %v5143_v59  ;;  %v5160_v57 = vld [vmem:[%s6565_s1 + $0xe8] ss:$16 sps:$4 sm:$0xff]   ;;  %v5161_v59 = vld [vmem:[%s6565_s1 + $0xec] ss:$16 sps:$4 sm:$0xff]  }
 0x5c6   :  { %4790 = vmatprep.subr.bf16.mxu0 %v5322_v0  ;;  %4810 = vmatprep.subr.bf16.mxu1 %v5322_v0 }
 0x5c9   :  { %4791 = vmatpush3.bf16.msra.mxu0 %v5144_v60  ;;  %4811 = vmatpush3.bf16.msra.mxu1 %v5145_v61  ;;  %v5162_v60 = vld [vmem:[%s6565_s1] ss:$16 sps:$4 sm:$0xff]   ;;  %v5163_v61 = vld [vmem:[%s6565_s1 + $0x4] ss:$16 sps:$4 sm:$0xff]  }
 0x5ca   :  { %4816 = vmatprep.subr.bf16.mxu0 %v5322_v0  ;;  %4836 = vmatprep.subr.bf16.mxu1 %v5322_v0 }
 0x65e   :  { %v2411_v62 = vpop.f32.mrb[40].mxu0  ;;  %v2524_v63 = vpop.f32.mrb[40].mxu1 }
 0x65f   :  { %v4714_v44 = vpop.f32.mrb[41].mxu0  ;;  %v4734_v2 = vpop.f32.mrb[41].mxu1  ;;  %v2530_v10 = vadd.f32 %v2524_v63, %v2425_v7  ;;  %v2417_v11 = vadd.f32 %v2411_v62, %v2312_v8  ;;  %v5164_v62 = vld [vmem:[%s6565_s1 + $0x20] ss:$16 sps:$4 sm:$0xff]   ;;  %v5165_v63 = vld [vmem:[%s6565_s1 + $0x24] ss:$16 sps:$4 sm:$0xff]  }
 0x660   :  { %v2414_v3 = vpop.f32.mrb[42].mxu0  ;;  %v2527_v4 = vpop.f32.mrb[42].mxu1  ;;  %v5167_v44 = vld [vmem:[%s6565_s1 + $0x44] ss:$16 sps:$4 sm:$0xff]   ;;  %v5168_v2 = vld [vmem:[%s6565_s1 + $0x60] ss:$16 sps:$4 sm:$0xff]  }
 0x661   :  { %v4715_v5 = vpop.f32.mrb[43].mxu0  ;;  %v4735_v6 = vpop.f32.mrb[43].mxu1  ;;  %v3907_v12 = vmul.f32 -1.442695, %v2530_v10  ;;  %v3897_v13 = vmul.f32 -1.442695, %v2417_v11 }
 0x662   :  { %v5169_v3 = vld [vmem:[%s6565_s1 + $0x64] ss:$16 sps:$4 sm:$0xff]   ;;  %v5170_v4 = vld [vmem:[%s6565_s1 + $0x80] ss:$16 sps:$4 sm:$0xff]  }
 0x663   :  { %5274 = vpow2.f32 %v3907_v12  ;;  %v5171_v5 = vld [vmem:[%s6565_s1 + $0x84] ss:$16 sps:$4 sm:$0xff]   ;;  %v5172_v6 = vld [vmem:[%s6565_s1 + $0xa0] ss:$16 sps:$4 sm:$0xff]  }
 0x664   :  { %5276 = vpow2.f32 %v3897_v13  ;;  %v5173_v7 = vld [vmem:[%s6565_s1 + $0xa4] ss:$16 sps:$4 sm:$0xff]   ;;  %v5174_v8 = vld [vmem:[%s6565_s1 + $0xc0] ss:$16 sps:$4 sm:$0xff]  }
 0x665   :  { %v5175_v10 = vld [vmem:[%s6565_s1 + $0xc4] ss:$16 sps:$4 sm:$0xff]   ;;  %v5176_v11 = vld [vmem:[%s6565_s1 + $0xe0] ss:$16 sps:$4 sm:$0xff]  }
 0x666   :  { %v5177_v12 = vld [vmem:[%s6565_s1 + $0xe4] ss:$16 sps:$4 sm:$0xff]  }
 0x66d   :  { %v5275_v14 = vpop.eup %5274 }
 0x66e   :  { %v5277_v58 = vpop.eup %5276  ;;  %v2534_v16 = vadd.f32 1.0, %v5275_v14 }
 0x66f   :  { %v2421_v19 = vadd.f32 1.0, %v5277_v58 }
 0x670   :  { %5278 = vrcp.f32 %v2534_v16 }
 0x671   :  { %5280 = vrcp.f32 %v2421_v19 }
 0x67a   :  { %v5279_v32 = vpop.eup %5278 }
 0x67b   :  { %v5281_v33 = vpop.eup %5280  ;;  %v2758_v35 = vmul.f32 %v5279_v32, %v6176_v23 }
 0x67e   :  { %v2637_v20 = vpop.f32.mrb[44].mxu0  ;;  %v2745_v21 = vpop.f32.mrb[44].mxu1 }
 0x67f   :  { %v2643_v22 = vadd.f32 %v2637_v20, %v2538_v17  ;;  %v2751_v24 = vadd.f32 %v2745_v21, %v2646_v18  ;;  %v4754_v25 = vpop.f32.mrb[45].mxu0  ;;  %v4774_v26 = vpop.f32.mrb[45].mxu1  ;;  %v2881_v21 = vunpack.c.h.bf16 %v3928_v15 }
 0x680   :  { %v2640_v27 = vpop.f32.mrb[46].mxu0  ;;  %v2748_v28 = vpop.f32.mrb[46].mxu1 }
 0x681   :  { %5282 = vtanh.f32 %v2643_v22  ;;  %v3926_v30 = vmul.f32 -1.442695, %v2751_v24  ;;  %v4755_v9 = vpop.f32.mrb[47].mxu0  ;;  %v4775_v31 = vpop.f32.mrb[47].mxu1  ;;  %v2768_v22 = vunpack.c.l.bf16 %v3928_v15 }
 0x683   :  { %5284 = vpow2.f32 %v3926_v30  ;;  %v3948_v30 = vld [vmem:[%s6567_s0 + $0x68] sm:$0xff]  }
 0x684   :  { %v2994_v32 = vunpack.c.l.bf16 %v3948_v30 }
 0x68b   :  { %v5283_v34 = vpop.eup %5282 }
 0x68c   :  { %v2759_v36 = vmul.f32 %v5283_v34, %v5281_v33  ;;  %v3102_v33 = vunpack.c.h.bf16 %v3948_v30 }
 0x68d   :  { %v5285_v37 = vpop.eup %5284 }
 0x68e   :  { %v6325_v38 = vadd.f32 %v2759_v36, %v2758_v35  ;;  %v2755_v39 = vadd.f32 1.0, %v5285_v37 }
 0x690   :  { %5286 = vtanh.f32 %v6325_v38 }
 0x691   :  { %5288 = vrcp.f32 %v2755_v39 }
 0x69a   :  { %v5287_v40 = vpop.eup %5286 }
 0x69b   :  { %v5289_v41 = vpop.eup %5288 }
 0x69c   :  { %v2762_v42 = vmul.f32 %v5289_v41, %v5287_v40 }
 0x69e   :  { %3927 = vst [vmem:[%s6569_s4 + $0x28] sm:$0xff] %v2762_v42  ;;  %v2765_v23 = vpack.c.bf16 %v2762_v42, %v2762_v42 }
 0x6a0   :  { %4793 = vmatmul.mubr.bf16.vlgmr.msra.gmra.mrb[48].mxu0 %v2765_v23  ;;  %4813 = vmatmul.mubr.bf16.vlgmr.msra.gmra.mrb[48].mxu1 %v2765_v23 }
 0x6a1   :  { %4817 = vmatpush3.bf16.msra.mxu0 %v5146_v43  ;;  %4837 = vmatpush3.bf16.msra.mxu1 %v5147_v45 }
 0x6a2   :  { %4818 = vmatprep.subr.bf16.mxu0 %v5322_v0  ;;  %4838 = vmatprep.subr.bf16.mxu1 %v5322_v0 }
 0x6a3   :  { %4832 = vmatprep.mubr.msk.bf16.mxu0 %vm5323_vm0, %v5322_v0  ;;  %4852 = vmatprep.mubr.msk.bf16.mxu1 %vm5323_vm0, %v5322_v0 }
 0x6a5   :  { %4819 = vmatpush3.bf16.msra.mxu0 %v5148_v46  ;;  %4839 = vmatpush3.bf16.msra.mxu1 %v5149_v47 }
 0x6a6   :  { %4820 = vmatprep.subr.bf16.mxu0 %v5322_v0  ;;  %4840 = vmatprep.subr.bf16.mxu1 %v5322_v0 }
 0x6a9   :  { %4821 = vmatpush3.bf16.msra.mxu0 %v5150_v48  ;;  %4841 = vmatpush3.bf16.msra.mxu1 %v5151_v49 }
 0x6aa   :  { %4822 = vmatprep.subr.bf16.mxu0 %v5322_v0  ;;  %4842 = vmatprep.subr.bf16.mxu1 %v5322_v0 }
 0x6ad   :  { %4823 = vmatpush3.bf16.msra.mxu0 %v5152_v50  ;;  %4843 = vmatpush3.bf16.msra.mxu1 %v5153_v29 }
 0x6ae   :  { %4824 = vmatprep.subr.bf16.mxu0 %v5322_v0  ;;  %4844 = vmatprep.subr.bf16.mxu1 %v5322_v0 }
 0x6b1   :  { %4825 = vmatpush3.bf16.msra.mxu0 %v5154_v51  ;;  %4845 = vmatpush3.bf16.msra.mxu1 %v5155_v52 }
 0x6b2   :  { %4826 = vmatprep.subr.bf16.mxu0 %v5322_v0  ;;  %4846 = vmatprep.subr.bf16.mxu1 %v5322_v0 }
 0x6b5   :  { %4827 = vmatpush3.bf16.msra.mxu0 %v5156_v53  ;;  %4847 = vmatpush3.bf16.msra.mxu1 %v5157_v54 }
 0x6b6   :  { %4828 = vmatprep.subr.bf16.mxu0 %v5322_v0  ;;  %4848 = vmatprep.subr.bf16.mxu1 %v5322_v0 }
 0x6b9   :  { %4829 = vmatpush3.bf16.msra.mxu0 %v5158_v55  ;;  %4849 = vmatpush3.bf16.msra.mxu1 %v5159_v56 }
 0x6ba   :  { %4830 = vmatprep.subr.bf16.mxu0 %v5322_v0  ;;  %4850 = vmatprep.subr.bf16.mxu1 %v5322_v0 }
 0x6bd   :  { %4831 = vmatpush3.bf16.msra.mxu0 %v5160_v57  ;;  %4851 = vmatpush3.bf16.msra.mxu1 %v5161_v59  ;;  %v5178_v57 = vld [vmem:[%s6565_s1 + $0x8] ss:$16 sps:$4 sm:$0xff]   ;;  %v5179_v59 = vld [vmem:[%s6565_s1 + $0xc] ss:$16 sps:$4 sm:$0xff]  }
 0x6be   :  { %4856 = vmatprep.subr.bf16.mxu0 %v5322_v0  ;;  %4876 = vmatprep.subr.bf16.mxu1 %v5322_v0 }
 0x6c0   :  { %4833 = vmatmul.mubr.bf16.vlgmr.msra.gmra.mrb[52].mxu0 %v2765_v23  ;;  %4853 = vmatmul.mubr.bf16.vlgmr.msra.gmra.mrb[52].mxu1 %v2765_v23 }
 0x6c1   :  { %4872 = vmatprep.mubr.msk.bf16.mxu0 %vm5323_vm0, %v5322_v0  ;;  %4892 = vmatprep.mubr.msk.bf16.mxu1 %vm5323_vm0, %v5322_v0 }
 0x6c2   :  { %4857 = vmatpush3.bf16.msra.mxu0 %v5162_v60  ;;  %4877 = vmatpush3.bf16.msra.mxu1 %v5163_v61  ;;  %v5180_v60 = vld [vmem:[%s6565_s1 + $0x28] ss:$16 sps:$4 sm:$0xff]   ;;  %v5181_v61 = vld [vmem:[%s6565_s1 + $0x2c] ss:$16 sps:$4 sm:$0xff]  }
 0x6c3   :  { %4858 = vmatprep.subr.bf16.mxu0 %v5322_v0  ;;  %4878 = vmatprep.subr.bf16.mxu1 %v5322_v0 }
 0x6c6   :  { %4859 = vmatpush3.bf16.msra.mxu0 %v5164_v62  ;;  %4879 = vmatpush3.bf16.msra.mxu1 %v5165_v63  ;;  %v5182_v62 = vld [vmem:[%s6565_s1 + $0x48] ss:$16 sps:$4 sm:$0xff]   ;;  %v5183_v63 = vld [vmem:[%s6565_s1 + $0x4c] ss:$16 sps:$4 sm:$0xff]  }
 0x6c7   :  { %4860 = vmatprep.subr.bf16.mxu0 %v5322_v0  ;;  %4880 = vmatprep.subr.bf16.mxu1 %v5322_v0 }
 0x6ca   :  { %4861 = vmatpush3.bf16.msra.mxu0 %v5166_v1  ;;  %4881 = vmatpush3.bf16.msra.mxu1 %v5167_v44  ;;  %v5184_v1 = vld [vmem:[%s6565_s1 + $0x68] ss:$16 sps:$4 sm:$0xff]   ;;  %v5185_v44 = vld [vmem:[%s6565_s1 + $0x6c] ss:$16 sps:$4 sm:$0xff]  }
 0x6cb   :  { %4862 = vmatprep.subr.bf16.mxu0 %v5322_v0  ;;  %4882 = vmatprep.subr.bf16.mxu1 %v5322_v0 }
 0x6ce   :  { %4863 = vmatpush3.bf16.msra.mxu0 %v5168_v2  ;;  %4883 = vmatpush3.bf16.msra.mxu1 %v5169_v3  ;;  %v5186_v2 = vld [vmem:[%s6565_s1 + $0x88] ss:$16 sps:$4 sm:$0xff]   ;;  %v5187_v3 = vld [vmem:[%s6565_s1 + $0x8c] ss:$16 sps:$4 sm:$0xff]  }
 0x6cf   :  { %4864 = vmatprep.subr.bf16.mxu0 %v5322_v0  ;;  %4884 = vmatprep.subr.bf16.mxu1 %v5322_v0 }
 0x6d2   :  { %4865 = vmatpush3.bf16.msra.mxu0 %v5170_v4  ;;  %4885 = vmatpush3.bf16.msra.mxu1 %v5171_v5  ;;  %v5188_v4 = vld [vmem:[%s6565_s1 + $0xa8] ss:$16 sps:$4 sm:$0xff]   ;;  %v5189_v5 = vld [vmem:[%s6565_s1 + $0xac] ss:$16 sps:$4 sm:$0xff]  }
 0x6d3   :  { %4866 = vmatprep.subr.bf16.mxu0 %v5322_v0  ;;  %4886 = vmatprep.subr.bf16.mxu1 %v5322_v0 }
 0x6d6   :  { %4867 = vmatpush3.bf16.msra.mxu0 %v5172_v6  ;;  %4887 = vmatpush3.bf16.msra.mxu1 %v5173_v7  ;;  %v5190_v6 = vld [vmem:[%s6565_s1 + $0xc8] ss:$16 sps:$4 sm:$0xff]   ;;  %v5191_v7 = vld [vmem:[%s6565_s1 + $0xcc] ss:$16 sps:$4 sm:$0xff]  }
 0x6d7   :  { %4868 = vmatprep.subr.bf16.mxu0 %v5322_v0  ;;  %4888 = vmatprep.subr.bf16.mxu1 %v5322_v0 }
 0x6da   :  { %4869 = vmatpush3.bf16.msra.mxu0 %v5174_v8  ;;  %4889 = vmatpush3.bf16.msra.mxu1 %v5175_v10  ;;  %v5192_v8 = vld [vmem:[%s6565_s1 + $0xe8] ss:$16 sps:$4 sm:$0xff]   ;;  %v5193_v10 = vld [vmem:[%s6565_s1 + $0xec] ss:$16 sps:$4 sm:$0xff]  }
 0x6db   :  { %4870 = vmatprep.subr.bf16.mxu0 %v5322_v0  ;;  %4890 = vmatprep.subr.bf16.mxu1 %v5322_v0 }
 0x6de   :  { %4871 = vmatpush3.bf16.msra.mxu0 %v5176_v11  ;;  %4891 = vmatpush3.bf16.msra.mxu1 %v5177_v12 }
 0x6df   :  { %4896 = vmatprep.subr.bf16.mxu0 %v5322_v0  ;;  %4916 = vmatprep.subr.bf16.mxu1 %v5322_v0 }
 0x773   :  { %v2867_v13 = vpop.f32.mrb[48].mxu0  ;;  %v2980_v14 = vpop.f32.mrb[48].mxu1 }
 0x774   :  { %v4794_v58 = vpop.f32.mrb[49].mxu0  ;;  %v4814_v16 = vpop.f32.mrb[49].mxu1  ;;  %v2986_v24 = vadd.f32 %v2980_v14, %v2881_v21  ;;  %v2873_v25 = vadd.f32 %v2867_v13, %v2768_v22  ;;  %v3968_v13 = vld [vmem:[%s6567_s0 + $0x70] sm:$0xff]  }
 0x775   :  { %v2870_v17 = vpop.f32.mrb[50].mxu0  ;;  %v2983_v18 = vpop.f32.mrb[50].mxu1 }
 0x776   :  { %v4795_v19 = vpop.f32.mrb[51].mxu0  ;;  %v4815_v20 = vpop.f32.mrb[51].mxu1  ;;  %v3947_v26 = vmul.f32 -1.442695, %v2986_v24  ;;  %v3937_v27 = vmul.f32 -1.442695, %v2873_v25 }
 0x777   :  { %v3337_v19 = vunpack.c.h.bf16 %v3968_v13  ;;  %v3224_v20 = vunpack.c.l.bf16 %v3968_v13 }
 0x778   :  { %5290 = vpow2.f32 %v3947_v26  ;;  %v3988_v26 = vld [vmem:[%s6567_s0 + $0x78] sm:$0xf] }
 0x779   :  { %5292 = vpow2.f32 %v3937_v27  ;;  %v3997_v27 = vld [vmem:[%s6567_s0 + $0x7c] sm:$0xf] }
 0x782   :  { %v5291_v28 = vpop.eup %5290 }
 0x783   :  { %v5293_v9 = vpop.eup %5292  ;;  %v2990_v31 = vadd.f32 1.0, %v5291_v28 }
 0x784   :  { %v2877_v34 = vadd.f32 1.0, %v5293_v9  ;;  %v3450_v9 = vunpack.c.l.bf16 %v3988_v26 }
 0x785   :  { %5294 = vrcp.f32 %v2990_v31  ;;  %v3558_v31 = vunpack.c.l.bf16 %v3997_v27 }
 0x786   :  { %5296 = vrcp.f32 %v2877_v34 }
 0x78f   :  { %v5295_v47 = vpop.eup %5294 }
 0x790   :  { %v5297_v48 = vpop.eup %5296  ;;  %v3214_v50 = vmul.f32 %v5295_v47, %v6325_v38 }
 0x793   :  { %v3093_v35 = vpop.f32.mrb[52].mxu0  ;;  %v3201_v36 = vpop.f32.mrb[52].mxu1 }
 0x794   :  { %v3099_v37 = vadd.f32 %v3093_v35, %v2994_v32  ;;  %v3207_v39 = vadd.f32 %v3201_v36, %v3102_v33  ;;  %v4834_v40 = vpop.f32.mrb[53].mxu0  ;;  %v4854_v41 = vpop.f32.mrb[53].mxu1 }
 0x795   :  { %v3096_v42 = vpop.f32.mrb[54].mxu0  ;;  %v3204_v43 = vpop.f32.mrb[54].mxu1 }
 0x796   :  { %5298 = vtanh.f32 %v3099_v37  ;;  %v3966_v45 = vmul.f32 -1.442695, %v3207_v39  ;;  %v4835_v23 = vpop.f32.mrb[55].mxu0  ;;  %v4855_v46 = vpop.f32.mrb[55].mxu1 }
 0x798   :  { %5300 = vpow2.f32 %v3966_v45 }
 0x7a0   :  { %v5299_v49 = vpop.eup %5298 }
 0x7a1   :  { %v3215_v29 = vmul.f32 %v5299_v49, %v5297_v48 }
 0x7a2   :  { %v5301_v51 = vpop.eup %5300 }
 0x7a3   :  { %v6474_v52 = vadd.f32 %v3215_v29, %v3214_v50  ;;  %v3211_v53 = vadd.f32 1.0, %v5301_v51 }
 0x7a5   :  { %5302 = vtanh.f32 %v6474_v52 }
 0x7a6   :  { %5304 = vrcp.f32 %v3211_v53 }
 0x7af   :  { %v5303_v54 = vpop.eup %5302 }
 0x7b0   :  { %v5305_v55 = vpop.eup %5304 }
 0x7b1   :  { %v3218_v56 = vmul.f32 %v5305_v55, %v5303_v54 }
 0x7b3   :  { %3967 = vst [vmem:[%s6569_s4 + $0x30] sm:$0xff] %v3218_v56  ;;  %v3221_v38 = vpack.c.bf16 %v3218_v56, %v3218_v56 }
 0x7b5   :  { %4873 = vmatmul.mubr.bf16.vlgmr.msra.gmra.mrb[56].mxu0 %v3221_v38  ;;  %4893 = vmatmul.mubr.bf16.vlgmr.msra.gmra.mrb[56].mxu1 %v3221_v38 }
 0x7b6   :  { %4897 = vmatpush3.bf16.msra.mxu0 %v5178_v57  ;;  %4917 = vmatpush3.bf16.msra.mxu1 %v5179_v59 }
 0x7b7   :  { %4898 = vmatprep.subr.bf16.mxu0 %v5322_v0  ;;  %4918 = vmatprep.subr.bf16.mxu1 %v5322_v0 }
 0x7b8   :  { %4912 = vmatprep.mubr.msk.bf16.mxu0 %vm5323_vm0, %v5322_v0  ;;  %4932 = vmatprep.mubr.msk.bf16.mxu1 %vm5323_vm0, %v5322_v0 }
 0x7ba   :  { %4899 = vmatpush3.bf16.msra.mxu0 %v5180_v60  ;;  %4919 = vmatpush3.bf16.msra.mxu1 %v5181_v61 }
 0x7bb   :  { %4900 = vmatprep.subr.bf16.mxu0 %v5322_v0  ;;  %4920 = vmatprep.subr.bf16.mxu1 %v5322_v0 }
 0x7be   :  { %4901 = vmatpush3.bf16.msra.mxu0 %v5182_v62  ;;  %4921 = vmatpush3.bf16.msra.mxu1 %v5183_v63 }
 0x7bf   :  { %4902 = vmatprep.subr.bf16.mxu0 %v5322_v0  ;;  %4922 = vmatprep.subr.bf16.mxu1 %v5322_v0 }
 0x7c2   :  { %4903 = vmatpush3.bf16.msra.mxu0 %v5184_v1  ;;  %4923 = vmatpush3.bf16.msra.mxu1 %v5185_v44 }
 0x7c3   :  { %4904 = vmatprep.subr.bf16.mxu0 %v5322_v0  ;;  %4924 = vmatprep.subr.bf16.mxu1 %v5322_v0 }
 0x7c6   :  { %4905 = vmatpush3.bf16.msra.mxu0 %v5186_v2  ;;  %4925 = vmatpush3.bf16.msra.mxu1 %v5187_v3 }
 0x7c7   :  { %4906 = vmatprep.subr.bf16.mxu0 %v5322_v0  ;;  %4926 = vmatprep.subr.bf16.mxu1 %v5322_v0 }
 0x7ca   :  { %4907 = vmatpush3.bf16.msra.mxu0 %v5188_v4  ;;  %4927 = vmatpush3.bf16.msra.mxu1 %v5189_v5 }
 0x7cb   :  { %4908 = vmatprep.subr.bf16.mxu0 %v5322_v0  ;;  %4928 = vmatprep.subr.bf16.mxu1 %v5322_v0 }
 0x7ce   :  { %4909 = vmatpush3.bf16.msra.mxu0 %v5190_v6  ;;  %4929 = vmatpush3.bf16.msra.mxu1 %v5191_v7 }
 0x7cf   :  { %4910 = vmatprep.subr.bf16.mxu0 %v5322_v0  ;;  %4930 = vmatprep.subr.bf16.mxu1 %v5322_v0 }
 0x7d2   :  { %4911 = vmatpush3.bf16.msra.mxu0 %v5192_v8  ;;  %4931 = vmatpush3.bf16.msra.mxu1 %v5193_v10 }
 0x7d5   :  { %4913 = vmatmul.mubr.bf16.vlgmr.msra.gmra.mrb[60].mxu0 %v3221_v38  ;;  %4933 = vmatmul.mubr.bf16.vlgmr.msra.gmra.mrb[60].mxu1 %v3221_v38 }
 0x888   :  { %v3323_v11 = vpop.f32.mrb[56].mxu0  ;;  %v3436_v12 = vpop.f32.mrb[56].mxu1 }
 0x889   :  { %v4874_v14 = vpop.f32.mrb[57].mxu0  ;;  %v4894_v15 = vpop.f32.mrb[57].mxu1  ;;  %v3442_v21 = vadd.f32 %v3436_v12, %v3337_v19  ;;  %v3329_v0 = vadd.f32 %v3323_v11, %v3224_v20 }
 0x88a   :  { %v3326_v58 = vpop.f32.mrb[58].mxu0  ;;  %v3439_v16 = vpop.f32.mrb[58].mxu1 }
 0x88b   :  { %v4875_v17 = vpop.f32.mrb[59].mxu0  ;;  %v4895_v18 = vpop.f32.mrb[59].mxu1  ;;  %v3987_v22 = vmul.f32 -1.442695, %v3442_v21  ;;  %v3977_v24 = vmul.f32 -1.442695, %v3329_v0 }
 0x88d   :  { %5306 = vpow2.f32 %v3987_v22 }
 0x88e   :  { %5308 = vpow2.f32 %v3977_v24 }
 0x897   :  { %v5307_v25 = vpop.eup %5306 }
 0x898   :  { %v5309_v28 = vpop.eup %5308  ;;  %v3446_v30 = vadd.f32 1.0, %v5307_v25 }
 0x899   :  { %v3333_v32 = vadd.f32 1.0, %v5309_v28 }
 0x89a   :  { %5310 = vrcp.f32 %v3446_v30 }
 0x89b   :  { %5312 = vrcp.f32 %v3333_v32 }
 0x8a4   :  { %v5311_v23 = vpop.eup %5310 }
 0x8a5   :  { %v5313_v46 = vpop.eup %5312  ;;  %v3670_v48 = vmul.f32 %v5311_v23, %v6474_v52 }
 0x8a8   :  { %v3549_v33 = vpop.f32.mrb[60].mxu0  ;;  %v3657_v34 = vpop.f32.mrb[60].mxu1 }
 0x8a9   :  { %v3555_v35 = vadd.f32 %v3549_v33, %v3450_v9  ;;  %v3663_v36 = vadd.f32 %v3657_v34, %v3558_v31  ;;  %v4914_v37 = vpop.f32.mrb[61].mxu0  ;;  %v4934_v39 = vpop.f32.mrb[61].mxu1 }
 0x8aa   :  { %v3552_v40 = vpop.f32.mrb[62].mxu0  ;;  %v3660_v41 = vpop.f32.mrb[62].mxu1 }
 0x8ab   :  { %5314 = vtanh.f32 %v3555_v35  ;;  %v4006_v42 = vmul.f32 -1.442695, %v3663_v36  ;;  %v4915_v43 = vpop.f32.mrb[63].mxu0  ;;  %v4935_v45 = vpop.f32.mrb[63].mxu1 }
 0x8ad   :  { %5316 = vpow2.f32 %v4006_v42 }
 0x8b5   :  { %v5315_v47 = vpop.eup %5314 }
 0x8b6   :  { %v3671_v49 = vmul.f32 %v5315_v47, %v5313_v46 }
 0x8b7   :  { %v5317_v50 = vpop.eup %5316 }
 0x8b8   :  { %v3672_v29 = vadd.f32 %v3671_v49, %v3670_v48  ;;  %v3667_v51 = vadd.f32 1.0, %v5317_v50 }
 0x8ba   :  { %5318 = vtanh.f32 %v3672_v29  ;;  %3680 = vst [vmem:[%s6570_s6] sm:$0xff] %v3672_v29 }
 0x8bb   :  { %5320 = vrcp.f32 %v3667_v51 }
 0x8c4   :  { %v5319_v53 = vpop.eup %5318 }
 0x8c5   :  { %v5321_v54 = vpop.eup %5320 }
 0x8c6   :  { %v3674_v55 = vmul.f32 %v5321_v54, %v5319_v53 }
 0x8c8   :  { %4007 = vst [vmem:[%s6569_s4 + $0x38] sm:$0xff] %v3674_v55  ;;  %3679 = vst [vmem:[%s6571_s5] sm:$0xff] %v3674_v55 }

</bundles_post_ra>
